<compile_context>
chip_gen: v7x
topology: tpu7x:2x2x1
jax: 0.10.0
libtpu: 0.0.40
codegen_flags: <defaults>
</compile_context>

<pallas_src>
import functools

import jax
import jax.numpy as jnp
from jax.experimental import pallas as pl
from jax.experimental.pallas import tpu as pltpu


# (dy, dx) input-shift order == (py, px) phase order used for all packing.
_SHIFTS = ((0, 0), (0, 1), (1, 0), (1, 1))

# Polyphase tap map of the stride-2, pad-1, 3x3 transposed conv:
#   out1[2a+py, 2b+px] = sum over ((dy,dx),(kh,kw)) of x[a+dy, b+dx] @ wflip[kh,kw]
_DECONV_TAPS = {
    (0, 0): (((0, 0), (1, 1)),),
    (0, 1): (((0, 0), (1, 0)), ((0, 1), (1, 2))),
    (1, 0): (((0, 0), (0, 1)), ((1, 0), (2, 1))),
    (1, 1): (((0, 0), (0, 0)), ((0, 1), (0, 2)),
             ((1, 0), (2, 0)), ((1, 1), (2, 2))),
}

# Second (stride-1 SAME) 3x3 conv, per output row/col parity:
# conv tap u (or v) reads deconv phase q at spatial offset `off` into the
# 1-halo-padded phase buffer:  _CONV_TAP_MAP[parity][u] == (q, off)
_CONV_TAP_MAP = {
    0: ((1, 0), (0, 1), (1, 1)),
    1: ((0, 1), (1, 1), (0, 2)),
}


def _fused_upsample_kernel(xe_ref, wd_ref, bd_ref, wc_ref, bc_ref, o_ref,
                           mid_ref, *, hi, wi, op_h, op_w):
    # xe_ref : (1, hi+1, wi+1, C)  bf16  input, zero-padded by 1 bottom/right
    # wd_ref : (4, C, 4C)          bf16  packed deconv weight: index = input
    #                                    shift (dy,dx); columns = 4 phases
    # bd_ref : (1, 4C)             f32   deconv bias, tiled per phase
    # wc_ref : (9, 4C, 4C2)        bf16  packed conv weight: index = spatial
    #                                    shift (ro,co); rows = 4 mid phases,
    #                                    columns = 4 output parities
    # bc_ref : (1, 4C2)            f32   conv bias, tiled per parity
    # o_ref  : (1, hi, wi, 4C2)          phase-packed final output
    # mid_ref: (hi+2, wi+2, 4C)    bf16  scratch: phase-packed relu(deconv)
    #                                    with a 1-pixel zero halo
    c = xe_ref.shape[-1]
    c4 = mid_ref.shape[-1]
    n_out = o_ref.shape[-1]
    f32 = jnp.float32
    mdt = mid_ref.dtype

    # ---- stage 1: polyphase transposed conv + bias + ReLU, phase-packed ----
    xe = xe_ref[0]                                          # (hi+1, wi+1, C)
    acc = None
    for si, (dy, dx) in enumerate(_SHIFTS):
        view = xe[dy:dy + hi, dx:dx + wi, :].reshape(hi * wi, c)
        d = jnp.dot(view, wd_ref[si], preferred_element_type=f32)
        acc = d if acc is None else acc + d
    m = jnp.maximum(acc + bd_ref[...], 0.0)                 # (hi*wi, 4C) f32

    # Mask the invalid odd-phase tail row/col when output_padding == 0, so the
    # second conv's SAME padding still sees zeros there.
    if op_h == 0 or op_w == 0:
        pix = jax.lax.broadcasted_iota(jnp.int32, (hi * wi, c4), 0)
        lane = jax.lax.broadcasted_iota(jnp.int32, (hi * wi, c4), 1)
        phase = lane // c                                   # 0..3 == (py, px)
        keep = None
        if op_h == 0:
            keep = ~((phase >= 2) & (pix // wi == hi - 1))
        if op_w == 0:
            kcol = ~((phase % 2 == 1) & (pix % wi == wi - 1))
            keep = kcol if keep is None else keep & kcol
        m = jnp.where(keep, m, 0.0)

    # Zero only the 1-pixel halo strips (the interior is fully overwritten).
    zrow = jnp.zeros((1, wi + 2, c4), mdt)
    zcol = jnp.zeros((hi + 2, 1, c4), mdt)
    mid_ref[0:1, :, :] = zrow
    mid_ref[hi + 1:hi + 2, :, :] = zrow
    mid_ref[:, 0:1, :] = zcol
    mid_ref[:, wi + 1:wi + 2, :] = zcol
    mid_ref[1:1 + hi, 1:1 + wi, :] = m.reshape(hi, wi, c4).astype(mdt)

    # ---- stage 2: 3x3 SAME conv + bias + ReLU, parity-packed output --------
    acc2 = None
    idx = 0
    for ro in range(3):
        for co in range(3):
            view = mid_ref[ro:ro + hi, co:co + wi, :].reshape(hi * wi, c4)
            d = jnp.dot(view, wc_ref[idx], preferred_element_type=f32)
            acc2 = d if acc2 is None else acc2 + d
            idx += 1
    out = jnp.maximum(acc2 + bc_ref[...], 0.0)              # (hi*wi, 4C2)
    o_ref[0] = out.reshape(hi, wi, n_out).astype(o_ref.dtype)


def prepare_params(params, *, mxu_dtype=jnp.bfloat16):
    """One-time conversion of PyTorch-layout weights into kernel-ready packed form."""
    wd = params["deconv_w"]          # ConvTranspose2d: (Cin, Cout=Cin, 3, 3)
    wc = params["conv_w"]            # Conv2d:          (Cout2, Cin, 3, 3)
    c = wd.shape[0]
    c2 = wc.shape[0]

    # Equivalent stride-1 conv weight of the transposed conv (flipped, HWIO).
    wflip = jnp.transpose(wd[:, :, ::-1, ::-1], (2, 3, 0, 1)).astype(jnp.float32)
    wc_hwio = jnp.transpose(wc, (2, 3, 1, 0)).astype(jnp.float32)

    # Stage-1 block weight: wd_packed[shift] has the 4 deconv phases packed
    # along its columns (zero blocks where a shift does not feed a phase).
    wd_packed = jnp.zeros((4, c, 4 * c), jnp.float32)
    for pi, phase in enumerate(_SHIFTS):
        for (dy, dx), (kh, kw) in _DECONV_TAPS[phase]:
            si = _SHIFTS.index((dy, dx))
            wd_packed = wd_packed.at[si, :, pi * c:(pi + 1) * c].set(wflip[kh, kw])

    # Stage-2 block weight: wc_packed[ro*3+co] maps the 4 packed mid phases
    # to the 4 packed output parities for the spatial shift (ro, co).
    wc_packed = jnp.zeros((9, 4 * c, 4 * c2), jnp.float32)
    for ri, (ry, rx) in enumerate(_SHIFTS):
        row_u = {qo: u for u, qo in enumerate(_CONV_TAP_MAP[ry])}
        col_v = {qo: v for v, qo in enumerate(_CONV_TAP_MAP[rx])}
        for ro in range(3):
            for co in range(3):
                for pi, (py, px) in enumerate(_SHIFTS):
                    u = row_u.get((py, ro))
                    v = col_v.get((px, co))
                    if u is None or v is None:
                        continue
                    wc_packed = wc_packed.at[
                        ro * 3 + co, pi * c:(pi + 1) * c,
                        ri * c2:(ri + 1) * c2].set(wc_hwio[u, v])

    return {
        "wd": wd_packed.astype(mxu_dtype),
        "bd": jnp.tile(params["deconv_b"].astype(jnp.float32), 4).reshape(1, 4 * c),
        "wc": wc_packed.astype(mxu_dtype),
        "bc": jnp.tile(params["conv_b"].astype(jnp.float32), 4).reshape(1, 4 * c2),
    }


def upsample_forward(prepped, x_nchw, output_size, *, mxu_dtype=jnp.bfloat16):
    """UpSample.forward: relu(deconv(x, output_size)) -> relu(conv(.)). NCHW io."""
    k, stride, pad = 3, 2, 1
    out_h, out_w = output_size

    x = jnp.transpose(x_nchw, (0, 2, 3, 1))                 # NCHW -> NHWC
    b, hi, wi, c = x.shape
    c2 = prepped["wc"].shape[-1] // 4

    op_h = out_h - ((hi - 1) * stride - 2 * pad + k)
    op_w = out_w - ((wi - 1) * stride - 2 * pad + k)
    assert 0 <= op_h < stride and 0 <= op_w < stride, "invalid output_size"

    # One zero row/col at bottom/right feeds the x[a+1]/x[b+1] polyphase taps.
    xe = jnp.pad(x, ((0, 0), (0, 1), (0, 1), (0, 0))).astype(mxu_dtype)

    kernel = functools.partial(_fused_upsample_kernel,
                               hi=hi, wi=wi, op_h=op_h, op_w=op_w)

    flops = 2 * b * hi * wi * (4 * c * 4 * c + 9 * 4 * c * 4 * c2)
    bytes_accessed = (xe.size * xe.dtype.itemsize
                      + prepped["wd"].size * prepped["wd"].dtype.itemsize
                      + prepped["wc"].size * prepped["wc"].dtype.itemsize
                      + b * hi * wi * 4 * c2 * x.dtype.itemsize)

    packed = pl.pallas_call(
        kernel,
        out_shape=jax.ShapeDtypeStruct((b, hi, wi, 4 * c2), x.dtype),
        grid=(b,),
        in_specs=[
            pl.BlockSpec((1, hi + 1, wi + 1, c), lambda i: (i, 0, 0, 0)),
            pl.BlockSpec((4, c, 4 * c), lambda i: (0, 0, 0)),
            pl.BlockSpec((1, 4 * c), lambda i: (0, 0)),
            pl.BlockSpec((9, 4 * c, 4 * c2), lambda i: (0, 0, 0)),
            pl.BlockSpec((1, 4 * c2), lambda i: (0, 0)),
        ],
        out_specs=pl.BlockSpec((1, hi, wi, 4 * c2), lambda i: (i, 0, 0, 0)),
        scratch_shapes=[pltpu.VMEM((hi + 2, wi + 2, 4 * c), mxu_dtype)],
        compiler_params=pltpu.CompilerParams(
            dimension_semantics=("parallel",)),
        cost_estimate=pl.CostEstimate(flops=flops, transcendentals=0,
                                      bytes_accessed=bytes_accessed),
    )(xe, prepped["wd"], prepped["bd"], prepped["wc"], prepped["bc"])

    # Interleave the packed output parities (pure layout plumbing) and crop.
    out = packed.reshape(b, hi, wi, 2, 2, c2)               # (B,a,b,ry,rx,C2)
    out = jnp.transpose(out, (0, 5, 1, 3, 2, 4)).reshape(b, c2, 2 * hi, 2 * wi)
    return out[:, :, :out_h, :out_w]                        # NCHW


# ----------------------------------------------------------------------------
# Pure-JAX f32 reference (independent dilated-input construction)
# ----------------------------------------------------------------------------
def _ref_conv3x3_relu(x_pad, w_hwio, bias):
    y = jax.lax.conv_general_dilated(
        x_pad, w_hwio, window_strides=(1, 1), padding="VALID",
        dimension_numbers=("NHWC", "HWIO", "NHWC"))
    return jnp.maximum(y + bias[None, None, None, :], 0.0)


def upsample_forward_ref(params, x_nchw, output_size):
    k, stride, pad = 3, 2, 1
    out_h, out_w = output_size
    x = jnp.transpose(x_nchw, (0, 2, 3, 1))
    b, h, w, c = x.shape
    op_h = out_h - ((h - 1) * stride - 2 * pad + k)
    op_w = out_w - ((w - 1) * stride - 2 * pad + k)
    xd = jnp.zeros((b, (h - 1) * stride + 1, (w - 1) * stride + 1, c), x.dtype)
    xd = xd.at[:, ::stride, ::stride, :].set(x)
    pt = k - 1 - pad
    xp = jnp.pad(xd, ((0, 0), (pt, pt + op_h), (pt, pt + op_w), (0, 0)))
    wd_hwio = jnp.transpose(params["deconv_w"][:, :, ::-1, ::-1], (2, 3, 0, 1))
    out1 = _ref_conv3x3_relu(xp, wd_hwio, params["deconv_b"])
    out1p = jnp.pad(out1, ((0, 0), (1, 1), (1, 1), (0, 0)))
    wc_hwio = jnp.transpose(params["conv_w"], (2, 3, 1, 0))
    out2 = _ref_conv3x3_relu(out1p, wc_hwio, params["conv_b"])
    return jnp.transpose(out2, (0, 3, 1, 2))


def init_params(key, in_channels, stride=2, kernel_size=3):
    k1, k2, k3, k4 = jax.random.split(key, 4)
    out_channels = in_channels // stride
    scale = 0.1
    return {
        # ConvTranspose2d weight: (in, out, kH, kW)
        "deconv_w": scale * jax.random.normal(
            k1, (in_channels, in_channels, kernel_size, kernel_size),
            jnp.float32),
        "deconv_b": scale * jax.random.normal(k2, (in_channels,), jnp.float32),
        # Conv2d weight: (out, in, kH, kW)
        "conv_w": scale * jax.random.normal(
            k3, (out_channels, in_channels, kernel_size, kernel_size),
            jnp.float32),
        "conv_b": scale * jax.random.normal(k4, (out_channels,), jnp.float32),
    }


if __name__ == "__main__":
    key = jax.random.PRNGKey(0)
    kx, kp = jax.random.split(key)

    B, C, H, W = 2, 4, 16, 16
    x = jax.random.normal(kx, (B, C, H, W), jnp.float32)    # NCHW, like PyTorch
    params = init_params(kp, C)
    prepped = prepare_params(params)                        # one-time weight packing

    # standard 2x upsample target + an output_padding=0 target
    for output_size in ((2 * H, 2 * W), (2 * H - 1, 2 * W - 1)):
        fwd = jax.jit(functools.partial(upsample_forward,
                                        output_size=output_size))
        out = jax.block_until_ready(fwd(prepped, x))
        assert out.shape == (B, C // 2, output_size[0], output_size[1]), out.shape

        ref = jax.block_until_ready(
            upsample_forward_ref(params, x, output_size))
        err = float(jnp.max(jnp.abs(out - ref)))
        # bf16 MXU operands / bf16 mid with f32 accumulation -> loosened tolerance
        assert jnp.allclose(out, ref, atol=5e-2, rtol=5e-2), (output_size, err)

    print("KERNEL_OK")
</pallas_src>

<mosaic_0001>
module attributes {stable_mosaic.version = 11 : i64} {
  func.func @_fused_upsample_kernel(%arg0: i32, %arg1: memref<1x17x17x4xbf16, #tpu.memory_space<vmem>>, %arg2: memref<4x4x16xbf16, #tpu.memory_space<vmem>>, %arg3: memref<1x16xf32, #tpu.memory_space<vmem>>, %arg4: memref<9x16x8xbf16, #tpu.memory_space<vmem>>, %arg5: memref<1x8xf32, #tpu.memory_space<vmem>>, %arg6: memref<1x16x16x8xf32, #tpu.memory_space<vmem>>, %arg7: memref<18x18x16xbf16, #tpu.memory_space<vmem>>) attributes {dimension_semantics = [#tpu.dimension_semantics<parallel>], iteration_bounds = array<i64: 2>, scalar_prefetch = 0 : i64, scratch_operands = 1 : i64, tpu.core_type = #tpu.core_type<tc>, window_params = [{transform_indices = @transform_0, window_bounds = array<i64: 1, 17, 17, 4>}, {pipeline_mode = #tpu.pipeline_mode<synchronous>, transform_indices = @transform_1, window_bounds = array<i64: 4, 4, 16>}, {pipeline_mode = #tpu.pipeline_mode<synchronous>, transform_indices = @transform_2, window_bounds = array<i64: 1, 16>}, {pipeline_mode = #tpu.pipeline_mode<synchronous>, transform_indices = @transform_3, window_bounds = array<i64: 9, 16, 8>}, {pipeline_mode = #tpu.pipeline_mode<synchronous>, transform_indices = @transform_4, window_bounds = array<i64: 1, 8>}, {transform_indices = @transform_5, window_bounds = array<i64: 1, 16, 16, 8>}]} {
    %c0 = arith.constant 0 : index
    %c0_0 = arith.constant 0 : index
    %c0_1 = arith.constant 0 : index
    %c0_2 = arith.constant 0 : index
    %0 = vector.load %arg1[%c0, %c0_0, %c0_1, %c0_2] : memref<1x17x17x4xbf16, #tpu.memory_space<vmem>>, vector<1x17x17x4xbf16>
    %1 = vector.shape_cast %0 : vector<1x17x17x4xbf16> to vector<17x17x4xbf16>
    %2 = vector.extract_strided_slice %1 {offsets = [0, 0, 0], sizes = [16, 16, 4], strides = [1, 1, 1]} : vector<17x17x4xbf16> to vector<16x16x4xbf16>
    %3 = vector.shape_cast %2 : vector<16x16x4xbf16> to vector<256x4xbf16>
    %c0_3 = arith.constant 0 : index
    %c0_4 = arith.constant 0 : index
    %c0_5 = arith.constant 0 : index
    %4 = vector.load %arg2[%c0_3, %c0_4, %c0_5] : memref<4x4x16xbf16, #tpu.memory_space<vmem>>, vector<1x4x16xbf16>
    %5 = vector.shape_cast %4 : vector<1x4x16xbf16> to vector<4x16xbf16>
    %cst = arith.constant dense<0.000000e+00> : vector<256x16xf32>
    %6 = tpu.matmul %3, %5, %cst {dimension_numbers = #tpu.dot_dimension_numbers<[1], [0], [0], [1], [0, 0, 1, 1], [], []>} : vector<256x4xbf16>, vector<4x16xbf16>, vector<256x16xf32> -> vector<256x16xf32>
    %7 = vector.extract_strided_slice %1 {offsets = [0, 1, 0], sizes = [16, 16, 4], strides = [1, 1, 1]} : vector<17x17x4xbf16> to vector<16x16x4xbf16>
    %8 = vector.shape_cast %7 : vector<16x16x4xbf16> to vector<256x4xbf16>
    %c1 = arith.constant 1 : index
    %c0_6 = arith.constant 0 : index
    %c0_7 = arith.constant 0 : index
    %9 = vector.load %arg2[%c1, %c0_6, %c0_7] : memref<4x4x16xbf16, #tpu.memory_space<vmem>>, vector<1x4x16xbf16>
    %10 = vector.shape_cast %9 : vector<1x4x16xbf16> to vector<4x16xbf16>
    %cst_8 = arith.constant dense<0.000000e+00> : vector<256x16xf32>
    %11 = tpu.matmul %8, %10, %cst_8 {dimension_numbers = #tpu.dot_dimension_numbers<[1], [0], [0], [1], [0, 0, 1, 1], [], []>} : vector<256x4xbf16>, vector<4x16xbf16>, vector<256x16xf32> -> vector<256x16xf32>
    %12 = arith.addf %6, %11 : vector<256x16xf32>
    %13 = vector.extract_strided_slice %1 {offsets = [1, 0, 0], sizes = [16, 16, 4], strides = [1, 1, 1]} : vector<17x17x4xbf16> to vector<16x16x4xbf16>
    %14 = vector.shape_cast %13 : vector<16x16x4xbf16> to vector<256x4xbf16>
    %c2 = arith.constant 2 : index
    %c0_9 = arith.constant 0 : index
    %c0_10 = arith.constant 0 : index
    %15 = vector.load %arg2[%c2, %c0_9, %c0_10] : memref<4x4x16xbf16, #tpu.memory_space<vmem>>, vector<1x4x16xbf16>
    %16 = vector.shape_cast %15 : vector<1x4x16xbf16> to vector<4x16xbf16>
    %cst_11 = arith.constant dense<0.000000e+00> : vector<256x16xf32>
    %17 = tpu.matmul %14, %16, %cst_11 {dimension_numbers = #tpu.dot_dimension_numbers<[1], [0], [0], [1], [0, 0, 1, 1], [], []>} : vector<256x4xbf16>, vector<4x16xbf16>, vector<256x16xf32> -> vector<256x16xf32>
    %18 = arith.addf %12, %17 : vector<256x16xf32>
    %19 = vector.extract_strided_slice %1 {offsets = [1, 1, 0], sizes = [16, 16, 4], strides = [1, 1, 1]} : vector<17x17x4xbf16> to vector<16x16x4xbf16>
    %20 = vector.shape_cast %19 : vector<16x16x4xbf16> to vector<256x4xbf16>
    %c3 = arith.constant 3 : index
    %c0_12 = arith.constant 0 : index
    %c0_13 = arith.constant 0 : index
    %21 = vector.load %arg2[%c3, %c0_12, %c0_13] : memref<4x4x16xbf16, #tpu.memory_space<vmem>>, vector<1x4x16xbf16>
    %22 = vector.shape_cast %21 : vector<1x4x16xbf16> to vector<4x16xbf16>
    %cst_14 = arith.constant dense<0.000000e+00> : vector<256x16xf32>
    %23 = tpu.matmul %20, %22, %cst_14 {dimension_numbers = #tpu.dot_dimension_numbers<[1], [0], [0], [1], [0, 0, 1, 1], [], []>} : vector<256x4xbf16>, vector<4x16xbf16>, vector<256x16xf32> -> vector<256x16xf32>
    %24 = arith.addf %18, %23 : vector<256x16xf32>
    %c0_15 = arith.constant 0 : index
    %c0_16 = arith.constant 0 : index
    %25 = vector.load %arg3[%c0_15, %c0_16] : memref<1x16xf32, #tpu.memory_space<vmem>>, vector<1x16xf32>
    %26 = vector.broadcast %25 : vector<1x16xf32> to vector<256x16xf32>
    %27 = arith.addf %24, %26 : vector<256x16xf32>
    %cst_17 = arith.constant 0.000000e+00 : f32
    %28 = vector.broadcast %cst_17 : f32 to vector<256x16xf32>
    %29 = arith.maximumf %27, %28 : vector<256x16xf32>
    %cst_18 = arith.constant 0.000000e+00 : bf16
    %30 = vector.broadcast %cst_18 : bf16 to vector<1x18x16xbf16>
    %cst_19 = arith.constant 0.000000e+00 : bf16
    %31 = vector.broadcast %cst_19 : bf16 to vector<18x1x16xbf16>
    %c0_20 = arith.constant 0 : index
    %c0_21 = arith.constant 0 : index
    %c0_22 = arith.constant 0 : index
    %32 = vector.load %arg7[%c0_20, %c0_21, %c0_22] : memref<18x18x16xbf16, #tpu.memory_space<vmem>>, vector<1x18x16xbf16>
    tpu.vector_store %arg7[%c0_20, %c0_21, %c0_22], %30 {strides = array<i32>} : memref<18x18x16xbf16, #tpu.memory_space<vmem>>, vector<1x18x16xbf16>,
    %c17 = arith.constant 17 : index
    %c0_23 = arith.constant 0 : index
    %c0_24 = arith.constant 0 : index
    %33 = vector.load %arg7[%c17, %c0_23, %c0_24] : memref<18x18x16xbf16, #tpu.memory_space<vmem>>, vector<1x18x16xbf16>
    tpu.vector_store %arg7[%c17, %c0_23, %c0_24], %30 {strides = array<i32>} : memref<18x18x16xbf16, #tpu.memory_space<vmem>>, vector<1x18x16xbf16>,
    %c0_25 = arith.constant 0 : index
    %c0_26 = arith.constant 0 : index
    %c0_27 = arith.constant 0 : index
    %34 = vector.load %arg7[%c0_25, %c0_26, %c0_27] : memref<18x18x16xbf16, #tpu.memory_space<vmem>>, vector<18x1x16xbf16>
    tpu.vector_store %arg7[%c0_25, %c0_26, %c0_27], %31 {strides = array<i32>} : memref<18x18x16xbf16, #tpu.memory_space<vmem>>, vector<18x1x16xbf16>,
    %c0_28 = arith.constant 0 : index
    %c17_29 = arith.constant 17 : index
    %c0_30 = arith.constant 0 : index
    %35 = vector.load %arg7[%c0_28, %c17_29, %c0_30] : memref<18x18x16xbf16, #tpu.memory_space<vmem>>, vector<18x1x16xbf16>
    tpu.vector_store %arg7[%c0_28, %c17_29, %c0_30], %31 {strides = array<i32>} : memref<18x18x16xbf16, #tpu.memory_space<vmem>>, vector<18x1x16xbf16>,
    %36 = vector.shape_cast %29 : vector<256x16xf32> to vector<16x16x16xf32>
    %37 = arith.truncf %36 : vector<16x16x16xf32> to vector<16x16x16xbf16>
    %c1_31 = arith.constant 1 : index
    %c1_32 = arith.constant 1 : index
    %c0_33 = arith.constant 0 : index
    %38 = vector.load %arg7[%c1_31, %c1_32, %c0_33] : memref<18x18x16xbf16, #tpu.memory_space<vmem>>, vector<16x16x16xbf16>
    tpu.vector_store %arg7[%c1_31, %c1_32, %c0_33], %37 {strides = array<i32>} : memref<18x18x16xbf16, #tpu.memory_space<vmem>>, vector<16x16x16xbf16>,
    %c0_34 = arith.constant 0 : index
    %c0_35 = arith.constant 0 : index
    %c0_36 = arith.constant 0 : index
    %39 = vector.load %arg7[%c0_34, %c0_35, %c0_36] : memref<18x18x16xbf16, #tpu.memory_space<vmem>>, vector<16x16x16xbf16>
    %40 = vector.shape_cast %39 : vector<16x16x16xbf16> to vector<256x16xbf16>
    %c0_37 = arith.constant 0 : index
    %c0_38 = arith.constant 0 : index
    %c0_39 = arith.constant 0 : index
    %41 = vector.load %arg4[%c0_37, %c0_38, %c0_39] : memref<9x16x8xbf16, #tpu.memory_space<vmem>>, vector<1x16x8xbf16>
    %42 = vector.shape_cast %41 : vector<1x16x8xbf16> to vector<16x8xbf16>
    %cst_40 = arith.constant dense<0.000000e+00> : vector<256x8xf32>
    %43 = tpu.matmul %40, %42, %cst_40 {dimension_numbers = #tpu.dot_dimension_numbers<[1], [0], [0], [1], [0, 0, 1, 1], [], []>} : vector<256x16xbf16>, vector<16x8xbf16>, vector<256x8xf32> -> vector<256x8xf32>
    %c0_41 = arith.constant 0 : index
    %c1_42 = arith.constant 1 : index
    %c0_43 = arith.constant 0 : index
    %44 = vector.load %arg7[%c0_41, %c1_42, %c0_43] : memref<18x18x16xbf16, #tpu.memory_space<vmem>>, vector<16x16x16xbf16>
    %45 = vector.shape_cast %44 : vector<16x16x16xbf16> to vector<256x16xbf16>
    %c1_44 = arith.constant 1 : index
    %c0_45 = arith.constant 0 : index
    %c0_46 = arith.constant 0 : index
    %46 = vector.load %arg4[%c1_44, %c0_45, %c0_46] : memref<9x16x8xbf16, #tpu.memory_space<vmem>>, vector<1x16x8xbf16>
    %47 = vector.shape_cast %46 : vector<1x16x8xbf16> to vector<16x8xbf16>
    %cst_47 = arith.constant dense<0.000000e+00> : vector<256x8xf32>
    %48 = tpu.matmul %45, %47, %cst_47 {dimension_numbers = #tpu.dot_dimension_numbers<[1], [0], [0], [1], [0, 0, 1, 1], [], []>} : vector<256x16xbf16>, vector<16x8xbf16>, vector<256x8xf32> -> vector<256x8xf32>
    %49 = arith.addf %43, %48 : vector<256x8xf32>
    %c0_48 = arith.constant 0 : index
    %c2_49 = arith.constant 2 : index
    %c0_50 = arith.constant 0 : index
    %50 = vector.load %arg7[%c0_48, %c2_49, %c0_50] : memref<18x18x16xbf16, #tpu.memory_space<vmem>>, vector<16x16x16xbf16>
    %51 = vector.shape_cast %50 : vector<16x16x16xbf16> to vector<256x16xbf16>
    %c2_51 = arith.constant 2 : index
    %c0_52 = arith.constant 0 : index
    %c0_53 = arith.constant 0 : index
    %52 = vector.load %arg4[%c2_51, %c0_52, %c0_53] : memref<9x16x8xbf16, #tpu.memory_space<vmem>>, vector<1x16x8xbf16>
    %53 = vector.shape_cast %52 : vector<1x16x8xbf16> to vector<16x8xbf16>
    %cst_54 = arith.constant dense<0.000000e+00> : vector<256x8xf32>
    %54 = tpu.matmul %51, %53, %cst_54 {dimension_numbers = #tpu.dot_dimension_numbers<[1], [0], [0], [1], [0, 0, 1, 1], [], []>} : vector<256x16xbf16>, vector<16x8xbf16>, vector<256x8xf32> -> vector<256x8xf32>
    %55 = arith.addf %49, %54 : vector<256x8xf32>
    %c1_55 = arith.constant 1 : index
    %c0_56 = arith.constant 0 : index
    %c0_57 = arith.constant 0 : index
    %56 = vector.load %arg7[%c1_55, %c0_56, %c0_57] : memref<18x18x16xbf16, #tpu.memory_space<vmem>>, vector<16x16x16xbf16>
    %57 = vector.shape_cast %56 : vector<16x16x16xbf16> to vector<256x16xbf16>
    %c3_58 = arith.constant 3 : index
    %c0_59 = arith.constant 0 : index
    %c0_60 = arith.constant 0 : index
    %58 = vector.load %arg4[%c3_58, %c0_59, %c0_60] : memref<9x16x8xbf16, #tpu.memory_space<vmem>>, vector<1x16x8xbf16>
    %59 = vector.shape_cast %58 : vector<1x16x8xbf16> to vector<16x8xbf16>
    %cst_61 = arith.constant dense<0.000000e+00> : vector<256x8xf32>
    %60 = tpu.matmul %57, %59, %cst_61 {dimension_numbers = #tpu.dot_dimension_numbers<[1], [0], [0], [1], [0, 0, 1, 1], [], []>} : vector<256x16xbf16>, vector<16x8xbf16>, vector<256x8xf32> -> vector<256x8xf32>
    %61 = arith.addf %55, %60 : vector<256x8xf32>
    %c1_62 = arith.constant 1 : index
    %c1_63 = arith.constant 1 : index
    %c0_64 = arith.constant 0 : index
    %62 = vector.load %arg7[%c1_62, %c1_63, %c0_64] : memref<18x18x16xbf16, #tpu.memory_space<vmem>>, vector<16x16x16xbf16>
    %63 = vector.shape_cast %62 : vector<16x16x16xbf16> to vector<256x16xbf16>
    %c4 = arith.constant 4 : index
    %c0_65 = arith.constant 0 : index
    %c0_66 = arith.constant 0 : index
    %64 = vector.load %arg4[%c4, %c0_65, %c0_66] : memref<9x16x8xbf16, #tpu.memory_space<vmem>>, vector<1x16x8xbf16>
    %65 = vector.shape_cast %64 : vector<1x16x8xbf16> to vector<16x8xbf16>
    %cst_67 = arith.constant dense<0.000000e+00> : vector<256x8xf32>
    %66 = tpu.matmul %63, %65, %cst_67 {dimension_numbers = #tpu.dot_dimension_numbers<[1], [0], [0], [1], [0, 0, 1, 1], [], []>} : vector<256x16xbf16>, vector<16x8xbf16>, vector<256x8xf32> -> vector<256x8xf32>
    %67 = arith.addf %61, %66 : vector<256x8xf32>
    %c1_68 = arith.constant 1 : index
    %c2_69 = arith.constant 2 : index
    %c0_70 = arith.constant 0 : index
    %68 = vector.load %arg7[%c1_68, %c2_69, %c0_70] : memref<18x18x16xbf16, #tpu.memory_space<vmem>>, vector<16x16x16xbf16>
    %69 = vector.shape_cast %68 : vector<16x16x16xbf16> to vector<256x16xbf16>
    %c5 = arith.constant 5 : index
    %c0_71 = arith.constant 0 : index
    %c0_72 = arith.constant 0 : index
    %70 = vector.load %arg4[%c5, %c0_71, %c0_72] : memref<9x16x8xbf16, #tpu.memory_space<vmem>>, vector<1x16x8xbf16>
    %71 = vector.shape_cast %70 : vector<1x16x8xbf16> to vector<16x8xbf16>
    %cst_73 = arith.constant dense<0.000000e+00> : vector<256x8xf32>
    %72 = tpu.matmul %69, %71, %cst_73 {dimension_numbers = #tpu.dot_dimension_numbers<[1], [0], [0], [1], [0, 0, 1, 1], [], []>} : vector<256x16xbf16>, vector<16x8xbf16>, vector<256x8xf32> -> vector<256x8xf32>
    %73 = arith.addf %67, %72 : vector<256x8xf32>
    %c2_74 = arith.constant 2 : index
    %c0_75 = arith.constant 0 : index
    %c0_76 = arith.constant 0 : index
    %74 = vector.load %arg7[%c2_74, %c0_75, %c0_76] : memref<18x18x16xbf16, #tpu.memory_space<vmem>>, vector<16x16x16xbf16>
    %75 = vector.shape_cast %74 : vector<16x16x16xbf16> to vector<256x16xbf16>
    %c6 = arith.constant 6 : index
    %c0_77 = arith.constant 0 : index
    %c0_78 = arith.constant 0 : index
    %76 = vector.load %arg4[%c6, %c0_77, %c0_78] : memref<9x16x8xbf16, #tpu.memory_space<vmem>>, vector<1x16x8xbf16>
    %77 = vector.shape_cast %76 : vector<1x16x8xbf16> to vector<16x8xbf16>
    %cst_79 = arith.constant dense<0.000000e+00> : vector<256x8xf32>
    %78 = tpu.matmul %75, %77, %cst_79 {dimension_numbers = #tpu.dot_dimension_numbers<[1], [0], [0], [1], [0, 0, 1, 1], [], []>} : vector<256x16xbf16>, vector<16x8xbf16>, vector<256x8xf32> -> vector<256x8xf32>
    %79 = arith.addf %73, %78 : vector<256x8xf32>
    %c2_80 = arith.constant 2 : index
    %c1_81 = arith.constant 1 : index
    %c0_82 = arith.constant 0 : index
    %80 = vector.load %arg7[%c2_80, %c1_81, %c0_82] : memref<18x18x16xbf16, #tpu.memory_space<vmem>>, vector<16x16x16xbf16>
    %81 = vector.shape_cast %80 : vector<16x16x16xbf16> to vector<256x16xbf16>
    %c7 = arith.constant 7 : index
    %c0_83 = arith.constant 0 : index
    %c0_84 = arith.constant 0 : index
    %82 = vector.load %arg4[%c7, %c0_83, %c0_84] : memref<9x16x8xbf16, #tpu.memory_space<vmem>>, vector<1x16x8xbf16>
    %83 = vector.shape_cast %82 : vector<1x16x8xbf16> to vector<16x8xbf16>
    %cst_85 = arith.constant dense<0.000000e+00> : vector<256x8xf32>
    %84 = tpu.matmul %81, %83, %cst_85 {dimension_numbers = #tpu.dot_dimension_numbers<[1], [0], [0], [1], [0, 0, 1, 1], [], []>} : vector<256x16xbf16>, vector<16x8xbf16>, vector<256x8xf32> -> vector<256x8xf32>
    %85 = arith.addf %79, %84 : vector<256x8xf32>
    %c2_86 = arith.constant 2 : index
    %c2_87 = arith.constant 2 : index
    %c0_88 = arith.constant 0 : index
    %86 = vector.load %arg7[%c2_86, %c2_87, %c0_88] : memref<18x18x16xbf16, #tpu.memory_space<vmem>>, vector<16x16x16xbf16>
    %87 = vector.shape_cast %86 : vector<16x16x16xbf16> to vector<256x16xbf16>
    %c8 = arith.constant 8 : index
    %c0_89 = arith.constant 0 : index
    %c0_90 = arith.constant 0 : index
    %88 = vector.load %arg4[%c8, %c0_89, %c0_90] : memref<9x16x8xbf16, #tpu.memory_space<vmem>>, vector<1x16x8xbf16>
    %89 = vector.shape_cast %88 : vector<1x16x8xbf16> to vector<16x8xbf16>
    %cst_91 = arith.constant dense<0.000000e+00> : vector<256x8xf32>
    %90 = tpu.matmul %87, %89, %cst_91 {dimension_numbers = #tpu.dot_dimension_numbers<[1], [0], [0], [1], [0, 0, 1, 1], [], []>} : vector<256x16xbf16>, vector<16x8xbf16>, vector<256x8xf32> -> vector<256x8xf32>
    %91 = arith.addf %85, %90 : vector<256x8xf32>
    %c0_92 = arith.constant 0 : index
    %c0_93 = arith.constant 0 : index
    %92 = vector.load %arg5[%c0_92, %c0_93] : memref<1x8xf32, #tpu.memory_space<vmem>>, vector<1x8xf32>
    %93 = vector.broadcast %92 : vector<1x8xf32> to vector<256x8xf32>
    %94 = arith.addf %91, %93 : vector<256x8xf32>
    %cst_94 = arith.constant 0.000000e+00 : f32
    %95 = vector.broadcast %cst_94 : f32 to vector<256x8xf32>
    %96 = arith.maximumf %94, %95 : vector<256x8xf32>
    %97 = vector.shape_cast %96 : vector<256x8xf32> to vector<16x16x8xf32>
    %c0_95 = arith.constant 0 : index
    %c0_96 = arith.constant 0 : index
    %c0_97 = arith.constant 0 : index
    %c0_98 = arith.constant 0 : index
    %98 = vector.load %arg6[%c0_95, %c0_96, %c0_97, %c0_98] : memref<1x16x16x8xf32, #tpu.memory_space<vmem>>, vector<1x16x16x8xf32>
    %99 = vector.shape_cast %98 : vector<1x16x16x8xf32> to vector<16x16x8xf32>
    %100 = vector.shape_cast %97 : vector<16x16x8xf32> to vector<1x16x16x8xf32>
    tpu.vector_store %arg6[%c0_95, %c0_96, %c0_97, %c0_98], %100 {strides = array<i32>} : memref<1x16x16x8xf32, #tpu.memory_space<vmem>>, vector<1x16x16x8xf32>,
    return
  }
  func.func @transform_0(%arg0: i32) -> (i32, i32, i32, i32) {
    %c0_i32 = arith.constant 0 : i32
    %c0_i32_0 = arith.constant 0 : i32
    %c0_i32_1 = arith.constant 0 : i32
    %c0_i32_2 = arith.constant 0 : i32
    return %arg0, %c0_i32, %c0_i32_0, %c0_i32_1 : i32, i32, i32, i32
  }
  func.func @transform_1(%arg0: i32) -> (i32, i32, i32) {
    %c0_i32 = arith.constant 0 : i32
    %c0_i32_0 = arith.constant 0 : i32
    %c0_i32_1 = arith.constant 0 : i32
    %c0_i32_2 = arith.constant 0 : i32
    return %c0_i32, %c0_i32_0, %c0_i32_1 : i32, i32, i32
  }
  func.func @transform_2(%arg0: i32) -> (i32, i32) {
    %c0_i32 = arith.constant 0 : i32
    %c0_i32_0 = arith.constant 0 : i32
    %c0_i32_1 = arith.constant 0 : i32
    return %c0_i32, %c0_i32_0 : i32, i32
  }
  func.func @transform_3(%arg0: i32) -> (i32, i32, i32) {
    %c0_i32 = arith.constant 0 : i32
    %c0_i32_0 = arith.constant 0 : i32
    %c0_i32_1 = arith.constant 0 : i32
    %c0_i32_2 = arith.constant 0 : i32
    return %c0_i32, %c0_i32_0, %c0_i32_1 : i32, i32, i32
  }
  func.func @transform_4(%arg0: i32) -> (i32, i32) {
    %c0_i32 = arith.constant 0 : i32
    %c0_i32_0 = arith.constant 0 : i32
    %c0_i32_1 = arith.constant 0 : i32
    return %c0_i32, %c0_i32_0 : i32, i32
  }
  func.func @transform_5(%arg0: i32) -> (i32, i32, i32, i32) {
    %c0_i32 = arith.constant 0 : i32
    %c0_i32_0 = arith.constant 0 : i32
    %c0_i32_1 = arith.constant 0 : i32
    %c0_i32_2 = arith.constant 0 : i32
    return %arg0, %c0_i32, %c0_i32_0, %c0_i32_1 : i32, i32, i32, i32
  }
}

</mosaic_0001>

<bundles_post_ra>
// kernel: upsample_forward.1
= control target key start
LH: loop header
LB: loop body
LE: loop exit
PB: predicated region body
PF: predicated region fallthrough
CT: control target
= control target key end

     0   :  { %s8836_s18 = smov 0   ;;  %s11330_s0 = inlined_call_operand.vmem [shape: bf16[2,17,17,4], index: 0, kind: input, shape index: {}]   ;;  %s11331_s1 = inlined_call_operand.vmem [shape: bf16[4,4,16], index: 1, kind: input, shape index: {}]   ;;  %s11332_s2 = inlined_call_operand.vmem [shape: f32[1,16], index: 2, kind: input, shape index: {}]   ;;  %s11333_s3 = inlined_call_operand.vmem [shape: bf16[9,16,8], index: 3, kind: input, shape index: {}]   ;;  %s11334_s4 = inlined_call_operand.vmem [shape: f32[1,8], index: 4, kind: input, shape index: {}]   ;;  %s11335_s5 = inlined_call_operand.vmem [shape: f32[2,16,16,8], index: 5, kind: output, shape index: {}]  }
   0x1 LB: > { %s7130_s19 = sadd.s32 4294967295, %s8803_s18   ;;  %p7134_p0 = scmp.ge.s32.totalorder %s8803_s18, 1  ;;  %s8803_s18 = sphi %s8836_s18, %s15_s18  }
   0x2   : > { %p187_p1 = scmp.lt.s32.totalorder %s8803_s18, 3 }
   0x4   : > { %p188_p2 = pnand %p7134_p0, %p187_p1 }
   0x6   : > { %191 = sbr.rel (%p188_p2) target bundleno = 1205 (0x4b5), region = 40 }
   0xd   : > { %v7138_v0 = vld [vmem:[%s11331_s1 + $0x2] sm:$0x3]  ;;  %vm764_vm0 = vcmask 1041408   ;;  %p215_p3 = scmp.lt.s32.totalorder %s7130_s19, 1  ;;  %v277_v2 = vld [vmem:[%s11331_s1] sm:$0x3] }
   0xe   : > { %8686 = vmatprep.subr.msk.bf16.mxu0 %vm764_vm0, %v7138_v0  ;;  %v766_v1 = vsel %vm764_vm0, %v7138_v0, 0  ;;  %vm278_vm1 = vsmask.f32 3328  ;;  %vm279_vm2 = vsmask.f32 7440  ;;  %v8857_v3 = vsel %vm764_vm0, %v277_v2, 0 }
   0xf   : > { %7891 = vmatpush3.bf16.msra.mxu0 %v766_v1  ;;  %s11532_s19 = smov (!%p215_p3, %s7130_s19), 1  ;;  %vm715_vm3 = vcmask 31744   ;;  %vm8896_vm4 = vmor %vm278_vm1, %vm279_vm2  ;;  %vm1729_vm5 = vcmask 122880   ;;  %vm1736_vm6 = vsmask.f32 256  ;;  %vm1726_vm10 = vcmask 125952  }
  0x10   : > { %8687 = vmatprep.subr.msk.bf16.mxu0 %vm764_vm0, %v277_v2  ;;  %s8690_s24 = smul.u32 204, %s11532_s19  ;;  %vm9283_vm7 = vmand %vm1729_vm5, %vm1736_vm6  ;;  %vm1792_vm8 = vsmask.f32 7938  ;;  %vm2872_vm11 = vcmask 130048   ;;  %vm1944_vm12 = vsmask.f32 4368 }
  0x11   : > { %vm9293_vm9 = vmand %vm1729_vm5, %vm1792_vm8  ;;  %vm3425_vm15 = vcmask 1042432   ;;  %s7636_s12 = sshll.u32 %s11532_s19, 8  ;;  %vm7042_vm2 = vcmask 64512  }
  0x12   : > { %s8862_s27 = scalar_lea.vmem %s11330_s0, %s8690_s24  ;;  %vm9397_vm13 = vmand %vm1726_vm10, %vm1792_vm8  ;;  %s11201_s15 = scalar_lea.vmem %s11335_s5, %s7636_s12 }
  0x13   : > { %v8865_v4 = vld [vmem:[%s8862_s27] sm:$0xf]  ;;  %v8868_v5 = vld [vmem:[%s8862_s27 + $0x4] sm:$0xf]  ;;  %v228_v6 = vld [vmem:[%s8862_s27 + $0x8] sm:$0x1] }
  0x14   : > { %v282_v7 = vshrl.u32 %v8865_v4, 16  ;;  %v285_v8 = vshll.u32 %v8865_v4, 16  ;;  %v291_v9 = vshll.u32 %v8868_v5, 16  ;;  %v295_v10 = vshrl.u32 %v8868_v5, 16  ;;  %v8876_v11 = vld [vmem:[%s8862_s27 + $0xc] sm:$0xf]  ;;  %vm9404_vm14 = vmor %vm1736_vm6, %vm1944_vm12 }
  0x15   : > { %v301_v12 = vshll.u32 %v228_v6, 16  ;;  %v8879_v13 = vld [vmem:[%s8862_s27 + $0x10] sm:$0xf]  ;;  %v231_v14 = vld [vmem:[%s8862_s27 + $0x14] sm:$0x1]  ;;  %v306_v15 = vshrl.u32 %v8876_v11, 16 }
  0x16   : > { %v284_v17 = vrot.slane %v282_v7, 4  ;;  %v287_v18 = vrot.slane %v285_v8, 5  ;;  %v293_v19 = vrot.slane %v291_v9, 5  ;;  %v297_v20 = vrot.slane %v295_v10, 4  ;;  %v8886_v21 = vld [vmem:[%s8862_s27 + $0x18] sm:$0xf] }
  0x17   : > { %v303_v22 = vrot.slane %v301_v12, 5  ;;  %v308_v23 = vrot.slane %v306_v15, 4  ;;  %v309_v24 = vshll.u32 %v8876_v11, 16  ;;  %v315_v25 = vshll.u32 %v8879_v13, 16  ;;  %v8892_v30 = vld [vmem:[%s8862_s27 + $0x1c] sm:$0xf] }
  0x18   : > { %v288_v26 = vor.u32 %v287_v18, %v284_v17  ;;  %v298_v27 = vor.u32 %v297_v20, %v293_v19  ;;  %v319_v28 = vshrl.u32 %v8879_v13, 16  ;;  %v325_v29 = vshll.u32 %v231_v14, 16  ;;  %v234_v40 = vld [vmem:[%s8862_s27 + $0x20] sm:$0x1]  ;;  %v8905_v45 = vld [vmem:[%s8862_s27 + $0x24] sm:$0xf] }
  0x19   : > { %v311_v32 = vrot.slane %v309_v24, 5  ;;  %v317_v33 = vrot.slane %v315_v25, 5  ;;  %v330_v34 = vshrl.u32 %v8886_v21, 16  ;;  %v333_v35 = vshll.u32 %v8886_v21, 16  ;;  %v8913_v50 = vld [vmem:[%s8862_s27 + $0x28] sm:$0xf] }
  0x1a   : > { %v289_v36 = vrot.slane %v288_v26, 4  ;;  %v299_v37 = vrot.slane %v298_v27, 4  ;;  %v321_v38 = vrot.slane %v319_v28, 4  ;;  %v327_v39 = vrot.slane %v325_v29, 5  ;;  %v237_v58 = vld [vmem:[%s8862_s27 + $0x2c] sm:$0x1] }
  0x1b   : > { %v312_v41 = vor.u32 %v311_v32, %v308_v23  ;;  %v332_v42 = vrot.slane %v330_v34, 4  ;;  %v335_v43 = vrot.slane %v333_v35, 5  ;;  %v339_v44 = vshll.u32 %v8892_v30, 16  ;;  %v8923_v0 = vld [vmem:[%s8862_s27 + $0x30] sm:$0xf] }
  0x1c   : > { %v294_v46 = vsel %vm8896_vm4, %v289_v36, %v293_v19  ;;  %v304_v47 = vsel %vm8896_vm4, %v299_v37, %v303_v22  ;;  %v322_v48 = vor.u32 %v321_v38, %v317_v33  ;;  %v343_v49 = vshrl.u32 %v8892_v30, 16  ;;  %v8928_v8 = vld [vmem:[%s8862_s27 + $0x34] sm:$0xf]  ;;  %v8937_v15 = vld [vmem:[%s11331_s1 + $0x4] sm:$0x3] }
  0x1d   : > { %v7139_v51 = vcombine.low %v294_v46, %v304_v47  ;;  %v313_v52 = vrot.slane %v312_v41, 4  ;;  %v336_v53 = vor.u32 %v335_v43, %v332_v42  ;;  %v341_v54 = vrot.slane %v339_v44, 5  ;;  %v240_v20 = vld [vmem:[%s8862_s27 + $0x38] sm:$0x1]  ;;  %v8948_v27 = vld [vmem:[%s8862_s27 + $0x3c] sm:$0xf] }
  0x1e   : > { %v323_v55 = vrot.slane %v322_v48, 4  ;;  %v345_v56 = vrot.slane %v343_v49, 4  ;;  %v349_v57 = vshll.u32 %v234_v40, 16  ;;  %v354_v59 = vshrl.u32 %v8905_v45, 16  ;;  %v8954_v34 = vld [vmem:[%s8862_s27 + $0x40] sm:$0xf] }
  0x1f   : > { %7892 = vmatprep.mubr.msk.bf16.mxu0 %vm715_vm3, %v7139_v51  ;;  %v318_v60 = vsel %vm8896_vm4, %v313_v52, %v317_v33  ;;  %v337_v61 = vrot.slane %v336_v53, 4  ;;  %v357_v62 = vshll.u32 %v8905_v45, 16  ;;  %v363_v63 = vshll.u32 %v8913_v50, 16  ;;  %v243_v44 = vld [vmem:[%s8862_s27 + $0x44] sm:$0x1] }
  0x20   : > { %v328_v1 = vsel %vm8896_vm4, %v323_v55, %v327_v39  ;;  %v346_v2 = vor.u32 %v345_v56, %v341_v54  ;;  %v351_v6 = vrot.slane %v349_v57, 5  ;;  %v356_v7 = vrot.slane %v354_v59, 4  ;;  %v8969_v48 = vld [vmem:[%s8862_s27 + $0x48] sm:$0xf] }
  0x21   : > { %v8930_v9 = vcombine.low %v318_v60, %v328_v1  ;;  %v342_v10 = vsel %vm8896_vm4, %v337_v61, %v341_v54  ;;  %v359_v12 = vrot.slane %v357_v62, 5  ;;  %v365_v14 = vrot.slane %v363_v63, 5  ;;  %v8975_v61 = vld [vmem:[%s8862_s27 + $0x4c] sm:$0xf] }
  0x22   : > { %v347_v17 = vrot.slane %v346_v2, 4  ;;  %v367_v18 = vshrl.u32 %v8913_v50, 16  ;;  %v373_v19 = vshll.u32 %v237_v58, 16  ;;  %v378_v22 = vshrl.u32 %v8923_v0, 16 }
  0x23   : > { %7893 = vmatmul.mubr.msk.bf16.vlgmr.msra.gmra.mrb[0].mxu0 %vm715_vm3, %v8930_v9  ;;  %v360_v23 = vor.u32 %v359_v12, %v356_v7  ;;  %v381_v24 = vshll.u32 %v8923_v0, 16  ;;  %v387_v25 = vshll.u32 %v8928_v8, 16  ;;  %v391_v26 = vshrl.u32 %v8928_v8, 16  ;;  %v246_v7 = vld [vmem:[%s8862_s27 + $0x50] sm:$0x1] }
  0x24   : > { %7925 = vmatpush3.bf16.msra.mxu0 %v8857_v3  ;;  %v352_v28 = vsel %vm8896_vm4, %v347_v17, %v351_v6  ;;  %v369_v29 = vrot.slane %v367_v18, 4  ;;  %v375_v32 = vrot.slane %v373_v19, 5  ;;  %v380_v33 = vrot.slane %v378_v22, 4 }
  0x25   : > { %v8956_v35 = vcombine.low %v342_v10, %v352_v28  ;;  %v361_v36 = vrot.slane %v360_v23, 4  ;;  %v383_v37 = vrot.slane %v381_v24, 5  ;;  %v389_v38 = vrot.slane %v387_v25, 5  ;;  %8688 = vmatprep.subr.msk.bf16.mxu0 %vm764_vm0, %v8937_v15  ;;  %v8984_v10 = vld [vmem:[%s8862_s27 + $0x54] sm:$0xf] }
  0x26   : > { %v370_v39 = vor.u32 %v369_v29, %v365_v14  ;;  %v393_v3 = vrot.slane %v391_v26, 4  ;;  %v397_v40 = vshll.u32 %v240_v20, 16  ;;  %v402_v41 = vshrl.u32 %v8948_v27, 16  ;;  %v8996_v28 = vld [vmem:[%s8862_s27 + $0x58] sm:$0xf] }
  0x27   : > { %7896 = vmatprep.mubr.msk.bf16.mxu0 %vm715_vm3, %v8956_v35  ;;  %v366_v42 = vsel %vm8896_vm4, %v361_v36, %v365_v14  ;;  %v384_v43 = vor.u32 %v383_v37, %v380_v33  ;;  %v405_v46 = vshll.u32 %v8948_v27, 16  ;;  %v411_v47 = vshll.u32 %v8954_v34, 16  ;;  %v249_v37 = vld [vmem:[%s8862_s27 + $0x5c] sm:$0x1] }
  0x28   : > { %v371_v49 = vrot.slane %v370_v39, 4  ;;  %v394_v51 = vor.u32 %v393_v3, %v389_v38  ;;  %v399_v52 = vrot.slane %v397_v40, 5  ;;  %v404_v53 = vrot.slane %v402_v41, 4 }
  0x29   : > { %v385_v54 = vrot.slane %v384_v43, 4  ;;  %v407_v55 = vrot.slane %v405_v46, 5  ;;  %v413_v56 = vrot.slane %v411_v47, 5  ;;  %v415_v57 = vshrl.u32 %v8954_v34, 16 }
  0x2a   : > { %v376_v58 = vsel %vm8896_vm4, %v371_v49, %v375_v32  ;;  %v395_v59 = vrot.slane %v394_v51, 4  ;;  %v421_v60 = vshll.u32 %v243_v44, 16  ;;  %v426_v62 = vshrl.u32 %v8969_v48, 16 }
  0x2b   : > { %v8978_v63 = vcombine.low %v366_v42, %v376_v58  ;;  %v390_v1 = vsel %vm8896_vm4, %v385_v54, %v389_v38  ;;  %v408_v2 = vor.u32 %v407_v55, %v404_v53  ;;  %v417_v6 = vrot.slane %v415_v57, 4  ;;  %v9006_v42 = vld [vmem:[%s8862_s27 + $0x60] sm:$0xf]  ;;  %v9015_v54 = vld [vmem:[%s8862_s27 + $0x64] sm:$0xf] }
  0x2c   : > { %v400_v12 = vsel %vm8896_vm4, %v395_v59, %v399_v52  ;;  %v423_v14 = vrot.slane %v421_v60, 5  ;;  %v428_v17 = vrot.slane %v426_v62, 4  ;;  %v429_v18 = vshll.u32 %v8969_v48, 16  ;;  %v252_v58 = vld [vmem:[%s8862_s27 + $0x68] sm:$0x1] }
  0x2d   : > { %7897 = vmatmul.mubr.msk.bf16.gmra.mrb[4].mxu0 %vm715_vm3, %v8978_v63  ;;  %v8991_v19 = vcombine.low %v390_v1, %v400_v12  ;;  %v409_v20 = vrot.slane %v408_v2, 4  ;;  %v418_v22 = vor.u32 %v417_v6, %v413_v56  ;;  %v435_v23 = vshll.u32 %v8975_v61, 16  ;;  %v9023_v6 = vld [vmem:[%s8862_s27 + $0x6c] sm:$0xf] }
  0x2e   : > { %v431_v24 = vrot.slane %v429_v18, 5  ;;  %v439_v25 = vshrl.u32 %v8975_v61, 16  ;;  %v445_v26 = vshll.u32 %v246_v7, 16  ;;  %v450_v29 = vshrl.u32 %v8984_v10, 16  ;;  %v9029_v18 = vld [vmem:[%s8862_s27 + $0x70] sm:$0xf] }
  0x2f   : > { %7900 = vmatprep.mubr.msk.bf16.mxu0 %vm715_vm3, %v8991_v19  ;;  %v414_v32 = vsel %vm8896_vm4, %v409_v20, %v413_v56  ;;  %v419_v33 = vrot.slane %v418_v22, 4  ;;  %v437_v36 = vrot.slane %v435_v23, 5  ;;  %v453_v38 = vshll.u32 %v8984_v10, 16 }
  0x30   : > { %v432_v39 = vor.u32 %v431_v24, %v428_v17  ;;  %v441_v3 = vrot.slane %v439_v25, 4  ;;  %v447_v40 = vrot.slane %v445_v26, 5  ;;  %v452_v41 = vrot.slane %v450_v29, 4  ;;  %v255_v25 = vld [vmem:[%s8862_s27 + $0x74] sm:$0x1] }
  0x31   : > { %v424_v43 = vsel %vm8896_vm4, %v419_v33, %v423_v14  ;;  %v455_v44 = vrot.slane %v453_v38, 5  ;;  %v459_v46 = vshll.u32 %v8996_v28, 16  ;;  %v463_v47 = vshrl.u32 %v8996_v28, 16 }
  0x32   : > { %v9012_v49 = vcombine.low %v414_v32, %v424_v43  ;;  %v433_v51 = vrot.slane %v432_v39, 4  ;;  %v442_v52 = vor.u32 %v441_v3, %v437_v36  ;;  %v469_v53 = vshll.u32 %v249_v37, 16 }
  0x33   : > { %v456_v55 = vor.u32 %v455_v44, %v452_v41  ;;  %v461_v56 = vrot.slane %v459_v46, 5  ;;  %v465_v57 = vrot.slane %v463_v47, 4  ;;  %v474_v59 = vshrl.u32 %v9006_v42, 16 }
  0x34   : > { %11388 = vst [vmem:[#allocation3_spill] sm:$0xff] %v9012_v49  ;;  %v438_v60 = vsel %vm8896_vm4, %v433_v51, %v437_v36  ;;  %v443_v62 = vrot.slane %v442_v52, 4  ;;  %v471_v1 = vrot.slane %v469_v53, 5  ;;  %v477_v2 = vshll.u32 %v9006_v42, 16  ;;  %v9040_v36 = vld [vmem:[%s8862_s27 + $0x78] sm:$0xf] }
  0x35   : > { %7901 = vmatmul.mubr.msk.bf16.gmra.mrb[8].mxu0 %vm715_vm3, %v9012_v49  ;;  %v457_v7 = vrot.slane %v456_v55, 4  ;;  %v466_v12 = vor.u32 %v465_v57, %v461_v56  ;;  %v476_v14 = vrot.slane %v474_v59, 4  ;;  %v483_v17 = vshll.u32 %v9015_v54, 16 }
  0x36   : > { %v448_v20 = vsel %vm8896_vm4, %v443_v62, %v447_v40  ;;  %v479_v22 = vrot.slane %v477_v2, 5  ;;  %v487_v23 = vshrl.u32 %v9015_v54, 16  ;;  %v493_v24 = vshll.u32 %v252_v58, 16  ;;  %v9044_v40 = vld [vmem:[%s8862_s27 + $0x7c] sm:$0xf] }
  0x37   : > { %v9035_v26 = vcombine.low %v438_v60, %v448_v20  ;;  %v462_v29 = vsel %vm8896_vm4, %v457_v7, %v461_v56  ;;  %v467_v32 = vrot.slane %v466_v12, 4  ;;  %v485_v33 = vrot.slane %v483_v17, 5  ;;  %v9064_v20 = vld [vmem:[%s8862_s27 + $0x84] sm:$0xf] }
  0x38   : > { %v480_v37 = vor.u32 %v479_v22, %v476_v14  ;;  %v489_v38 = vrot.slane %v487_v23, 4  ;;  %v495_v39 = vrot.slane %v493_v24, 5  ;;  %v498_v3 = vshrl.u32 %v9023_v6, 16  ;;  %v258_v14 = vld [vmem:[%s8862_s27 + $0x80] sm:$0x1] }
  0x39   : > { %11389 = vst [vmem:[#allocation4_spill] sm:$0xff] %v9035_v26  ;;  %7904 = vmatprep.mubr.msk.bf16.mxu0 %vm715_vm3, %v9035_v26  ;;  %v472_v41 = vsel %vm8896_vm4, %v467_v32, %v471_v1  ;;  %v501_v43 = vshll.u32 %v9023_v6, 16  ;;  %v507_v44 = vshll.u32 %v9029_v18, 16  ;;  %v511_v46 = vshrl.u32 %v9029_v18, 16 }
  0x3a   : > { %v9053_v47 = vcombine.low %v462_v29, %v472_v41  ;;  %v481_v51 = vrot.slane %v480_v37, 4  ;;  %v490_v52 = vor.u32 %v489_v38, %v485_v33  ;;  %v500_v53 = vrot.slane %v498_v3, 4  ;;  %v9070_v29 = vld [vmem:[%s8862_s27 + $0x88] sm:$0xf] }
  0x3b   : > { %v503_v55 = vrot.slane %v501_v43, 5  ;;  %v509_v56 = vrot.slane %v507_v44, 5  ;;  %v513_v57 = vrot.slane %v511_v46, 4  ;;  %v517_v58 = vshll.u32 %v255_v25, 16 }
  0x3c   : > { %11390 = vst [vmem:[#allocation5_spill] sm:$0xff] %v9053_v47  ;;  %v486_v59 = vsel %vm8896_vm4, %v481_v51, %v485_v33  ;;  %v491_v60 = vrot.slane %v490_v52, 4  ;;  %v522_v62 = vshrl.u32 %v9040_v36, 16  ;;  %v525_v1 = vshll.u32 %v9040_v36, 16  ;;  %v261_v51 = vld [vmem:[%s8862_s27 + $0x8c] sm:$0x1] }
  0x3d   : > { %7905 = vmatmul.mubr.msk.bf16.gmra.mrb[12].mxu0 %vm715_vm3, %v9053_v47  ;;  %v504_v2 = vor.u32 %v503_v55, %v500_v53  ;;  %v514_v7 = vor.u32 %v513_v57, %v509_v56  ;;  %v519_v12 = vrot.slane %v517_v58, 5  ;;  %v531_v17 = vshll.u32 %v9044_v40, 16  ;;  %v9085_v55 = vld [vmem:[%s8862_s27 + $0x90] sm:$0xf] }
  0x3e   : > { %v496_v22 = vsel %vm8896_vm4, %v491_v60, %v495_v39  ;;  %v524_v23 = vrot.slane %v522_v62, 4  ;;  %v527_v24 = vrot.slane %v525_v1, 5  ;;  %v535_v25 = vshrl.u32 %v9044_v40, 16  ;;  %v9090_v62 = vld [vmem:[%s8862_s27 + $0x94] sm:$0xf] }
  0x3f   : > { %v9072_v32 = vcombine.low %v486_v59, %v496_v22  ;;  %v505_v33 = vrot.slane %v504_v2, 4  ;;  %v515_v37 = vrot.slane %v514_v7, 4  ;;  %v533_v38 = vrot.slane %v531_v17, 5  ;;  %v264_v22 = vld [vmem:[%s8862_s27 + $0x98] sm:$0x1] }
  0x40   : > { %v528_v3 = vor.u32 %v527_v24, %v524_v23  ;;  %v537_v41 = vrot.slane %v535_v25, 4  ;;  %v541_v43 = vshll.u32 %v258_v14, 16  ;;  %v546_v44 = vshrl.u32 %v9064_v20, 16 }
  0x41   : > { %11391 = vst [vmem:[#allocation6_spill] sm:$0xff] %v9072_v32  ;;  %7908 = vmatprep.mubr.msk.bf16.mxu0 %vm715_vm3, %v9072_v32  ;;  %v510_v39 = vsel %vm8896_vm4, %v505_v33, %v509_v56  ;;  %v520_v46 = vsel %vm8896_vm4, %v515_v37, %v519_v12  ;;  %v549_v52 = vshll.u32 %v9064_v20, 16  ;;  %v555_v53 = vshll.u32 %v9070_v29, 16 }
  0x42   : > { %v9087_v57 = vcombine.low %v510_v39, %v520_v46  ;;  %v529_v58 = vrot.slane %v528_v3, 4  ;;  %v538_v59 = vor.u32 %v537_v41, %v533_v38  ;;  %v543_v60 = vrot.slane %v541_v43, 5  ;;  %v9102_v3 = vld [vmem:[%s8862_s27 + $0x9c] sm:$0xf] }
  0x43   : > { %v548_v56 = vrot.slane %v546_v44, 4  ;;  %v551_v1 = vrot.slane %v549_v52, 5  ;;  %v557_v2 = vrot.slane %v555_v53, 5  ;;  %v559_v7 = vshrl.u32 %v9070_v29, 16  ;;  %v9110_v53 = vld [vmem:[%s8862_s27 + $0xa0] sm:$0xf] }
  0x44   : > { %11392 = vst [vmem:[#allocation7_spill] sm:$0xff] %v9087_v57  ;;  %v534_v12 = vsel %vm8896_vm4, %v529_v58, %v533_v38  ;;  %v539_v14 = vrot.slane %v538_v59, 4  ;;  %v565_v17 = vshll.u32 %v261_v51, 16  ;;  %v570_v23 = vshrl.u32 %v9085_v55, 16 }
  0x45   : > { %7909 = vmatmul.mubr.msk.bf16.gmra.mrb[16].mxu0 %vm715_vm3, %v9087_v57  ;;  %v552_v24 = vor.u32 %v551_v1, %v548_v56  ;;  %v561_v25 = vrot.slane %v559_v7, 4  ;;  %v573_v33 = vshll.u32 %v9085_v55, 16  ;;  %v579_v37 = vshll.u32 %v9090_v62, 16 }
  0x46   : > { %v544_v38 = vsel %vm8896_vm4, %v539_v14, %v543_v60  ;;  %v567_v41 = vrot.slane %v565_v17, 5  ;;  %v572_v43 = vrot.slane %v570_v23, 4  ;;  %v583_v44 = vshrl.u32 %v9090_v62, 16  ;;  %v267_v14 = vld [vmem:[%s8862_s27 + $0xa4] sm:$0x1] }
  0x47   : > { %v9107_v39 = vcombine.low %v534_v12, %v544_v38  ;;  %v553_v46 = vrot.slane %v552_v24, 4  ;;  %v562_v51 = vor.u32 %v561_v25, %v557_v2  ;;  %v575_v52 = vrot.slane %v573_v33, 5  ;;  %v9121_v33 = vld [vmem:[%s8862_s27 + $0xa8] sm:$0xf] }
  0x48   : > { %v581_v58 = vrot.slane %v579_v37, 5  ;;  %v585_v59 = vrot.slane %v583_v44, 4  ;;  %v589_v56 = vshll.u32 %v264_v22, 16  ;;  %v594_v1 = vshrl.u32 %v9102_v3, 16 }
  0x49   : > { %11393 = vst [vmem:[#allocation8_spill] sm:$0xff] %v9107_v39  ;;  %7912 = vmatprep.mubr.msk.bf16.mxu0 %vm715_vm3, %v9107_v39  ;;  %v558_v60 = vsel %vm8896_vm4, %v553_v46, %v557_v2  ;;  %v563_v7 = vrot.slane %v562_v51, 4  ;;  %v576_v12 = vor.u32 %v575_v52, %v572_v43  ;;  %v597_v17 = vshll.u32 %v9102_v3, 16  ;;  %v9127_v43 = vld [vmem:[%s8862_s27 + $0xac] sm:$0xf] }
  0x4a   : > { %v586_v23 = vor.u32 %v585_v59, %v581_v58  ;;  %v591_v24 = vrot.slane %v589_v56, 5  ;;  %v596_v25 = vrot.slane %v594_v1, 4  ;;  %v603_v22 = vshll.u32 %v9110_v53, 16  ;;  %v270_v39 = vld [vmem:[%s8862_s27 + $0xb0] sm:$0x1] }
  0x4b   : > { %v568_v37 = vsel %vm8896_vm4, %v563_v7, %v567_v41  ;;  %v577_v38 = vrot.slane %v576_v12, 4  ;;  %v599_v44 = vrot.slane %v597_v17, 5  ;;  %v607_v2 = vshrl.u32 %v9110_v53, 16  ;;  %v271_v17 = vld [vmem:[%s8862_s27 + $0xb4] sm:$0xf] }
  0x4c   : > { %v9129_v46 = vcombine.low %v558_v60, %v568_v37  ;;  %v587_v51 = vrot.slane %v586_v23, 4  ;;  %v605_v52 = vrot.slane %v603_v22, 5  ;;  %v613_v59 = vshll.u32 %v267_v14, 16  ;;  %v272_v37 = vld [vmem:[%s8862_s27 + $0xb8] sm:$0xf] }
  0x4d   : > { %v582_v56 = vsel %vm8896_vm4, %v577_v38, %v581_v58  ;;  %v600_v1 = vor.u32 %v599_v44, %v596_v25  ;;  %v609_v16 = vrot.slane %v607_v2, 4  ;;  %v618_v41 = vshrl.u32 %v9121_v33, 16 }
  0x4e   : > { %11394 = vst [vmem:[#allocation9_spill] sm:$0xff] %v9129_v46  ;;  %7913 = vmatmul.mubr.msk.bf16.gmra.mrb[20].mxu0 %vm715_vm3, %v9129_v46  ;;  %v592_v7 = vsel %vm8896_vm4, %v587_v51, %v591_v24  ;;  %v615_v60 = vrot.slane %v613_v59, 5  ;;  %v621_v12 = vshll.u32 %v9121_v33, 16  ;;  %v627_v14 = vshll.u32 %v9127_v43, 16 }
  0x4f   : > { %v9142_v23 = vcombine.low %v582_v56, %v592_v7  ;;  %v601_v58 = vrot.slane %v600_v1, 4  ;;  %v610_v25 = vor.u32 %v609_v16, %v605_v52  ;;  %v620_v22 = vrot.slane %v618_v41, 4  ;;  %v273_v16 = vld [vmem:[%s8862_s27 + $0xbc] sm:$0x1] }
  0x50   : > { %v623_v38 = vrot.slane %v621_v12, 5  ;;  %v629_v44 = vrot.slane %v627_v14, 5  ;;  %v631_v2 = vshrl.u32 %v9127_v43, 16  ;;  %v637_v46 = vshll.u32 %v270_v39, 16 }
  0x51   : > { %11395 = vst [vmem:[#allocation10_spill] sm:$0xff] %v9142_v23  ;;  %7916 = vmatprep.mubr.msk.bf16.mxu0 %vm715_vm3, %v9142_v23  ;;  %v606_v24 = vsel %vm8896_vm4, %v601_v58, %v605_v52  ;;  %v611_v51 = vrot.slane %v610_v25, 4  ;;  %v642_v59 = vshrl.u32 %v271_v17, 16  ;;  %v645_v56 = vshll.u32 %v271_v17, 16 }
  0x52   : > { %v624_v7 = vor.u32 %v623_v38, %v620_v22  ;;  %v633_v1 = vrot.slane %v631_v2, 4  ;;  %v639_v57 = vrot.slane %v637_v46, 5  ;;  %v651_v41 = vshll.u32 %v272_v37, 16 }
  0x53   : > { %v616_v12 = vsel %vm8896_vm4, %v611_v51, %v615_v60  ;;  %v644_v14 = vrot.slane %v642_v59, 4  ;;  %v647_v32 = vrot.slane %v645_v56, 5  ;;  %v655_v39 = vshrl.u32 %v272_v37, 16 }
  0x54   : > { %v9153_v47 = vcombine.low %v606_v24, %v616_v12  ;;  %v625_v23 = vrot.slane %v624_v7, 4  ;;  %v634_v26 = vor.u32 %v633_v1, %v629_v44  ;;  %v653_v49 = vrot.slane %v651_v41, 5 }
  0x55   : > { %v648_v52 = vor.u32 %v647_v32, %v644_v14  ;;  %v657_v58 = vrot.slane %v655_v39, 4  ;;  %v661_v25 = vshll.u32 %v273_v16, 16  ;;  %v7172_v22 = vcombine.low %v8876_v11, %v8879_v13 }
  0x56   : > { %7917 = vmatmul.mubr.msk.bf16.gmra.mrb[24].mxu0 %vm715_vm3, %v9153_v47  ;;  %v630_v46 = vsel %vm8896_vm4, %v625_v23, %v629_v44  ;;  %v635_v60 = vrot.slane %v634_v26, 4  ;;  %v7173_v38 = vcombine.low %v8886_v21, %v8892_v30  ;;  %v7174_v2 = vcombine.low %v8905_v45, %v8913_v50  ;;  %v276_v23 = vld [vmem:[%s8862_s27 + $0xc8] sm:$0x1] }
  0x57   : > { %v649_v24 = vrot.slane %v648_v52, 4  ;;  %v658_v32 = vor.u32 %v657_v58, %v653_v49  ;;  %v663_v51 = vrot.slane %v661_v25, 5  ;;  %v7175_v59 = vcombine.low %v8923_v0, %v8928_v8  ;;  %v1744_v52 = vld [vmem:[#allocation2 + $0x18] sm:$0x1]  ;;  %v1741_v25 = vld [vmem:[#allocation2 + $0xc] sm:$0x1] }
  0x58   : > { %v640_v11 = vsel %vm8896_vm4, %v635_v60, %v639_v57  ;;  %v7176_v13 = vcombine.low %v8948_v27, %v8954_v34  ;;  %v7177_v26 = vcombine.low %v8969_v48, %v8975_v61  ;;  %v7178_v21 = vcombine.low %v8984_v10, %v8996_v28  ;;  %v1800_v60 = vld [vmem:[#allocation2 + $0x20] sm:$0x1] }
  0x59   : > { %v9175_v30 = vcombine.low %v630_v46, %v640_v11  ;;  %v654_v45 = vsel %vm8896_vm4, %v649_v24, %v653_v49  ;;  %v659_v50 = vrot.slane %v658_v32, 4  ;;  %v7179_v0 = vcombine.low %v9006_v42, %v9015_v54  ;;  %v1750_v32 = vld [vmem:[#allocation2 + $0x30] sm:$0x1] }
  0x5a   : > { %v7180_v8 = vcombine.low %v9023_v6, %v9029_v18  ;;  %v7181_v27 = vcombine.low %v9040_v36, %v9044_v40  ;;  %v7182_v34 = vcombine.low %v9064_v20, %v9070_v29  ;;  %v7183_v48 = vcombine.low %v9085_v55, %v9090_v62  ;;  %v7221_v18 = vld [vmem:[%s11331_s1 + $0x6] sm:$0x3]  ;;  %v11397_v40 = vld [vmem:[#allocation3_spill] sm:$0xff]  ;;  %v11399_v29 = vld [vmem:[#allocation5_spill] sm:$0xff] }
  0x5b   : > { %7920 = vmatprep.mubr.msk.bf16.mxu0 %vm715_vm3, %v9175_v30  ;;  %v664_v61 = vsel %vm8896_vm4, %v659_v50, %v663_v51  ;;  %v7184_v10 = vcombine.low %v9102_v3, %v9110_v53  ;;  %v7185_v28 = vcombine.low %v9121_v33, %v9127_v43  ;;  %v7186_v42 = vcombine.low %v271_v17, %v272_v37  ;;  %v11398_v20 = vld [vmem:[#allocation4_spill] sm:$0xff]  ;;  %v11403_v3 = vld [vmem:[#allocation9_spill] sm:$0xff]  ;;  %v11404_v37 = vld [vmem:[#allocation10_spill] sm:$0xff] }
  0x5c   : > { %v9197_v49 = vcombine.low %v654_v45, %v664_v61  ;;  %v11396_v54 = vcombine.low %v8865_v4, %v8868_v5  ;;  %v1232_v6 = vsel %vm764_vm0, %v8937_v15, 0  ;;  %v1460_v4 = vsel %vm764_vm0, %v7221_v18, 0  ;;  %v274_v5 = vld [vmem:[%s8862_s27 + $0xc0] sm:$0xf]  ;;  %v275_v15 = vld [vmem:[%s8862_s27 + $0xc4] sm:$0xf] }
  0x5d   : > { %v7204_v36 = vcombine.low %v274_v5, %v275_v15  ;;  %v1431_v55 = vshll.u32 %v274_v5, 16  ;;  %v1437_v57 = vshll.u32 %v275_v15, 16  ;;  %v1441_v62 = vshrl.u32 %v275_v15, 16  ;;  %v1756_v50 = vld [vmem:[#allocation2 + $0x48] sm:$0x1] }
  0x5e   : > { %7921 = vmatmul.mubr.msk.bf16.gmra.mrb[28].mxu0 %vm715_vm3, %v9197_v49  ;;  %v1447_v7 = vshll.u32 %v276_v23, 16  ;;  %v1745_v58 = vsel %vm9283_vm7, 0, %v1744_v52  ;;  %v11408_v46 = vmov 0  ;;  %v1751_v51 = vsel %vm9283_vm7, 0, %v1750_v32  ;;  %v1812_v61 = vld [vmem:[#allocation2 + $0x50] sm:$0x1] }
  0x5f   : > { %7926 = vmatprep.mubr.msk.bf16.mxu0 %vm715_vm3, %v11396_v54  ;;  %v1433_v33 = vrot.slane %v1431_v55, 5  ;;  %v1439_v43 = vrot.slane %v1437_v57, 5  ;;  %v1443_v17 = vrot.slane %v1441_v62, 4  ;;  %1746 = vst [vmem:[#allocation2 + $0x18] sm:$0x1] %v1745_v58  ;;  %v11409_v46 = vsel %vm9293_vm9, 4294967295, %v11408_v46 }
  0x60   : > { %v1449_v41 = vrot.slane %v1447_v7, 5  ;;  %11410 = vst [vmem:[#allocation4_spill] sm:$0xff] %v11409_v46  ;;  %1752 = vst [vmem:[#allocation2 + $0x30] sm:$0x1] %v1751_v51  ;;  %v1830_v32 = vld [vmem:[#allocation2 + $0x98] sm:$0x1] }
  0x61   : > { %v1444_v56 = vor.u32 %v1443_v17, %v1439_v43 }
  0x63   : > { %v1445_v16 = vrot.slane %v1444_v56, 4  ;;  %v1765_v56 = vld [vmem:[#allocation2 + $0x6c] sm:$0x1] }
  0x65   : > { %v1450_v14 = vsel %vm8896_vm4, %v1445_v16, %v1449_v41  ;;  %v1766_v41 = vsel %vm9283_vm7, 0, %v1765_v56 }
  0x66   : > { %7927 = vmatmul.mubr.msk.bf16.vlgmr.msra.gmra.mrb[0].mxu0 %vm715_vm3, %v7172_v22  ;;  %1767 = vst [vmem:[#allocation2 + $0x6c] sm:$0x1] %v1766_v41 }
  0x67   : > { %7959 = vmatpush3.bf16.msra.mxu0 %v1232_v6  ;;  %7930 = vmatprep.mubr.msk.bf16.mxu0 %vm715_vm3, %v7173_v38  ;;  %v1762_v6 = vld [vmem:[#allocation2 + $0x60] sm:$0x1] }
  0x68   : > { %8689 = vmatprep.subr.msk.bf16.mxu0 %vm764_vm0, %v7221_v18  ;;  %vm3426_vm0 = vcmask 1046532  }
  0x69   : > { %vm9624_vm1 = vmor %vm3425_vm15, %vm3426_vm0 }
  0x6e   : > { %7931 = vmatmul.mubr.msk.bf16.gmra.mrb[4].mxu0 %vm715_vm3, %v7174_v2 }
  0x6f   : > { %7934 = vmatprep.mubr.msk.bf16.mxu0 %vm715_vm3, %v7175_v59 }
  0x76   : > { %7935 = vmatmul.mubr.msk.bf16.gmra.mrb[8].mxu0 %vm715_vm3, %v7176_v13 }
  0x77   : > { %7938 = vmatprep.mubr.msk.bf16.mxu0 %vm715_vm3, %v7177_v26 }
  0x7e   : > { %7939 = vmatmul.mubr.msk.bf16.gmra.mrb[12].mxu0 %vm715_vm3, %v7178_v21 }
  0x7f   : > { %7942 = vmatprep.mubr.msk.bf16.mxu0 %vm715_vm3, %v7179_v0 }
  0x86   : > { %7943 = vmatmul.mubr.msk.bf16.gmra.mrb[16].mxu0 %vm715_vm3, %v7180_v8 }
  0x87   : > { %7946 = vmatprep.mubr.msk.bf16.mxu0 %vm715_vm3, %v7181_v27 }
  0x8e   : > { %7947 = vmatmul.mubr.msk.bf16.gmra.mrb[20].mxu0 %vm715_vm3, %v7182_v34 }
  0x8f   : > { %7950 = vmatprep.mubr.msk.bf16.mxu0 %vm715_vm3, %v7183_v48 }
  0x96   : > { %7951 = vmatmul.mubr.msk.bf16.gmra.mrb[24].mxu0 %vm715_vm3, %v7184_v10 }
  0x97   : > { %7954 = vmatprep.mubr.msk.bf16.mxu0 %vm715_vm3, %v7185_v28 }
  0x9e   : > { %7955 = vmatmul.mubr.msk.bf16.gmra.mrb[28].mxu0 %vm715_vm3, %v7186_v42 }
  0x9f   : > { %7960 = vmatprep.mubr.msk.bf16.mxu0 %vm715_vm3, %v7172_v22  ;;  %v1742_v22 = vsel %vm9283_vm7, 0, %v1741_v25 }
  0xa0   : > { %1743 = vst [vmem:[#allocation2 + $0xc] sm:$0x1] %v1742_v22  ;;  %v1821_v22 = vld [vmem:[#allocation2 + $0x74] sm:$0x1] }
  0xa6   : > { %7961 = vmatmul.mubr.msk.bf16.vlgmr.msra.gmra.mrb[0].mxu0 %vm715_vm3, %v7173_v38  ;;  %v1801_v38 = vsel %vm9293_vm9, 0, %v1800_v60  ;;  %v1822_v60 = vsel %vm9293_vm9, 0, %v1821_v22 }
  0xa7   : > { %7993 = vmatpush3.bf16.msra.mxu0 %v1460_v4  ;;  %7964 = vmatprep.mubr.msk.bf16.mxu0 %vm715_vm3, %v7174_v2  ;;  %v1797_v2 = vld [vmem:[#allocation2 + $0x14] sm:$0x1]  ;;  %1802 = vst [vmem:[#allocation2 + $0x20] sm:$0x1] %v1801_v38  ;;  %v1763_v4 = vsel %vm9283_vm7, 0, %v1762_v6 }
  0xa8   : > { %v1798_v24 = vsel %vm9293_vm9, 0, %v1797_v2  ;;  %1764 = vst [vmem:[#allocation2 + $0x60] sm:$0x1] %v1763_v4  ;;  %1823 = vst [vmem:[#allocation2 + $0x74] sm:$0x1] %v1822_v60 }
  0xa9   : > { %1799 = vst [vmem:[#allocation2 + $0x14] sm:$0x1] %v1798_v24  ;;  %v1774_v38 = vld [vmem:[#allocation2 + $0x90] sm:$0x1]  ;;  %v1771_v24 = vld [vmem:[#allocation2 + $0x84] sm:$0x1] }
  0xaa   : > { %v1775_v2 = vsel %vm9283_vm7, 0, %v1774_v38  ;;  %v1772_v51 = vsel %vm9283_vm7, 0, %v1771_v24  ;;  %v9388_v4 = vld [vmem:[%s11332_s2] ss:$0 sm:$0xff] }
  0xab   : > { %1776 = vst [vmem:[#allocation2 + $0x90] sm:$0x1] %v1775_v2  ;;  %1773 = vst [vmem:[#allocation2 + $0x84] sm:$0x1] %v1772_v51  ;;  %v2269_v2 = vld [vmem:[#allocation2 + $0xc] sm:$0xf] }
  0xae   : > { %7965 = vmatmul.mubr.msk.bf16.gmra.mrb[4].mxu0 %vm715_vm3, %v7175_v59  ;;  %v1747_v59 = vld [vmem:[#allocation2 + $0x24] sm:$0x1] }
  0xaf   : > { %7968 = vmatprep.mubr.msk.bf16.mxu0 %vm715_vm3, %v7176_v13  ;;  %v1748_v11 = vsel %vm9283_vm7, 0, %v1747_v59  ;;  %v8805_v13 = vmov 0   ;;  %v1831_v59 = vsel %vm9293_vm9, 0, %v1830_v32 }
  0xb0   : > { %1749 = vst [vmem:[#allocation2 + $0x24] sm:$0x1] %v1748_v11  ;;  %1727 = vst.msk [vmem:[#allocation2] sm:$0xf] %vm1726_vm10, %v8805_v13  ;;  %v1827_v11 = vld [vmem:[#allocation2 + $0x8c] sm:$0x1] }
  0xb1   : > { %1728 = vst.msk [vmem:[#allocation2 + $0x4] sm:$0xf] %vm1726_vm10, %v8805_v13  ;;  %1732 = vst.msk [vmem:[#allocation2 + $0xcc] sm:$0xf] %vm1726_vm10, %v8805_v13 }
  0xb2   : > { %1730 = vst.msk [vmem:[#allocation2 + $0x8] sm:$0x1] %vm1729_vm5, %v8805_v13  ;;  %1734 = vst.msk [vmem:[#allocation2 + $0xd4] sm:$0x1] %vm1729_vm5, %v8805_v13 }
  0xb3   : > { %1733 = vst.msk [vmem:[#allocation2 + $0xd0] sm:$0xf] %vm1726_vm10, %v8805_v13  ;;  %1832 = vst [vmem:[#allocation2 + $0x98] sm:$0x1] %v1831_v59  ;;  %v1828_v13 = vsel %vm9293_vm9, 0, %v1827_v11 }
  0xb4   : > { %1829 = vst [vmem:[#allocation2 + $0x8c] sm:$0x1] %v1828_v13 }
  0xb6   : > { %7969 = vmatmul.mubr.msk.bf16.gmra.mrb[8].mxu0 %vm715_vm3, %v7177_v26  ;;  %v1806_v26 = vld [vmem:[#allocation2 + $0x38] sm:$0x1] }
  0xb7   : > { %7972 = vmatprep.mubr.msk.bf16.mxu0 %vm715_vm3, %v7178_v21  ;;  %v1807_v21 = vsel %vm9293_vm9, 0, %v1806_v26  ;;  %v1780_v26 = vld [vmem:[#allocation2 + $0xa8] sm:$0x1] }
  0xb8   : > { %1808 = vst [vmem:[#allocation2 + $0x38] sm:$0x1] %v1807_v21  ;;  %v1781_v21 = vsel %vm9283_vm7, 0, %v1780_v26  ;;  %v2280_v26 = vld [vmem:[#allocation2 + $0x20] sm:$0x1] }
  0xb9   : > { %1782 = vst [vmem:[#allocation2 + $0xa8] sm:$0x1] %v1781_v21 }
  0xbe   : > { %7973 = vmatmul.mubr.msk.bf16.gmra.mrb[12].mxu0 %vm715_vm3, %v7179_v0  ;;  %v1738_v0 = vld [vmem:[#allocation2] sm:$0x1] }
  0xbf   : > { %7976 = vmatprep.mubr.msk.bf16.mxu0 %vm715_vm3, %v7180_v8  ;;  %v1757_v8 = vsel %vm9283_vm7, 0, %v1756_v50 }
  0xc0   : > { %1758 = vst [vmem:[#allocation2 + $0x48] sm:$0x1] %v1757_v8  ;;  %v1833_v8 = vld [vmem:[#allocation2 + $0xa4] sm:$0x1] }
  0xc6   : > { %7977 = vmatmul.mubr.msk.bf16.gmra.mrb[16].mxu0 %vm715_vm3, %v7181_v27  ;;  %v1753_v27 = vld [vmem:[#allocation2 + $0x3c] sm:$0x1] }
  0xc7   : > { %7980 = vmatprep.mubr.msk.bf16.mxu0 %vm715_vm3, %v7182_v34  ;;  %v1739_v34 = vsel %vm9283_vm7, 0, %v1738_v0 }
  0xc8   : > { %1740 = vst [vmem:[#allocation2] sm:$0x1] %v1739_v34  ;;  %v1786_v34 = vld [vmem:[#allocation2 + $0xc0] sm:$0x1] }
  0xce   : > { %7981 = vmatmul.mubr.msk.bf16.gmra.mrb[20].mxu0 %vm715_vm3, %v7183_v48  ;;  %v1754_v48 = vsel %vm9283_vm7, 0, %v1753_v27  ;;  %v1834_v27 = vsel %vm9293_vm9, 0, %v1833_v8  ;;  %v2273_v8 = vld [vmem:[#allocation2 + $0x14] sm:$0x1] }
  0xcf   : > { %7984 = vmatprep.mubr.msk.bf16.mxu0 %vm715_vm3, %v7184_v10  ;;  %1755 = vst [vmem:[#allocation2 + $0x3c] sm:$0x1] %v1754_v48  ;;  %v1813_v10 = vsel %vm9293_vm9, 0, %v1812_v61  ;;  %v2381_v18 = vld [vmem:[#allocation2] sm:$0xf]  ;;  %v1787_v48 = vsel %vm9283_vm7, 0, %v1786_v34 }
  0xd0   : > { %1814 = vst [vmem:[#allocation2 + $0x50] sm:$0x1] %v1813_v10  ;;  %v2432_v15 = vshrl.u32 %v2381_v18, 16  ;;  %1835 = vst [vmem:[#allocation2 + $0xa4] sm:$0x1] %v1834_v27 }
  0xd1   : > { %1788 = vst [vmem:[#allocation2 + $0xc0] sm:$0x1] %v1787_v48  ;;  %v1783_v61 = vld [vmem:[#allocation2 + $0xb4] sm:$0x1] }
  0xd2   : > { %v2434_v57 = vrot.slane %v2432_v15, 4  ;;  %v1784_v10 = vsel %vm9283_vm7, 0, %v1783_v61 }
  0xd3   : > { %1785 = vst [vmem:[#allocation2 + $0xb4] sm:$0x1] %v1784_v10 }
  0xd6   : > { %7985 = vmatmul.mubr.msk.bf16.gmra.mrb[24].mxu0 %vm715_vm3, %v7185_v28  ;;  %v1809_v28 = vld [vmem:[#allocation2 + $0x44] sm:$0x1] }
  0xd7   : > { %7988 = vmatprep.mubr.msk.bf16.mxu0 %vm715_vm3, %v7186_v42  ;;  %v1794_v42 = vld [vmem:[#allocation2 + $0x8] sm:$0x1] }
  0xd8   : > { %v1795_v54 = vsel %vm9293_vm9, 0, %v1794_v42 }
  0xd9   : > { %1796 = vst [vmem:[#allocation2 + $0x8] sm:$0x1] %v1795_v54  ;;  %v9376_v54 = vld [vmem:[%s11333_s3 + $0x10] sm:$0xff]  }
  0xda   : > { %8332 = vmatprep.subr.bf16.mxu1 %v9376_v54 }
  0xdb   : > { %8333 = vmatpush3.bf16.msra.mxu1 %v9376_v54 }
  0xde   : > { %7989 = vmatmul.mubr.msk.bf16.gmra.mrb[28].mxu0 %vm715_vm3, %v7204_v36 }
  0xdf   : > { %7994 = vmatprep.mubr.msk.bf16.mxu0 %vm715_vm3, %v8930_v9  ;;  %v11400_v9 = vld [vmem:[#allocation6_spill] sm:$0xff] }
  0xe0   : > { %v2415_v55 = vld [vmem:[#allocation2 + $0x8] sm:$0x1] }
  0xe6   : > { %7995 = vmatmul.mubr.msk.bf16.vlgmr.msra.gmra.mrb[0].mxu0 %vm715_vm3, %v8956_v35  ;;  %v11401_v35 = vld [vmem:[#allocation7_spill] sm:$0xff] }
  0xe7   : > { %7998 = vmatprep.mubr.msk.bf16.mxu0 %vm715_vm3, %v8978_v63  ;;  %v11402_v63 = vld [vmem:[#allocation8_spill] sm:$0xff] }
  0xee   : > { %7999 = vmatmul.mubr.msk.bf16.gmra.mrb[4].mxu0 %vm715_vm3, %v8991_v19  ;;  %v1428_v19 = vshrl.u32 %v274_v5, 16  ;;  %v1759_v5 = vld [vmem:[#allocation2 + $0x54] sm:$0x1] }
  0xef   : > { %8002 = vmatprep.mubr.msk.bf16.mxu0 %vm715_vm3, %v11397_v40  ;;  %v1760_v36 = vsel %vm9283_vm7, 0, %v1759_v5  ;;  %v1818_v40 = vld [vmem:[#allocation2 + $0x68] sm:$0x1] }
  0xf0   : > { %v1430_v53 = vrot.slane %v1428_v19, 4  ;;  %1761 = vst [vmem:[#allocation2 + $0x54] sm:$0x1] %v1760_v36 }
  0xf2   : > { %v1434_v44 = vor.u32 %v1433_v33, %v1430_v53  ;;  %v2451_v33 = vshll.u32 %v2415_v55, 16 }
  0xf4   : > { %v1435_v1 = vrot.slane %v1434_v44, 4  ;;  %v2453_v16 = vrot.slane %v2451_v33, 5 }
  0xf6   : > { %8003 = vmatmul.mubr.msk.bf16.gmra.mrb[8].mxu0 %vm715_vm3, %v11398_v20  ;;  %v1440_v12 = vsel %vm8896_vm4, %v1435_v1, %v1439_v43  ;;  %v2382_v20 = vld [vmem:[#allocation2 + $0x4] sm:$0xf] }
  0xf7   : > { %8006 = vmatprep.mubr.msk.bf16.mxu0 %vm715_vm3, %v11399_v29  ;;  %v7222_v39 = vcombine.low %v1440_v12, %v1450_v14  ;;  %v2435_v29 = vshll.u32 %v2381_v18, 16  ;;  %v2445_v53 = vshrl.u32 %v2382_v20, 16  ;;  %v8719_v18 = vld [vmem:[%s11333_s3 + $0x18] sm:$0xff]  }
  0xf8   : > { %8128 = vmatprep.subr.bf16.mxu1 %v8719_v18 }
  0xf9   : > { %v2437_v62 = vrot.slane %v2435_v29, 5  ;;  %v2447_v23 = vrot.slane %v2445_v53, 4 }
  0xfb   : > { %v2438_v43 = vor.u32 %v2437_v62, %v2434_v57 }
  0xfd   : > { %v2439_v7 = vrot.slane %v2438_v43, 4 }
  0xfe   : > { %8007 = vmatmul.mubr.msk.bf16.gmra.mrb[12].mxu0 %vm715_vm3, %v11400_v9  ;;  %v1819_v9 = vsel %vm9293_vm9, 0, %v1818_v40 }
  0xff   : > { %8010 = vmatprep.mubr.msk.bf16.mxu0 %vm715_vm3, %v11401_v35  ;;  %v1815_v35 = vld [vmem:[#allocation2 + $0x5c] sm:$0x1]  ;;  %1820 = vst [vmem:[#allocation2 + $0x68] sm:$0x1] %v1819_v9 }
 0x100   : > { %v1816_v19 = vsel %vm9293_vm9, 0, %v1815_v35 }
 0x101   : > { %1817 = vst [vmem:[#allocation2 + $0x5c] sm:$0x1] %v1816_v19 }
 0x106   : > { %8011 = vmatmul.mubr.msk.bf16.gmra.mrb[16].mxu0 %vm715_vm3, %v11402_v63  ;;  %v8717_v63 = vld [vmem:[%s11333_s3 + $0x8] sm:$0xff]  }
 0x107   : > { %8014 = vmatprep.mubr.msk.bf16.mxu0 %vm715_vm3, %v11403_v3  ;;  %8026 = vmatprep.subr.bf16.mxu0 %v8717_v63  ;;  %v2441_v3 = vshll.u32 %v2382_v20, 16 }
 0x108   : > { %8027 = vmatpush3.bf16.msra.mxu0 %v8717_v63 }
 0x109   : > { %v2443_v17 = vrot.slane %v2441_v3, 5 }
 0x10b   : > { %v2448_v1 = vor.u32 %v2447_v23, %v2443_v17  ;;  %v2444_v12 = vsel %vm8896_vm4, %v2439_v7, %v2443_v17 }
 0x10d   : > { %v2449_v14 = vrot.slane %v2448_v1, 4 }
 0x10e   : > { %8015 = vmatmul.mubr.msk.bf16.gmra.mrb[20].mxu0 %vm715_vm3, %v11404_v37  ;;  %v1768_v37 = vld [vmem:[#allocation2 + $0x78] sm:$0x1] }
 0x10f   : > { %8018 = vmatprep.mubr.msk.bf16.mxu0 %vm715_vm3, %v9153_v47  ;;  %v11405_v47 = vmov 0  ;;  %v1769_v44 = vsel %vm9283_vm7, 0, %v1768_v37  ;;  %v2454_v52 = vsel %vm8896_vm4, %v2449_v14, %v2453_v16  ;;  %v2276_v14 = vld [vmem:[#allocation2 + $0x18] sm:$0xf] }
 0x110   : > { %v11406_v47 = vsel %vm9283_vm7, 4294967295, %v11405_v47  ;;  %1770 = vst [vmem:[#allocation2 + $0x78] sm:$0x1] %v1769_v44  ;;  %v7274_v25 = vcombine.low %v2444_v12, %v2454_v52 }
 0x111   : > { %11407 = vst [vmem:[#allocation3_spill] sm:$0xff] %v11406_v47 }
 0x116   : > { %8019 = vmatmul.mubr.msk.bf16.gmra.mrb[24].mxu0 %vm715_vm3, %v9175_v30  ;;  %v1803_v30 = vld [vmem:[#allocation2 + $0x2c] sm:$0x1] }
 0x117   : > { %8022 = vmatprep.mubr.msk.bf16.mxu0 %vm715_vm3, %v9197_v49  ;;  %v1804_v45 = vsel %vm9293_vm9, 0, %v1803_v30  ;;  %v1810_v49 = vsel %vm9293_vm9, 0, %v1809_v28  ;;  %v1777_v30 = vld [vmem:[#allocation2 + $0x9c] sm:$0x1]  ;;  %v1842_v28 = vld [vmem:[#allocation2 + $0xc8] sm:$0x1] }
 0x118   : > { %1805 = vst [vmem:[#allocation2 + $0x2c] sm:$0x1] %v1804_v45  ;;  %1811 = vst [vmem:[#allocation2 + $0x44] sm:$0x1] %v1810_v49  ;;  %v1836_v45 = vld [vmem:[#allocation2 + $0xb0] sm:$0x1] }
 0x119   : > { %v1778_v50 = vsel %vm9283_vm7, 0, %v1777_v30  ;;  %v1837_v0 = vsel %vm9293_vm9, 0, %v1836_v45  ;;  %v1843_v42 = vsel %vm9293_vm9, 0, %v1842_v28  ;;  %v1839_v49 = vld [vmem:[#allocation2 + $0xbc] sm:$0x1] }
 0x11a   : > { %1779 = vst [vmem:[#allocation2 + $0x9c] sm:$0x1] %v1778_v50  ;;  %1838 = vst [vmem:[#allocation2 + $0xb0] sm:$0x1] %v1837_v0  ;;  %v1840_v6 = vsel %vm9293_vm9, 0, %v1839_v49 }
 0x11b   : > { %1844 = vst [vmem:[#allocation2 + $0xc8] sm:$0x1] %v1843_v42  ;;  %1841 = vst [vmem:[#allocation2 + $0xbc] sm:$0x1] %v1840_v6 }
 0x11e   : > { %8023 = vmatmul.mubr.msk.bf16.gmra.mrb[28].mxu0 %vm715_vm3, %v7222_v39  ;;  %v1824_v39 = vld [vmem:[#allocation2 + $0x80] sm:$0x1] }
 0x11f   : > { %v1825_v58 = vsel %vm9293_vm9, 0, %v1824_v39  ;;  %8028 = vmatprep.mubr.msk.bf16.mxu0 %vm2872_vm11, %v7274_v25 }
 0x120   : > { %1826 = vst [vmem:[#allocation2 + $0x80] sm:$0x1] %v1825_v58 }
 0x1b9   : > { %v7996_v5 = vpop.f32.mrb[0].mxu0 }
 0x1ba   : > { %v1664_v15 = vadd.f32 %v7996_v5, %v9388_v4  ;;  %v1496_v36 = vpop.f32.mrb[1].mxu0 }
 0x1bb   : > { %v1662_v40 = vadd.f32 %v9388_v4, %v1496_v36  ;;  %v7997_v20 = vpop.f32.mrb[2].mxu0 }
 0x1bc   : > { %v1696_v29 = vmax.f32 %v1664_v15, 0.0  ;;  %v1665_v9 = vadd.f32 %v7997_v20, %v9388_v4  ;;  %v1499_v35 = vpop.f32.mrb[3].mxu0 }
 0x1bd   : > { %v1694_v63 = vmax.f32 %v1662_v40, 0.0  ;;  %v1663_v19 = vadd.f32 %v9388_v4, %v1499_v35 }
 0x1be   : > { %v7639_v55 = vpack.c.bf16 %v1696_v29, %v1696_v29  ;;  %v1697_v57 = vmax.f32 %v1665_v9, 0.0 }
 0x1bf   : > { %v7637_v62 = vpack.c.bf16 %v1694_v63, %v1694_v63  ;;  %v1695_v3 = vmax.f32 %v1663_v19, 0.0  ;;  %v2290_v63 = vld [vmem:[#allocation2 + $0x30] sm:$0xf] }
 0x1c0   : > { %v1964_v53 = vshrl.u32 %v7639_v55, 16  ;;  %v7640_v33 = vpack.c.bf16 %v1697_v57, %v1697_v57  ;;  %v1967_v43 = vshll.u32 %v7639_v55, 16 }
 0x1c1   : > { %v1947_v17 = vshrl.u32 %v7637_v62, 16  ;;  %v1950_v23 = vshll.u32 %v7637_v62, 16  ;;  %v7638_v37 = vpack.c.bf16 %v1695_v3, %v1695_v3  ;;  %v8000_v44 = vpop.f32.mrb[4].mxu0 }
 0x1c2   : > { %v1966_v56 = vrot.slane %v1964_v53, 7  ;;  %v1972_v7 = vshrl.u32 %v7640_v33, 16  ;;  %v1975_v1 = vshll.u32 %v7640_v33, 16  ;;  %v1668_v16 = vadd.f32 %v8000_v44, %v9388_v4  ;;  %v1512_v41 = vpop.f32.mrb[5].mxu0  ;;  %v2283_v33 = vld [vmem:[#allocation2 + $0x24] sm:$0xf] }
 0x1c3   : > { %v1949_v39 = vrot.slane %v1947_v17, 7  ;;  %v1955_v52 = vshrl.u32 %v7638_v37, 16  ;;  %v1958_v58 = vshll.u32 %v7638_v37, 16  ;;  %v1666_v25 = vadd.f32 %v9388_v4, %v1512_v41  ;;  %v8001_v22 = vpop.f32.mrb[6].mxu0 }
 0x1c4   : > { %v1969_v60 = vor.u32 %v1967_v43, %v1966_v56  ;;  %v1970_v38 = vrot.slane %v1966_v56, 4  ;;  %v1974_v24 = vrot.slane %v1972_v7, 7  ;;  %v1700_v32 = vmax.f32 %v1668_v16, 0.0  ;;  %v1515_v51 = vpop.f32.mrb[7].mxu0 }
 0x1c5   : > { %v1952_v59 = vor.u32 %v1950_v23, %v1949_v39  ;;  %v1953_v11 = vrot.slane %v1949_v39, 4  ;;  %v1957_v21 = vrot.slane %v1955_v52, 7  ;;  %v1698_v30 = vmax.f32 %v1666_v25, 0.0 }
 0x1c6   : > { %v2277_v45 = vsel %vm9397_vm13, %v1969_v60, %v2276_v14  ;;  %v1977_v50 = vor.u32 %v1975_v1, %v1974_v24  ;;  %v1979_v0 = vrot.slane %v1974_v24, 4  ;;  %v7643_v27 = vpack.c.bf16 %v1700_v32, %v1700_v32  ;;  %v2294_v24 = vld [vmem:[#allocation2 + $0x38] sm:$0x1]  ;;  %v2287_v32 = vld [vmem:[#allocation2 + $0x2c] sm:$0x1] }
 0x1c7   : > { %2278 = vst [vmem:[#allocation2 + $0x18] sm:$0xf] %v2277_v45  ;;  %v2270_v34 = vsel %vm9397_vm13, %v1952_v59, %v2269_v2  ;;  %v1960_v48 = vor.u32 %v1958_v58, %v1957_v21  ;;  %v1962_v61 = vrot.slane %v1957_v21, 4  ;;  %v7641_v10 = vpack.c.bf16 %v1698_v30, %v1698_v30 }
 0x1c8   : > { %2271 = vst [vmem:[#allocation2 + $0xc] sm:$0xf] %v2270_v34  ;;  %v1978_v28 = vsel %vm9404_vm14, %v1970_v38, %v1977_v50  ;;  %v2281_v42 = vsel %vm9283_vm7, %v1979_v0, %v2280_v26  ;;  %v1998_v49 = vshrl.u32 %v7643_v27, 16  ;;  %v2001_v5 = vshll.u32 %v7643_v27, 16  ;;  %v2304_v34 = vld [vmem:[#allocation2 + $0x48] sm:$0xf] }
 0x1c9   : > { %2279 = vst.msk [vmem:[#allocation2 + $0x1c] sm:$0xf] %vm1726_vm10, %v1978_v28  ;;  %2282 = vst [vmem:[#allocation2 + $0x20] sm:$0x1] %v2281_v42  ;;  %v1961_v6 = vsel %vm9404_vm14, %v1953_v11, %v1960_v48  ;;  %v2274_v18 = vsel %vm9283_vm7, %v1962_v61, %v2273_v8  ;;  %v1981_v15 = vshrl.u32 %v7641_v10, 16  ;;  %v8004_v36 = vpop.f32.mrb[8].mxu0  ;;  %v1669_v20 = vadd.f32 %v8001_v22, %v9388_v4 }
 0x1ca   : > { %2272 = vst.msk [vmem:[#allocation2 + $0x10] sm:$0xf] %vm1726_vm10, %v1961_v6  ;;  %2275 = vst [vmem:[#allocation2 + $0x14] sm:$0x1] %v2274_v18  ;;  %v9422_v40 = vrot.slane %v1998_v49, 7  ;;  %v1667_v29 = vadd.f32 %v9388_v4, %v1515_v51  ;;  %v1672_v9 = vadd.f32 %v8004_v36, %v9388_v4  ;;  %v1528_v35 = vpop.f32.mrb[9].mxu0 }
 0x1cb   : > { %v1983_v19 = vrot.slane %v1981_v15, 7  ;;  %v1984_v55 = vshll.u32 %v7641_v10, 16  ;;  %v1670_v57 = vadd.f32 %v9388_v4, %v1528_v35  ;;  %v8005_v62 = vpop.f32.mrb[10].mxu0  ;;  %v1701_v43 = vmax.f32 %v1669_v20, 0.0 }
 0x1cc   : > { %v2003_v3 = vor.u32 %v2001_v5, %v9422_v40  ;;  %v2004_v53 = vrot.slane %v9422_v40, 4  ;;  %v1699_v17 = vmax.f32 %v1667_v29, 0.0  ;;  %v1531_v23 = vpop.f32.mrb[11].mxu0  ;;  %v1704_v56 = vmax.f32 %v1672_v9, 0.0  ;;  %v2297_v5 = vld [vmem:[#allocation2 + $0x3c] sm:$0xf] }
 0x1cd   : > { %v1986_v37 = vor.u32 %v1984_v55, %v1983_v19  ;;  %v1987_v44 = vrot.slane %v1983_v19, 4  ;;  %v1702_v7 = vmax.f32 %v1670_v57, 0.0  ;;  %v7644_v16 = vpack.c.bf16 %v1701_v43, %v1701_v43 }
 0x1ce   : > { %v2291_v1 = vsel %vm9397_vm13, %v2003_v3, %v2290_v63  ;;  %v7642_v41 = vpack.c.bf16 %v1699_v17, %v1699_v17  ;;  %v1673_v14 = vadd.f32 %v8005_v62, %v9388_v4  ;;  %v7647_v52 = vpack.c.bf16 %v1704_v56, %v1704_v56 }
 0x1cf   : > { %2292 = vst [vmem:[#allocation2 + $0x30] sm:$0xf] %v2291_v1  ;;  %v2284_v39 = vsel %vm9397_vm13, %v1986_v37, %v2283_v33  ;;  %v7645_v58 = vpack.c.bf16 %v1702_v7, %v1702_v7  ;;  %v1671_v25 = vadd.f32 %v9388_v4, %v1531_v23  ;;  %v2006_v22 = vshrl.u32 %v7644_v16, 16  ;;  %v2308_v1 = vld [vmem:[#allocation2 + $0x50] sm:$0x1] }
 0x1d0   : > { %2285 = vst [vmem:[#allocation2 + $0x24] sm:$0xf] %v2284_v39  ;;  %v2009_v60 = vshll.u32 %v7644_v16, 16  ;;  %v1989_v38 = vshrl.u32 %v7642_v41, 16  ;;  %v1992_v2 = vshll.u32 %v7642_v41, 16  ;;  %v2032_v51 = vshrl.u32 %v7647_v52, 16 }
 0x1d1   : > { %v2035_v59 = vshll.u32 %v7647_v52, 16  ;;  %v2015_v11 = vshrl.u32 %v7645_v58, 16  ;;  %v2018_v26 = vshll.u32 %v7645_v58, 16  ;;  %v8008_v21 = vpop.f32.mrb[12].mxu0  ;;  %v2008_v30 = vrot.slane %v2006_v22, 7 }
 0x1d2   : > { %v1991_v45 = vrot.slane %v1989_v38, 7  ;;  %v1705_v50 = vmax.f32 %v1673_v14, 0.0  ;;  %v1703_v0 = vmax.f32 %v1671_v25, 0.0  ;;  %v1544_v8 = vpop.f32.mrb[13].mxu0  ;;  %v9436_v27 = vrot.slane %v2032_v51, 7 }
 0x1d3   : > { %v9438_v48 = vrot.slane %v2015_v11, 7  ;;  %v1676_v61 = vadd.f32 %v8008_v21, %v9388_v4  ;;  %v1674_v10 = vadd.f32 %v9388_v4, %v1544_v8  ;;  %v8009_v28 = vpop.f32.mrb[14].mxu0  ;;  %v2011_v42 = vor.u32 %v2009_v60, %v2008_v30  ;;  %v2301_v22 = vld [vmem:[#allocation2 + $0x44] sm:$0x1] }
 0x1d4   : > { %v2013_v49 = vrot.slane %v2008_v30, 4  ;;  %v1994_v6 = vor.u32 %v1992_v2, %v1991_v45  ;;  %v1996_v18 = vrot.slane %v1991_v45, 4  ;;  %v1547_v15 = vpop.f32.mrb[15].mxu0  ;;  %v2037_v36 = vor.u32 %v2035_v59, %v9436_v27 }
 0x1d5   : > { %v2038_v40 = vrot.slane %v9436_v27, 4  ;;  %v2020_v20 = vor.u32 %v2018_v26, %v9438_v48  ;;  %v2021_v29 = vrot.slane %v9438_v48, 4  ;;  %v2012_v9 = vsel %vm9404_vm14, %v2004_v53, %v2011_v42  ;;  %v2311_v42 = vld [vmem:[#allocation2 + $0x54] sm:$0xf] }
 0x1d6   : > { %v2295_v35 = vsel %vm9283_vm7, %v2013_v49, %v2294_v24  ;;  %v1995_v63 = vsel %vm9404_vm14, %v1987_v44, %v1994_v6  ;;  %v2288_v19 = vsel %vm9283_vm7, %v1996_v18, %v2287_v32  ;;  %2293 = vst.msk [vmem:[#allocation2 + $0x34] sm:$0xf] %vm1726_vm10, %v2012_v9  ;;  %v2305_v55 = vsel %vm9397_vm13, %v2037_v36, %v2304_v34  ;;  %v9477_v36 = vld [vmem:[%s11333_s3] sm:$0xff]  }
 0x1d7   : > { %2296 = vst [vmem:[#allocation2 + $0x38] sm:$0x1] %v2295_v35  ;;  %2286 = vst.msk [vmem:[#allocation2 + $0x28] sm:$0xf] %vm1726_vm10, %v1995_v63  ;;  %v2298_v57 = vsel %vm9397_vm13, %v2020_v20, %v2297_v5  ;;  %v7648_v62 = vpack.c.bf16 %v1705_v50, %v1705_v50  ;;  %v7646_v3 = vpack.c.bf16 %v1703_v0, %v1703_v0  ;;  %v1708_v53 = vmax.f32 %v1676_v61, 0.0 }
 0x1d8   : > { %2289 = vst [vmem:[#allocation2 + $0x2c] sm:$0x1] %v2288_v19  ;;  %2306 = vst [vmem:[#allocation2 + $0x48] sm:$0xf] %v2305_v55  ;;  %v1706_v33 = vmax.f32 %v1674_v10, 0.0  ;;  %v1677_v43 = vadd.f32 %v8009_v28, %v9388_v4  ;;  %v1675_v17 = vadd.f32 %v9388_v4, %v1547_v15  ;;  %8060 = vmatprep.subr.bf16.mxu0 %v9477_v36 }
 0x1d9   : > { %2299 = vst [vmem:[#allocation2 + $0x3c] sm:$0xf] %v2298_v57  ;;  %v2040_v23 = vshrl.u32 %v7648_v62, 16  ;;  %v2043_v37 = vshll.u32 %v7648_v62, 16  ;;  %v2023_v44 = vshrl.u32 %v7646_v3, 16  ;;  %v2026_v56 = vshll.u32 %v7646_v3, 16 }
 0x1da   : > { %v8012_v7 = vpop.f32.mrb[16].mxu0  ;;  %v7651_v16 = vpack.c.bf16 %v1708_v53, %v1708_v53  ;;  %v7649_v41 = vpack.c.bf16 %v1706_v33, %v1706_v33  ;;  %v1709_v14 = vmax.f32 %v1677_v43, 0.0  ;;  %v1707_v39 = vmax.f32 %v1675_v17, 0.0  ;;  %v2318_v28 = vld [vmem:[#allocation2 + $0x60] sm:$0xf] }
 0x1db   : > { %v1560_v52 = vpop.f32.mrb[17].mxu0  ;;  %v2042_v58 = vrot.slane %v2040_v23, 7  ;;  %v2025_v25 = vrot.slane %v2023_v44, 7  ;;  %v1680_v60 = vadd.f32 %v8012_v7, %v9388_v4  ;;  %v2383_v15 = vld [vmem:[#allocation2 + $0xc] sm:$0xf] }
 0x1dc   : > { %v1678_v38 = vadd.f32 %v9388_v4, %v1560_v52  ;;  %v8013_v2 = vpop.f32.mrb[18].mxu0  ;;  %v2066_v24 = vshrl.u32 %v7651_v16, 16  ;;  %v2069_v32 = vshll.u32 %v7651_v16, 16  ;;  %v2049_v51 = vshrl.u32 %v7649_v41, 16  ;;  %v2322_v55 = vld [vmem:[#allocation2 + $0x68] sm:$0x1] }
 0x1dd   : > { %v2052_v59 = vshll.u32 %v7649_v41, 16  ;;  %v1563_v11 = vpop.f32.mrb[19].mxu0  ;;  %v2045_v26 = vor.u32 %v2043_v37, %v2042_v58  ;;  %v2047_v21 = vrot.slane %v2042_v58, 4  ;;  %v2028_v30 = vor.u32 %v2026_v56, %v2025_v25  ;;  %v2315_v57 = vld [vmem:[#allocation2 + $0x5c] sm:$0x1] }
 0x1de   : > { %v2030_v45 = vrot.slane %v2025_v25, 4  ;;  %v2068_v50 = vrot.slane %v2066_v24, 7  ;;  %v2051_v0 = vrot.slane %v2049_v51, 7  ;;  %v7652_v8 = vpack.c.bf16 %v1709_v14, %v1709_v14 }
 0x1df   : > { %v7650_v27 = vpack.c.bf16 %v1707_v39, %v1707_v39  ;;  %v2046_v34 = vsel %vm9404_vm14, %v2038_v40, %v2045_v26  ;;  %v2309_v48 = vsel %vm9283_vm7, %v2047_v21, %v2308_v1  ;;  %v2029_v61 = vsel %vm9404_vm14, %v2021_v29, %v2028_v30 }
 0x1e0   : > { %v2302_v10 = vsel %vm9283_vm7, %v2030_v45, %v2301_v22  ;;  %2307 = vst.msk [vmem:[#allocation2 + $0x4c] sm:$0xf] %vm1726_vm10, %v2046_v34  ;;  %2310 = vst [vmem:[#allocation2 + $0x50] sm:$0x1] %v2309_v48  ;;  %v2071_v49 = vor.u32 %v2069_v32, %v2068_v50  ;;  %v2072_v6 = vrot.slane %v2068_v50, 4  ;;  %v2054_v18 = vor.u32 %v2052_v59, %v2051_v0 }
 0x1e1   : > { %2300 = vst.msk [vmem:[#allocation2 + $0x40] sm:$0xf] %vm1726_vm10, %v2029_v61  ;;  %2303 = vst [vmem:[#allocation2 + $0x44] sm:$0x1] %v2302_v10  ;;  %v2055_v5 = vrot.slane %v2051_v0, 4  ;;  %v2074_v40 = vshrl.u32 %v7652_v8, 16  ;;  %v1681_v17 = vadd.f32 %v8013_v2, %v9388_v4  ;;  %v1679_v23 = vadd.f32 %v9388_v4, %v1563_v11 }
 0x1e2   : > { %v2077_v20 = vshll.u32 %v7652_v8, 16  ;;  %v2057_v29 = vshrl.u32 %v7650_v27, 16  ;;  %v2060_v9 = vshll.u32 %v7650_v27, 16  ;;  %v9479_v35 = vpop.f32.mrb[20].mxu0  ;;  %v2319_v63 = vsel %vm9397_vm13, %v2071_v49, %v2318_v28  ;;  %v2332_v59 = vld [vmem:[#allocation2 + $0x78] sm:$0xf] }
 0x1e3   : > { %v2312_v19 = vsel %vm9397_vm13, %v2054_v18, %v2311_v42  ;;  %v1712_v62 = vmax.f32 %v1680_v60, 0.0  ;;  %v1710_v3 = vmax.f32 %v1678_v38, 0.0  ;;  %v9485_v53 = vpop.f32.mrb[21].mxu0  ;;  %2320 = vst [vmem:[#allocation2 + $0x60] sm:$0xf] %v2319_v63  ;;  %v2076_v33 = vrot.slane %v2074_v40, 7 }
 0x1e4   : > { %2313 = vst [vmem:[#allocation2 + $0x54] sm:$0xf] %v2312_v19  ;;  %v2059_v43 = vrot.slane %v2057_v29, 7  ;;  %v9490_v37 = vpop.f32.mrb[22].mxu0  ;;  %v2456_v7 = vshrl.u32 %v2383_v15, 16  ;;  %v2459_v1 = vshll.u32 %v2383_v15, 16 }
 0x1e5   : > { %v7655_v44 = vpack.c.bf16 %v1712_v62, %v1712_v62  ;;  %v7653_v56 = vpack.c.bf16 %v1710_v3, %v1710_v3  ;;  %v9492_v16 = vpop.f32.mrb[23].mxu0  ;;  %v2079_v41 = vor.u32 %v2077_v20, %v2076_v33  ;;  %v2081_v14 = vrot.slane %v2076_v33, 4  ;;  %v2384_v38 = vld [vmem:[#allocation2 + $0x10] sm:$0xf]  ;;  %v2325_v11 = vld [vmem:[#allocation2 + $0x6c] sm:$0xf] }
 0x1e6   : > { %v2062_v39 = vor.u32 %v2060_v9, %v2059_v43  ;;  %v2064_v52 = vrot.slane %v2059_v43, 4  ;;  %v1713_v30 = vmax.f32 %v1681_v17, 0.0  ;;  %v1711_v45 = vmax.f32 %v1679_v23, 0.0  ;;  %v2416_v50 = vld [vmem:[#allocation2 + $0x14] sm:$0x1] }
 0x1e7   : > { %v2100_v58 = vshrl.u32 %v7655_v44, 16  ;;  %v2103_v25 = vshll.u32 %v7655_v44, 16  ;;  %v2083_v22 = vshrl.u32 %v7653_v56, 16  ;;  %v2086_v60 = vshll.u32 %v7653_v56, 16  ;;  %v2385_v40 = vld [vmem:[#allocation2 + $0x18] sm:$0xf] }
 0x1e8   : > { %v2080_v2 = vsel %vm9404_vm14, %v2072_v6, %v2079_v41  ;;  %v2323_v24 = vsel %vm9283_vm7, %v2081_v14, %v2322_v55  ;;  %v2063_v32 = vsel %vm9404_vm14, %v2055_v5, %v2062_v39  ;;  %v2316_v51 = vsel %vm9283_vm7, %v2064_v52, %v2315_v57  ;;  %v2386_v20 = vld [vmem:[#allocation2 + $0x1c] sm:$0xf]  ;;  %v2329_v52 = vld [vmem:[#allocation2 + $0x74] sm:$0x1]  ;;  %v8786_v47 = vld [vmem:[#allocation2 + $0x4c] sm:$0xf] }
 0x1e9   : > { %2321 = vst.msk [vmem:[#allocation2 + $0x64] sm:$0xf] %vm1726_vm10, %v2080_v2  ;;  %2324 = vst [vmem:[#allocation2 + $0x68] sm:$0x1] %v2323_v24  ;;  %v2102_v26 = vrot.slane %v2100_v58, 7  ;;  %v2085_v21 = vrot.slane %v2083_v22, 7  ;;  %v7656_v6 = vpack.c.bf16 %v1713_v30, %v1713_v30  ;;  %v7654_v18 = vpack.c.bf16 %v1711_v45, %v1711_v45 }
 0x1ea   : > { %2314 = vst.msk [vmem:[#allocation2 + $0x58] sm:$0xf] %vm1726_vm10, %v2063_v32  ;;  %2317 = vst [vmem:[#allocation2 + $0x5c] sm:$0x1] %v2316_v51  ;;  %v2458_v0 = vrot.slane %v2456_v7, 4  ;;  %v2461_v8 = vrot.slane %v2459_v1, 5 }
 0x1eb   : > { %v2465_v27 = vshll.u32 %v2384_v38, 16  ;;  %v2469_v34 = vshrl.u32 %v2384_v38, 16  ;;  %v9504_v48 = vpop.f32.mrb[24].mxu0  ;;  %v2105_v61 = vor.u32 %v2103_v25, %v2102_v26  ;;  %v2106_v10 = vrot.slane %v2102_v26, 4  ;;  %v2336_v1 = vld [vmem:[#allocation2 + $0x80] sm:$0x1] }
 0x1ec   : > { %v2088_v28 = vor.u32 %v2086_v60, %v2085_v21  ;;  %v2089_v42 = vrot.slane %v2085_v21, 4  ;;  %v9506_v49 = vpop.f32.mrb[25].mxu0  ;;  %v2462_v5 = vor.u32 %v2461_v8, %v2458_v0  ;;  %v2475_v55 = vshll.u32 %v2416_v50, 16  ;;  %v2417_v51 = vld [vmem:[#allocation2 + $0x20] sm:$0x1] }
 0x1ed   : > { %v2467_v15 = vrot.slane %v2465_v27, 5  ;;  %v9508_v29 = vpop.f32.mrb[26].mxu0  ;;  %v2333_v9 = vsel %vm9397_vm13, %v2105_v61, %v2332_v59  ;;  %v2471_v19 = vrot.slane %v2469_v34, 4  ;;  %v2108_v62 = vshrl.u32 %v7656_v6, 16  ;;  %v2387_v45 = vld [vmem:[#allocation2 + $0x24] sm:$0xf] }
 0x1ee   : > { %v2326_v63 = vsel %vm9397_vm13, %v2088_v28, %v2325_v11  ;;  %v9514_v57 = vpop.f32.mrb[27].mxu0  ;;  %2334 = vst [vmem:[#allocation2 + $0x78] sm:$0xf] %v2333_v9  ;;  %v2111_v3 = vshll.u32 %v7656_v6, 16  ;;  %v2091_v33 = vshrl.u32 %v7654_v18, 16  ;;  %v2094_v43 = vshll.u32 %v7654_v18, 16 }
 0x1ef   : > { %2327 = vst [vmem:[#allocation2 + $0x6c] sm:$0xf] %v2326_v63  ;;  %v2463_v17 = vrot.slane %v2462_v5, 4  ;;  %v2472_v23 = vor.u32 %v2471_v19, %v2467_v15  ;;  %v2477_v44 = vrot.slane %v2475_v55, 5  ;;  %v2480_v56 = vshrl.u32 %v2385_v40, 16 }
 0x1f0   : > { %v2110_v7 = vrot.slane %v2108_v62, 7  ;;  %v2093_v41 = vrot.slane %v2091_v33, 7  ;;  %v2483_v14 = vshll.u32 %v2385_v40, 16  ;;  %v2489_v39 = vshll.u32 %v2386_v20, 16  ;;  %v2388_v9 = vld [vmem:[#allocation2 + $0x28] sm:$0xf] }
 0x1f1   : > { %v2468_v58 = vsel %vm8896_vm4, %v2463_v17, %v2467_v15  ;;  %v2473_v25 = vrot.slane %v2472_v23, 4  ;;  %v2482_v22 = vrot.slane %v2480_v56, 4  ;;  %v2493_v60 = vshrl.u32 %v2386_v20, 16  ;;  %v9518_v59 = vpop.f32.mrb[28].mxu0 }
 0x1f2   : > { %v2113_v38 = vor.u32 %v2111_v3, %v2110_v7  ;;  %v2115_v2 = vrot.slane %v2110_v7, 4  ;;  %v2096_v24 = vor.u32 %v2094_v43, %v2093_v41  ;;  %v2098_v32 = vrot.slane %v2093_v41, 4  ;;  %v9522_v50 = vpop.f32.mrb[29].mxu0 }
 0x1f3   : > { %v2478_v11 = vsel %vm8896_vm4, %v2473_v25, %v2477_v44  ;;  %v2485_v26 = vrot.slane %v2483_v14, 5  ;;  %v2491_v21 = vrot.slane %v2489_v39, 5  ;;  %v2495_v30 = vrot.slane %v2493_v60, 4  ;;  %v9532_v61 = vpop.f32.mrb[30].mxu0  ;;  %v2346_v60 = vld [vmem:[#allocation2 + $0x90] sm:$0xf] }
 0x1f4   : > { %v2114_v0 = vsel %vm9404_vm14, %v2106_v10, %v2113_v38  ;;  %v2337_v8 = vsel %vm9283_vm7, %v2115_v2, %v2336_v1  ;;  %v2097_v27 = vsel %vm9404_vm14, %v2089_v42, %v2096_v24  ;;  %v2330_v34 = vsel %vm9283_vm7, %v2098_v32, %v2329_v52  ;;  %v9536_v5 = vpop.f32.mrb[31].mxu0  ;;  %v2339_v38 = vld [vmem:[#allocation2 + $0x84] sm:$0xf] }
 0x1f5   : > { %2335 = vst.msk [vmem:[#allocation2 + $0x7c] sm:$0xf] %vm1726_vm10, %v2114_v0  ;;  %2338 = vst [vmem:[#allocation2 + $0x80] sm:$0x1] %v2337_v8  ;;  %v7275_v28 = vcombine.low %v2468_v58, %v2478_v11  ;;  %v2486_v6 = vor.u32 %v2485_v26, %v2482_v22  ;;  %v2496_v10 = vor.u32 %v2495_v30, %v2491_v21  ;;  %v2499_v18 = vshll.u32 %v2417_v51, 16 }
 0x1f6   : > { %2328 = vst.msk [vmem:[#allocation2 + $0x70] sm:$0xf] %vm1726_vm10, %v2097_v27  ;;  %2331 = vst [vmem:[#allocation2 + $0x74] sm:$0x1] %v2330_v34  ;;  %v1684_v42 = vadd.f32 %v9479_v35, %v9388_v4  ;;  %v1682_v15 = vadd.f32 %v9388_v4, %v9485_v53  ;;  %v1685_v40 = vadd.f32 %v9490_v37, %v9388_v4  ;;  %v2504_v62 = vshrl.u32 %v2387_v45, 16 }
 0x1f7   : > { %v1683_v20 = vadd.f32 %v9388_v4, %v9492_v16  ;;  %8029 = vmatmul.mubr.msk.bf16.vlgmr.msra.gmra.mrb[32].mxu0 %vm2872_vm11, %v7275_v28  ;;  %v2487_v63 = vrot.slane %v2486_v6, 4  ;;  %v2497_v19 = vrot.slane %v2496_v10, 4  ;;  %v2501_v55 = vrot.slane %v2499_v18, 5  ;;  %v2418_v22 = vld [vmem:[#allocation2 + $0x2c] sm:$0x1] }
 0x1f8   : > { %v1716_v3 = vmax.f32 %v1684_v42, 0.0  ;;  %v1714_v33 = vmax.f32 %v1682_v15, 0.0  ;;  %v1717_v43 = vmax.f32 %v1685_v40, 0.0  ;;  %8061 = vmatpush3.bf16.msra.mxu0 %v9477_v36  ;;  %v2506_v16 = vrot.slane %v2504_v62, 4  ;;  %v2350_v26 = vld [vmem:[#allocation2 + $0x98] sm:$0x1] }
 0x1f9   : > { %v1715_v35 = vmax.f32 %v1683_v20, 0.0  ;;  %v2492_v53 = vsel %vm8896_vm4, %v2487_v63, %v2491_v21  ;;  %v2502_v37 = vsel %vm8896_vm4, %v2497_v19, %v2501_v55  ;;  %v2507_v17 = vshll.u32 %v2387_v45, 16  ;;  %8094 = vmatprep.subr.bf16.mxu0 %v9376_v54  ;;  %v2343_v8 = vld [vmem:[#allocation2 + $0x8c] sm:$0x1] }
 0x1fa   : > { %v7276_v23 = vcombine.low %v2492_v53, %v2502_v37  ;;  %v7659_v44 = vpack.c.bf16 %v1716_v3, %v1716_v3  ;;  %v7657_v56 = vpack.c.bf16 %v1714_v33, %v1714_v33  ;;  %v7660_v7 = vpack.c.bf16 %v1717_v43, %v1717_v43  ;;  %v2390_v3 = vld [vmem:[#allocation2 + $0x34] sm:$0xf]  ;;  %v2419_v33 = vld [vmem:[#allocation2 + $0x38] sm:$0x1] }
 0x1fb   : > { %v7658_v1 = vpack.c.bf16 %v1715_v35, %v1715_v35  ;;  %v2509_v41 = vrot.slane %v2507_v17, 5  ;;  %v2513_v14 = vshll.u32 %v2388_v9, 16  ;;  %v2517_v39 = vshrl.u32 %v2388_v9, 16  ;;  %v2389_v9 = vld [vmem:[#allocation2 + $0x30] sm:$0xf] }
 0x1fc   : > { %8032 = vmatprep.mubr.msk.bf16.mxu0 %vm2872_vm11, %v7276_v23  ;;  %v2134_v36 = vshrl.u32 %v7659_v44, 16  ;;  %v2137_v52 = vshll.u32 %v7659_v44, 16  ;;  %v2117_v58 = vshrl.u32 %v7657_v56, 16  ;;  %v2120_v25 = vshll.u32 %v7657_v56, 16 }
 0x1fd   : > { %v2142_v2 = vshrl.u32 %v7660_v7, 16  ;;  %v2145_v24 = vshll.u32 %v7660_v7, 16  ;;  %v2125_v54 = vshrl.u32 %v7658_v1, 16  ;;  %v2128_v32 = vshll.u32 %v7658_v1, 16 }
 0x1fe   : > { %v2136_v51 = vrot.slane %v2134_v36, 7  ;;  %v2119_v11 = vrot.slane %v2117_v58, 7  ;;  %v2510_v21 = vor.u32 %v2509_v41, %v2506_v16  ;;  %v2515_v30 = vrot.slane %v2513_v14, 5  ;;  %v2391_v58 = vld [vmem:[#allocation2 + $0x3c] sm:$0xf] }
 0x1ff   : > { %v2144_v45 = vrot.slane %v2142_v2, 7  ;;  %v2127_v0 = vrot.slane %v2125_v54, 7  ;;  %v2519_v27 = vrot.slane %v2517_v39, 4  ;;  %v2523_v34 = vshll.u32 %v2418_v22, 16 }
 0x200   : > { %v2139_v28 = vor.u32 %v2137_v52, %v2136_v51  ;;  %v2140_v6 = vrot.slane %v2136_v51, 4  ;;  %v2122_v10 = vor.u32 %v2120_v25, %v2119_v11  ;;  %v2123_v18 = vrot.slane %v2119_v11, 4 }
 0x201   : > { %v2147_v42 = vor.u32 %v2145_v24, %v2144_v45  ;;  %v2149_v15 = vrot.slane %v2144_v45, 4  ;;  %v2130_v40 = vor.u32 %v2128_v32, %v2127_v0  ;;  %v2132_v20 = vrot.slane %v2127_v0, 4 }
 0x202   : > { %v2347_v63 = vsel %vm9397_vm13, %v2139_v28, %v2346_v60  ;;  %v2340_v19 = vsel %vm9397_vm13, %v2122_v10, %v2339_v38  ;;  %v2511_v55 = vrot.slane %v2510_v21, 4  ;;  %v2520_v62 = vor.u32 %v2519_v27, %v2515_v30 }
 0x203   : > { %2348 = vst [vmem:[#allocation2 + $0x90] sm:$0xf] %v2347_v63  ;;  %2341 = vst [vmem:[#allocation2 + $0x84] sm:$0xf] %v2340_v19  ;;  %v2148_v43 = vsel %vm9404_vm14, %v2140_v6, %v2147_v42  ;;  %v2351_v35 = vsel %vm9283_vm7, %v2149_v15, %v2350_v26  ;;  %v2131_v53 = vsel %vm9404_vm14, %v2123_v18, %v2130_v40  ;;  %v2525_v23 = vrot.slane %v2523_v34, 5 }
 0x204   : > { %v2344_v37 = vsel %vm9283_vm7, %v2132_v20, %v2343_v8  ;;  %2349 = vst.msk [vmem:[#allocation2 + $0x94] sm:$0xf] %vm1726_vm10, %v2148_v43  ;;  %2352 = vst [vmem:[#allocation2 + $0x98] sm:$0x1] %v2351_v35  ;;  %v2516_v16 = vsel %vm8896_vm4, %v2511_v55, %v2515_v30  ;;  %v2521_v17 = vrot.slane %v2520_v62, 4  ;;  %v2528_v44 = vshrl.u32 %v2389_v9, 16 }
 0x205   : > { %2342 = vst.msk [vmem:[#allocation2 + $0x88] sm:$0xf] %vm1726_vm10, %v2131_v53  ;;  %2345 = vst [vmem:[#allocation2 + $0x8c] sm:$0x1] %v2344_v37  ;;  %v2531_v56 = vshll.u32 %v2389_v9, 16  ;;  %v2537_v7 = vshll.u32 %v2390_v3, 16  ;;  %v1688_v36 = vadd.f32 %v9504_v48, %v9388_v4  ;;  %v1686_v52 = vadd.f32 %v9388_v4, %v9506_v49 }
 0x206   : > { %v2541_v1 = vshrl.u32 %v2390_v3, 16  ;;  %v2547_v41 = vshll.u32 %v2419_v33, 16  ;;  %v2526_v14 = vsel %vm8896_vm4, %v2521_v17, %v2525_v23  ;;  %v2530_v39 = vrot.slane %v2528_v44, 4  ;;  %v9585_v20 = vld [vmem:[#allocation2 + $0x40] sm:$0xf] }
 0x207   : > { %v7277_v25 = vcombine.low %v2516_v16, %v2526_v14  ;;  %v2533_v22 = vrot.slane %v2531_v56, 5  ;;  %v2539_v60 = vrot.slane %v2537_v7, 5  ;;  %v1720_v24 = vmax.f32 %v1688_v36, 0.0  ;;  %v2420_v55 = vld [vmem:[#allocation2 + $0x44] sm:$0x1] }
 0x208   : > { %v2543_v38 = vrot.slane %v2541_v1, 4  ;;  %v2549_v2 = vrot.slane %v2547_v41, 5  ;;  %v1718_v54 = vmax.f32 %v1686_v52, 0.0  ;;  %v1689_v32 = vadd.f32 %v9508_v29, %v9388_v4  ;;  %v2364_v23 = vld [vmem:[#allocation2 + $0xb0] sm:$0x1] }
 0x209   : > { %8033 = vmatmul.mubr.msk.bf16.gmra.mrb[36].mxu0 %vm2872_vm11, %v7277_v25  ;;  %v2534_v51 = vor.u32 %v2533_v22, %v2530_v39  ;;  %v1687_v48 = vadd.f32 %v9388_v4, %v9514_v57  ;;  %v2552_v26 = vshrl.u32 %v2391_v58, 16  ;;  %v7663_v49 = vpack.c.bf16 %v1720_v24, %v1720_v24  ;;  %v2360_v4 = vld [vmem:[#allocation2 + $0xa8] sm:$0xf]  ;;  %v2353_v57 = vld [vmem:[#allocation2 + $0x9c] sm:$0xf] }
 0x20a   : > { %v2544_v11 = vor.u32 %v2543_v38, %v2539_v60  ;;  %v7661_v21 = vpack.c.bf16 %v1718_v54, %v1718_v54  ;;  %v1721_v30 = vmax.f32 %v1689_v32, 0.0  ;;  %v2555_v45 = vshll.u32 %v2391_v58, 16  ;;  %v2357_v39 = vld [vmem:[#allocation2 + $0xa4] sm:$0x1]  ;;  %v9594_v58 = vld [vmem:[#allocation2 + $0x48] sm:$0xf] }
 0x20b   : > { %v2535_v0 = vrot.slane %v2534_v51, 4  ;;  %v1719_v27 = vmax.f32 %v1687_v48, 0.0  ;;  %v2554_v34 = vrot.slane %v2552_v26, 4  ;;  %v2168_v28 = vshrl.u32 %v7663_v49, 16  ;;  %v2421_v24 = vld [vmem:[#allocation2 + $0x50] sm:$0x1] }
 0x20c   : > { %v2545_v8 = vrot.slane %v2544_v11, 4  ;;  %v2171_v6 = vshll.u32 %v7663_v49, 16  ;;  %v2151_v10 = vshrl.u32 %v7661_v21, 16  ;;  %v2154_v29 = vshll.u32 %v7661_v21, 16  ;;  %v9598_v48 = vld [vmem:[#allocation2 + $0x64] sm:$0xf] }
 0x20d   : > { %v2540_v18 = vsel %vm8896_vm4, %v2535_v0, %v2539_v60  ;;  %v7664_v15 = vpack.c.bf16 %v1721_v30, %v1721_v30  ;;  %v7662_v40 = vpack.c.bf16 %v1719_v27, %v1719_v27  ;;  %v2170_v63 = vrot.slane %v2168_v28, 7  ;;  %v3385_v28 = vld [vmem:[#allocation2 + $0x60] sm:$0xe] }
 0x20e   : > { %v2550_v42 = vsel %vm8896_vm4, %v2545_v8, %v2549_v2  ;;  %v2153_v19 = vrot.slane %v2151_v10, 7  ;;  %v2557_v62 = vrot.slane %v2555_v45, 5  ;;  %v2561_v1 = vshll.u32 %v9585_v20, 16  ;;  %v9596_v2 = vld [vmem:[#allocation2 + $0x4c] sm:$0xf] }
 0x20f   : > { %v7278_v9 = vcombine.low %v2540_v18, %v2550_v42  ;;  %v2176_v3 = vshrl.u32 %v7664_v15, 16  ;;  %v2179_v33 = vshll.u32 %v7664_v15, 16  ;;  %v2159_v43 = vshrl.u32 %v7662_v40, 16  ;;  %v2423_v45 = vld [vmem:[#allocation2 + $0x68] sm:$0x1] }
 0x210   : > { %v2162_v35 = vshll.u32 %v7662_v40, 16  ;;  %v2173_v53 = vor.u32 %v2171_v6, %v2170_v63  ;;  %v2174_v37 = vrot.slane %v2170_v63, 4  ;;  %v2156_v16 = vor.u32 %v2154_v29, %v2153_v19 }
 0x211   : > { %8036 = vmatprep.mubr.msk.bf16.mxu0 %vm2872_vm11, %v7278_v9  ;;  %v2157_v17 = vrot.slane %v2153_v19, 4  ;;  %v2178_v44 = vrot.slane %v2176_v3, 7  ;;  %v2161_v56 = vrot.slane %v2159_v43, 7  ;;  %v2558_v7 = vor.u32 %v2557_v62, %v2554_v34 }
 0x212   : > { %v2361_v41 = vsel %vm9397_vm13, %v2173_v53, %v2360_v4  ;;  %v2354_v14 = vsel %vm9397_vm13, %v2156_v16, %v2353_v57  ;;  %v2565_v36 = vshrl.u32 %v9585_v20, 16  ;;  %v2571_v52 = vshll.u32 %v2420_v55, 16  ;;  %v8766_v16 = vld [vmem:[%s11332_s2] ss:$0 sm:$0xff] }
 0x213   : > { %2362 = vst [vmem:[#allocation2 + $0xa8] sm:$0xf] %v2361_v41  ;;  %2355 = vst [vmem:[#allocation2 + $0x9c] sm:$0xf] %v2354_v14  ;;  %v2181_v25 = vor.u32 %v2179_v33, %v2178_v44  ;;  %v2183_v22 = vrot.slane %v2178_v44, 4  ;;  %v2164_v60 = vor.u32 %v2162_v35, %v2161_v56  ;;  %v2166_v38 = vrot.slane %v2161_v56, 4 }
 0x214   : > { %v2559_v54 = vrot.slane %v2558_v7, 4  ;;  %v2563_v32 = vrot.slane %v2561_v1, 5  ;;  %v2567_v51 = vrot.slane %v2565_v36, 4  ;;  %v2573_v11 = vrot.slane %v2571_v52, 5 }
 0x215   : > { %v2182_v26 = vsel %vm9404_vm14, %v2174_v37, %v2181_v25  ;;  %v2365_v49 = vsel %vm9283_vm7, %v2183_v22, %v2364_v23  ;;  %v2165_v21 = vsel %vm9404_vm14, %v2157_v17, %v2164_v60  ;;  %v2358_v30 = vsel %vm9283_vm7, %v2166_v38, %v2357_v39  ;;  %v9632_v23 = vld [vmem:[#allocation2 + $0x54] sm:$0xf]  ;;  %v9644_v22 = vld [vmem:[#allocation2 + $0x58] sm:$0xf] }
 0x216   : > { %2363 = vst.msk [vmem:[#allocation2 + $0xac] sm:$0xf] %vm1726_vm10, %v2182_v26  ;;  %2366 = vst [vmem:[#allocation2 + $0xb0] sm:$0x1] %v2365_v49  ;;  %v2564_v0 = vsel %vm8896_vm4, %v2559_v54, %v2563_v32  ;;  %v2568_v8 = vor.u32 %v2567_v51, %v2563_v32  ;;  %v2576_v27 = vshrl.u32 %v9594_v58, 16  ;;  %v2579_v34 = vshll.u32 %v9594_v58, 16 }
 0x217   : > { %2356 = vst.msk [vmem:[#allocation2 + $0xa0] sm:$0xf] %vm1726_vm10, %v2165_v21  ;;  %2359 = vst [vmem:[#allocation2 + $0xa4] sm:$0x1] %v2358_v30  ;;  %v2585_v6 = vshll.u32 %v9596_v2, 16  ;;  %v2589_v10 = vshrl.u32 %v9596_v2, 16  ;;  %v1692_v17 = vadd.f32 %v8766_v16, %v9518_v59  ;;  %v1690_v1 = vadd.f32 %v8766_v16, %v9522_v50 }
 0x218   : > { %v2595_v29 = vshll.u32 %v2421_v24, 16  ;;  %v2637_v18 = vshrl.u32 %v9598_v48, 16  ;;  %v2569_v42 = vrot.slane %v2568_v8, 4  ;;  %v2578_v4 = vrot.slane %v2576_v27, 4 }
 0x219   : > { %v2581_v57 = vrot.slane %v2579_v34, 5  ;;  %v2643_v15 = vshll.u32 %v2423_v45, 16  ;;  %v2587_v40 = vrot.slane %v2585_v6, 5  ;;  %v2591_v9 = vrot.slane %v2589_v10, 4  ;;  %v2374_v34 = vld [vmem:[#allocation2 + $0xc0] sm:$0xf] }
 0x21a   : > { %v2597_v63 = vrot.slane %v2595_v29, 5  ;;  %v7348_v19 = vrot.slane %v3385_v28, 9  ;;  %v2574_v55 = vsel %vm8896_vm4, %v2569_v42, %v2573_v11  ;;  %v3486_v33 = vrot.slane %v9598_v48, 5  ;;  %v2367_v42 = vld [vmem:[#allocation2 + $0xb4] sm:$0xf] }
 0x21b   : > { %v2582_v62 = vor.u32 %v2581_v57, %v2578_v4  ;;  %v9619_v3 = vrot.slane %v2643_v15, 5  ;;  %v7279_v43 = vcombine.low %v2564_v0, %v2574_v55  ;;  %v2592_v35 = vor.u32 %v2591_v9, %v2587_v40  ;;  %v2371_v55 = vld [vmem:[#allocation2 + $0xbc] sm:$0x1] }
 0x21c   : > { %v3489_v37 = vrot.slane %v2423_v45, 5  ;;  %v3487_v56 = vsel %vm9624_vm1, %v7348_v19, %v3486_v33  ;;  %v3488_v7 = vrot.slane %v3486_v33, 4  ;;  %v1724_v14 = vmax.f32 %v1692_v17, 0.0  ;;  %v2378_v19 = vld [vmem:[#allocation2 + $0xc8] sm:$0x1] }
 0x21d   : > { %v2583_v44 = vrot.slane %v2582_v62, 4  ;;  %8037 = vmatmul.mubr.msk.bf16.gmra.mrb[40].mxu0 %vm2872_vm11, %v7279_v43  ;;  %v2593_v41 = vrot.slane %v2592_v35, 4  ;;  %v1693_v39 = vadd.f32 %v8766_v16, %v9532_v61  ;;  %v1691_v36 = vadd.f32 %v8766_v16, %v9536_v5 }
 0x21e   : > { %v3490_v52 = vsel %vm9624_vm1, %v3488_v7, %v3489_v37  ;;  %v1722_v25 = vmax.f32 %v1690_v1, 0.0  ;;  %v2600_v60 = vshrl.u32 %v9632_v23, 16  ;;  %v7667_v24 = vpack.c.bf16 %v1724_v14, %v1724_v14  ;;  %v2422_v37 = vld [vmem:[#allocation2 + $0x5c] sm:$0x1]  ;;  %v9656_v1 = vld [vmem:[#allocation2 + $0x60] sm:$0xf] }
 0x21f   : > { %v2588_v59 = vsel %vm8896_vm4, %v2583_v44, %v2587_v40  ;;  %v2598_v50 = vsel %vm8896_vm4, %v2593_v41, %v2597_v63  ;;  %v7366_v38 = vcombine.low %v3487_v56, %v3490_v52  ;;  %v1725_v54 = vmax.f32 %v1693_v39, 0.0  ;;  %v3386_v41 = vld [vmem:[#allocation2 + $0x6c] sm:$0xe]  ;;  %v9660_v52 = vld [vmem:[#allocation2 + $0x70] sm:$0xf] }
 0x220   : > { %v7280_v61 = vcombine.low %v2588_v59, %v2598_v50  ;;  %v7665_v32 = vpack.c.bf16 %v1722_v25, %v1722_v25  ;;  %v1723_v5 = vmax.f32 %v1691_v36, 0.0  ;;  %v2602_v51 = vrot.slane %v2600_v60, 4  ;;  %v9662_v25 = vld [vmem:[#allocation2 + $0x74] sm:$0x1]  ;;  %v3387_v60 = vld [vmem:[#allocation2 + $0x78] sm:$0xe] }
 0x221   : > { %8112 = vmatprep.mubr.msk.bf16.mxu1 %vm2872_vm11, %v7366_v38  ;;  %v2202_v11 = vshrl.u32 %v7667_v24, 16  ;;  %v2205_v26 = vshll.u32 %v7667_v24, 16  ;;  %v7668_v49 = vpack.c.bf16 %v1725_v54, %v1725_v54  ;;  %v2603_v21 = vshll.u32 %v9632_v23, 16  ;;  %v9670_v54 = vld [vmem:[#allocation2 + $0x7c] sm:$0xf] }
 0x222   : > { %8040 = vmatprep.mubr.msk.bf16.mxu0 %vm2872_vm11, %v7280_v61  ;;  %v2185_v30 = vshrl.u32 %v7665_v32, 16  ;;  %v2188_v45 = vshll.u32 %v7665_v32, 16  ;;  %v7666_v0 = vpack.c.bf16 %v1723_v5, %v1723_v5  ;;  %v2609_v8 = vshll.u32 %v9644_v22, 16 }
 0x223   : > { %v2204_v27 = vrot.slane %v2202_v11, 7  ;;  %v2210_v28 = vshrl.u32 %v7668_v49, 16  ;;  %v2213_v6 = vshll.u32 %v7668_v49, 16  ;;  %v2605_v10 = vrot.slane %v2603_v21, 5  ;;  %v9678_v11 = vld [vmem:[#allocation2 + $0x80] sm:$0x1] }
 0x224   : > { %v2187_v29 = vrot.slane %v2185_v30, 7  ;;  %v2193_v4 = vshrl.u32 %v7666_v0, 16  ;;  %v2196_v57 = vshll.u32 %v7666_v0, 16  ;;  %v2611_v15 = vrot.slane %v2609_v8, 5  ;;  %v9685_v30 = vld [vmem:[#allocation2 + $0x6c] sm:$0xf] }
 0x225   : > { %v2207_v40 = vor.u32 %v2205_v26, %v2204_v27  ;;  %v2208_v9 = vrot.slane %v2204_v27, 4  ;;  %v2212_v63 = vrot.slane %v2210_v28, 7  ;;  %v2606_v62 = vor.u32 %v2605_v10, %v2602_v51 }
 0x226   : > { %v2190_v33 = vor.u32 %v2188_v45, %v2187_v29  ;;  %v2191_v43 = vrot.slane %v2187_v29, 4  ;;  %v2195_v35 = vrot.slane %v2193_v4, 7  ;;  %v2613_v16 = vshrl.u32 %v9644_v22, 16 }
 0x227   : > { %v2375_v17 = vsel %vm9397_vm13, %v2207_v40, %v2374_v34  ;;  %v2215_v44 = vor.u32 %v2213_v6, %v2212_v63  ;;  %v2217_v56 = vrot.slane %v2212_v63, 4  ;;  %v2607_v7 = vrot.slane %v2606_v62, 4 }
 0x228   : > { %2376 = vst [vmem:[#allocation2 + $0xc0] sm:$0xf] %v2375_v17  ;;  %v2368_v14 = vsel %vm9397_vm13, %v2190_v33, %v2367_v42  ;;  %v2198_v39 = vor.u32 %v2196_v57, %v2195_v35  ;;  %v2200_v36 = vrot.slane %v2195_v35, 4  ;;  %v2615_v59 = vrot.slane %v2613_v16, 4  ;;  %v9705_v16 = vld [vmem:[%s11333_s3 + $0x20] sm:$0xff]  }
 0x229   : > { %2369 = vst [vmem:[#allocation2 + $0xb4] sm:$0xf] %v2368_v14  ;;  %v2216_v50 = vsel %vm9404_vm14, %v2208_v9, %v2215_v44  ;;  %v2379_v38 = vsel %vm9283_vm7, %v2217_v56, %v2378_v19  ;;  %v2612_v24 = vsel %vm8896_vm4, %v2607_v7, %v2611_v15  ;;  %v2619_v12 = vshll.u32 %v2422_v37, 16 }
 0x22a   : > { %2377 = vst.msk [vmem:[#allocation2 + $0xc4] sm:$0xf] %vm1726_vm10, %v2216_v50  ;;  %2380 = vst [vmem:[#allocation2 + $0xc8] sm:$0x1] %v2379_v38  ;;  %v2199_v61 = vsel %vm9404_vm14, %v2191_v43, %v2198_v39  ;;  %v2372_v32 = vsel %vm9283_vm7, %v2200_v36, %v2371_v55  ;;  %v2616_v5 = vor.u32 %v2615_v59, %v2611_v15  ;;  %v2624_v51 = vshrl.u32 %v9656_v1, 16  ;;  %v8767_v38 = vld [vmem:[%s11333_s3 + $0x18] sm:$0xff]  }
 0x22b   : > { %2370 = vst.msk [vmem:[#allocation2 + $0xb8] sm:$0xf] %vm1726_vm10, %v2199_v61  ;;  %2373 = vst [vmem:[#allocation2 + $0xbc] sm:$0x1] %v2372_v32  ;;  %v2621_v26 = vrot.slane %v2619_v12, 5  ;;  %v2627_v49 = vshll.u32 %v9656_v1, 16 }
 0x22c   : > { %v2633_v21 = vshll.u32 %v9598_v48, 16  ;;  %v2639_v13 = vrot.slane %v2637_v18, 4  ;;  %v2617_v45 = vrot.slane %v2616_v5, 4  ;;  %v2626_v0 = vrot.slane %v2624_v51, 4 }
 0x22d   : > { %v7349_v8 = vrot.slane %v3386_v41, 9  ;;  %v3493_v27 = vrot.slane %v9660_v52, 5  ;;  %v2629_v34 = vrot.slane %v2627_v49, 5  ;;  %v3496_v6 = vrot.slane %v9662_v25, 5  ;;  %v9711_v41 = vld [vmem:[#allocation2 + $0x78] sm:$0xf] }
 0x22e   : > { %v2635_v28 = vrot.slane %v2633_v21, 5  ;;  %v7350_v10 = vrot.slane %v3387_v60, 9  ;;  %v2622_v29 = vsel %vm8896_vm4, %v2617_v45, %v2621_v26  ;;  %v3500_v18 = vrot.slane %v9670_v54, 5  ;;  %v3388_v60 = vld [vmem:[#allocation2 + $0x84] sm:$0xe] }
 0x22f   : > { %v3494_v42 = vsel %vm9624_vm1, %v7349_v8, %v3493_v27  ;;  %v3495_v4 = vrot.slane %v3493_v27, 4  ;;  %v7281_v57 = vcombine.low %v2612_v24, %v2622_v29  ;;  %v2630_v15 = vor.u32 %v2629_v34, %v2626_v0  ;;  %v9727_v26 = vld [vmem:[#allocation2 + $0x88] sm:$0xf]  ;;  %v3389_v49 = vld [vmem:[#allocation2 + $0x90] sm:$0xe] }
 0x230   : > { %v2640_v40 = vor.u32 %v2639_v13, %v2635_v28  ;;  %v3503_v9 = vrot.slane %v9678_v11, 5  ;;  %v3501_v19 = vsel %vm9624_vm1, %v7350_v10, %v3500_v18  ;;  %v3502_v55 = vrot.slane %v3500_v18, 4  ;;  %v2426_v0 = vld [vmem:[#allocation2 + $0x8c] sm:$0x1] }
 0x231   : > { %v3497_v63 = vsel %vm9624_vm1, %v3495_v4, %v3496_v6  ;;  %v2648_v62 = vshrl.u32 %v9685_v30, 16  ;;  %8041 = vmatmul.mubr.msk.bf16.gmra.mrb[44].mxu0 %vm2872_vm11, %v7281_v57  ;;  %v2631_v33 = vrot.slane %v2630_v15, 4  ;;  %v2651_v37 = vshll.u32 %v9685_v30, 16  ;;  %v9733_v6 = vld [vmem:[#allocation2 + $0x94] sm:$0xf] }
 0x232   : > { %v2641_v43 = vrot.slane %v2640_v40, 4  ;;  %v7367_v35 = vcombine.low %v3494_v42, %v3497_v63  ;;  %v3504_v17 = vsel %vm9624_vm1, %v3502_v55, %v3503_v9  ;;  %v2657_v56 = vshll.u32 %v9660_v52, 16  ;;  %v2427_v9 = vld [vmem:[#allocation2 + $0x98] sm:$0x1] }
 0x233   : > { %v2650_v44 = vrot.slane %v2648_v62, 4  ;;  %v2661_v7 = vshrl.u32 %v9660_v52, 16  ;;  %v2636_v14 = vsel %vm8896_vm4, %v2631_v33, %v2635_v28  ;;  %v7368_v36 = vcombine.low %v3501_v19, %v3504_v17  ;;  %v9741_v62 = vld [vmem:[#allocation2 + $0x84] sm:$0xf] }
 0x234   : > { %v2646_v39 = vsel %vm8896_vm4, %v2641_v43, %v9619_v3  ;;  %8113 = vmatmul.mubr.msk.bf16.vlgmr.msra.gmra.mrb[0].mxu1 %vm2872_vm11, %v7367_v35  ;;  %v2653_v59 = vrot.slane %v2651_v37, 5  ;;  %v2659_v24 = vrot.slane %v2657_v56, 5  ;;  %v2667_v61 = vshll.u32 %v9662_v25, 16 }
 0x235   : > { %v7282_v50 = vcombine.low %v2636_v14, %v2646_v39  ;;  %8129 = vmatpush3.bf16.msra.mxu1 %v8767_v38  ;;  %v2663_v12 = vrot.slane %v2661_v7, 4  ;;  %8116 = vmatprep.mubr.msk.bf16.mxu1 %vm2872_vm11, %v7368_v36  ;;  %v2672_v3 = vshrl.u32 %v9711_v41, 16  ;;  %v2675_v5 = vshll.u32 %v9711_v41, 16 }
 0x236   : > { %v2654_v32 = vor.u32 %v2653_v59, %v2650_v44  ;;  %v2681_v51 = vshll.u32 %v9670_v54, 16  ;;  %8162 = vmatprep.subr.bf16.mxu1 %v9705_v16  ;;  %v2669_v13 = vrot.slane %v2667_v61, 5  ;;  %v2685_v25 = vshrl.u32 %v9670_v54, 16 }
 0x237   : > { %8044 = vmatprep.mubr.msk.bf16.mxu0 %vm2872_vm11, %v7282_v50  ;;  %v2664_v21 = vor.u32 %v2663_v12, %v2659_v24  ;;  %v2691_v45 = vshll.u32 %v9678_v11, 16  ;;  %v2674_v27 = vrot.slane %v2672_v3, 4  ;;  %v2677_v34 = vrot.slane %v2675_v5, 5 }
 0x238   : > { %v2655_v8 = vrot.slane %v2654_v32, 4  ;;  %v2683_v28 = vrot.slane %v2681_v51, 5  ;;  %v2687_v29 = vrot.slane %v2685_v25, 4  ;;  %v7351_v4 = vrot.slane %v3388_v60, 9  ;;  %v9754_v60 = vld [vmem:[#allocation2 + $0x90] sm:$0xf] }
 0x239   : > { %v2665_v10 = vrot.slane %v2664_v21, 4  ;;  %v2693_v42 = vrot.slane %v2691_v45, 5  ;;  %v2678_v57 = vor.u32 %v2677_v34, %v2674_v27  ;;  %v3507_v15 = vrot.slane %v9727_v26, 5  ;;  %v9761_v51 = vld [vmem:[#allocation2 + $0xa0] sm:$0xf] }
 0x23a   : > { %v2660_v18 = vsel %vm8896_vm4, %v2655_v8, %v2659_v24  ;;  %v3510_v40 = vrot.slane %v2426_v0, 5  ;;  %v2688_v63 = vor.u32 %v2687_v29, %v2683_v28  ;;  %v7352_v19 = vrot.slane %v3389_v49, 9  ;;  %v3390_v49 = vld [vmem:[#allocation2 + $0x9c] sm:$0xe]  ;;  %v9766_v8 = vld [vmem:[#allocation2 + $0xa4] sm:$0x1] }
 0x23b   : > { %v2670_v11 = vsel %vm8896_vm4, %v2665_v10, %v2669_v13  ;;  %v3514_v55 = vrot.slane %v9733_v6, 5  ;;  %v2679_v43 = vrot.slane %v2678_v57, 4  ;;  %v3508_v35 = vsel %vm9624_vm1, %v7351_v4, %v3507_v15  ;;  %v3391_v29 = vld [vmem:[#allocation2 + $0xa8] sm:$0xe]  ;;  %v9773_v57 = vld [vmem:[#allocation2 + $0xac] sm:$0xf] }
 0x23c   : > { %v7283_v33 = vcombine.low %v2660_v18, %v2670_v11  ;;  %v3509_v37 = vrot.slane %v3507_v15, 4  ;;  %v2689_v17 = vrot.slane %v2688_v63, 4  ;;  %v3517_v7 = vrot.slane %v2427_v9, 5  ;;  %v9775_v15 = vld [vmem:[#allocation2 + $0xb0] sm:$0x1] }
 0x23d   : > { %v3515_v44 = vsel %vm9624_vm1, %v7352_v19, %v3514_v55  ;;  %v3516_v56 = vrot.slane %v3514_v55, 4  ;;  %v2684_v14 = vsel %vm8896_vm4, %v2679_v43, %v2683_v28  ;;  %v2696_v36 = vshrl.u32 %v9741_v62, 16 }
 0x23e   : > { %8045 = vmatmul.mubr.msk.bf16.gmra.mrb[48].mxu0 %vm2872_vm11, %v7283_v33  ;;  %v3511_v39 = vsel %vm9624_vm1, %v3509_v37, %v3510_v40  ;;  %v2699_v59 = vshll.u32 %v9741_v62, 16  ;;  %v2694_v50 = vsel %vm8896_vm4, %v2689_v17, %v2693_v42  ;;  %v2705_v12 = vshll.u32 %v9727_v26, 16 }
 0x23f   : > { %v7369_v38 = vcombine.low %v3508_v35, %v3511_v39  ;;  %v3518_v24 = vsel %vm9624_vm1, %v3516_v56, %v3517_v7  ;;  %v7284_v61 = vcombine.low %v2684_v14, %v2694_v50  ;;  %v2698_v3 = vrot.slane %v2696_v36, 4  ;;  %v9781_v56 = vld [vmem:[#allocation2 + $0x9c] sm:$0xf] }
 0x240   : > { %v7370_v32 = vcombine.low %v3515_v44, %v3518_v24  ;;  %v2701_v5 = vrot.slane %v2699_v59, 5  ;;  %v2707_v21 = vrot.slane %v2705_v12, 5  ;;  %v2709_v13 = vshrl.u32 %v9727_v26, 16 }
 0x241   : > { %8117 = vmatmul.mubr.msk.bf16.gmra.mrb[4].mxu1 %vm2872_vm11, %v7369_v38  ;;  %v2715_v25 = vshll.u32 %v2426_v0, 16  ;;  %v2720_v45 = vshrl.u32 %v9754_v60, 16  ;;  %8048 = vmatprep.mubr.msk.bf16.mxu0 %vm2872_vm11, %v7284_v61  ;;  %v2723_v34 = vshll.u32 %v9754_v60, 16  ;;  %v2729_v28 = vshll.u32 %v9733_v6, 16 }
 0x242   : > { %8120 = vmatprep.mubr.msk.bf16.mxu1 %vm2872_vm11, %v7370_v32  ;;  %v2702_v27 = vor.u32 %v2701_v5, %v2698_v3  ;;  %v2733_v10 = vshrl.u32 %v9733_v6, 16  ;;  %v2711_v42 = vrot.slane %v2709_v13, 4  ;;  %v2739_v0 = vshll.u32 %v2427_v9, 16  ;;  %v9793_v5 = vld [vmem:[#allocation2 + $0xa8] sm:$0xf] }
 0x243   : > { %v2717_v4 = vrot.slane %v2715_v25, 5  ;;  %v2722_v18 = vrot.slane %v2720_v45, 4  ;;  %v2725_v11 = vrot.slane %v2723_v34, 5  ;;  %v2731_v63 = vrot.slane %v2729_v28, 5 }
 0x244   : > { %v2703_v40 = vrot.slane %v2702_v27, 4  ;;  %v2735_v19 = vrot.slane %v2733_v10, 4  ;;  %v2712_v55 = vor.u32 %v2711_v42, %v2707_v21  ;;  %v2741_v33 = vrot.slane %v2739_v0, 5 }
 0x245   : > { %v7353_v43 = vrot.slane %v3390_v49, 9  ;;  %v3521_v35 = vrot.slane %v9761_v51, 5  ;;  %v2726_v17 = vor.u32 %v2725_v11, %v2722_v18  ;;  %v3524_v9 = vrot.slane %v9766_v8, 5 }
 0x246   : > { %v2708_v37 = vsel %vm8896_vm4, %v2703_v40, %v2707_v21  ;;  %v2736_v44 = vor.u32 %v2735_v19, %v2731_v63  ;;  %v2713_v7 = vrot.slane %v2712_v55, 4  ;;  %v7354_v36 = vrot.slane %v3391_v29, 9 }
 0x247   : > { %v3522_v14 = vsel %vm9624_vm1, %v7353_v43, %v3521_v35  ;;  %v3523_v39 = vrot.slane %v3521_v35, 4  ;;  %v2727_v59 = vrot.slane %v2726_v17, 4  ;;  %v3528_v38 = vrot.slane %v9773_v57, 5  ;;  %v9812_v43 = vld [vmem:[#allocation2 + $0xb8] sm:$0xf] }
 0x248   : > { %v2737_v50 = vrot.slane %v2736_v44, 4  ;;  %v3531_v24 = vrot.slane %v9775_v15, 5  ;;  %v2718_v12 = vsel %vm8896_vm4, %v2713_v7, %v2717_v4  ;;  %v2744_v32 = vshrl.u32 %v9781_v56, 16  ;;  %v3392_v17 = vld [vmem:[#allocation2 + $0xb4] sm:$0xe] }
 0x249   : > { %v3525_v61 = vsel %vm9624_vm1, %v3523_v39, %v3524_v9  ;;  %v2747_v3 = vshll.u32 %v9781_v56, 16  ;;  %v7285_v49 = vcombine.low %v2708_v37, %v2718_v12  ;;  %v2732_v21 = vsel %vm8896_vm4, %v2727_v59, %v2731_v63  ;;  %v9816_v39 = vld [vmem:[#allocation2 + $0xb4] sm:$0xf] }
 0x24a   : > { %v2742_v13 = vsel %vm8896_vm4, %v2737_v50, %v2741_v33  ;;  %v7371_v25 = vcombine.low %v3522_v14, %v3525_v61  ;;  %v3529_v27 = vsel %vm9624_vm1, %v7354_v36, %v3528_v38  ;;  %v3530_v34 = vrot.slane %v3528_v38, 4 }
 0x24b   : > { %v7286_v45 = vcombine.low %v2732_v21, %v2742_v13  ;;  %v2746_v28 = vrot.slane %v2744_v32, 4  ;;  %8049 = vmatmul.mubr.msk.bf16.gmra.mrb[52].mxu0 %vm2872_vm11, %v7285_v49  ;;  %v2749_v10 = vrot.slane %v2747_v3, 5  ;;  %v2753_v29 = vshll.u32 %v9761_v51, 16 }
 0x24c   : > { %8121 = vmatmul.mubr.msk.bf16.gmra.mrb[8].mxu1 %vm2872_vm11, %v7371_v25  ;;  %v2757_v42 = vshrl.u32 %v9761_v51, 16  ;;  %v2763_v4 = vshll.u32 %v9766_v8, 16  ;;  %v3532_v18 = vsel %vm9624_vm1, %v3530_v34, %v3531_v24  ;;  %v2768_v0 = vshrl.u32 %v9793_v5, 16  ;;  %v2430_v8 = vld [vmem:[#allocation2 + $0xbc] sm:$0x1] }
 0x24d   : > { %8052 = vmatprep.mubr.msk.bf16.mxu0 %vm2872_vm11, %v7286_v45  ;;  %v2771_v40 = vshll.u32 %v9793_v5, 16  ;;  %v2777_v11 = vshll.u32 %v9773_v57, 16  ;;  %v7372_v63 = vcombine.low %v3529_v27, %v3532_v18  ;;  %v2750_v19 = vor.u32 %v2749_v10, %v2746_v28 }
 0x24e   : > { %v2755_v55 = vrot.slane %v2753_v29, 5  ;;  %v2759_v33 = vrot.slane %v2757_v42, 4  ;;  %v2770_v35 = vrot.slane %v2768_v0, 4  ;;  %v2781_v14 = vshrl.u32 %v9773_v57, 16 }
 0x24f   : > { %v2773_v37 = vrot.slane %v2771_v40, 5  ;;  %8124 = vmatprep.mubr.msk.bf16.mxu1 %vm2872_vm11, %v7372_v63  ;;  %v2751_v44 = vrot.slane %v2750_v19, 4  ;;  %v2779_v7 = vrot.slane %v2777_v11, 5  ;;  %v2765_v36 = vrot.slane %v2763_v4, 5  ;;  %v8720_v40 = vld [vmem:[#allocation2 + $0xc] sm:$0xff]  }
 0x250   : > { %v2760_v9 = vor.u32 %v2759_v33, %v2755_v55  ;;  %v2787_v50 = vshll.u32 %v9775_v15, 16  ;;  %v3535_v38 = vrot.slane %v9812_v43, 5  ;;  %v2783_v12 = vrot.slane %v2781_v14, 4 }
 0x251   : > { %v2774_v59 = vor.u32 %v2773_v37, %v2770_v35  ;;  %v7355_v61 = vrot.slane %v3392_v17, 9  ;;  %v3538_v32 = vrot.slane %v2430_v8, 5  ;;  %v2756_v3 = vsel %vm8896_vm4, %v2751_v44, %v2755_v55 }
 0x252   : > { %v2761_v24 = vrot.slane %v2760_v9, 4  ;;  %v3537_v21 = vrot.slane %v3535_v38, 4  ;;  %v2792_v13 = vshrl.u32 %v9816_v39, 16  ;;  %v2784_v45 = vor.u32 %v2783_v12, %v2779_v7  ;;  %v8723_v12 = vld [vmem:[#allocation2 + $0x18] sm:$0xff]  }
 0x253   : > { %v2775_v49 = vrot.slane %v2774_v59, 4  ;;  %v2795_v27 = vshll.u32 %v9816_v39, 16  ;;  %v2801_v15 = vshll.u32 %v9812_v43, 16  ;;  %v3536_v28 = vsel %vm9624_vm1, %v7355_v61, %v3535_v38  ;;  %v4201_v61 = vld [vmem:[#allocation2 + $0x10] sm:$0xf] }
 0x254   : > { %v2766_v25 = vsel %vm8896_vm4, %v2761_v24, %v2765_v36  ;;  %v3539_v10 = vsel %vm9624_vm1, %v3537_v21, %v3538_v32  ;;  %v2794_v29 = vrot.slane %v2792_v13, 4  ;;  %v2785_v42 = vrot.slane %v2784_v45, 4  ;;  %v8724_v13 = vld [vmem:[#allocation2 + $0x24] sm:$0xff]   ;;  %v3378_v24 = vld [vmem:[#allocation2 + $0xc] sm:$0xe] }
 0x255   : > { %v7287_v34 = vcombine.low %v2756_v3, %v2766_v25  ;;  %v2789_v4 = vrot.slane %v2787_v50, 5  ;;  %v7373_v18 = vcombine.low %v3536_v28, %v3539_v10  ;;  %v2797_v0 = vrot.slane %v2795_v27, 5  ;;  %v9857_v3 = vld [vmem:[%s11333_s3 + $0x28] sm:$0xff]   ;;  %v8768_v25 = vld [vmem:[#allocation2] sm:$0xf] }
 0x256   : > { %v2803_v11 = vrot.slane %v2801_v15, 5  ;;  %v2805_v63 = vshrl.u32 %v9812_v43, 16  ;;  %v2780_v19 = vsel %vm8896_vm4, %v2775_v49, %v2779_v7  ;;  %v2811_v17 = vshll.u32 %v2430_v8, 16  ;;  %v9863_v45 = vld [vmem:[#allocation2 + $0x4] sm:$0xf] }
 0x257   : > { %8053 = vmatmul.mubr.msk.bf16.gmra.mrb[56].mxu0 %vm2872_vm11, %v7287_v34  ;;  %v2790_v55 = vsel %vm8896_vm4, %v2785_v42, %v2789_v4  ;;  %8125 = vmatmul.mubr.msk.bf16.gmra.mrb[12].mxu1 %vm2872_vm11, %v7373_v18  ;;  %v2798_v33 = vor.u32 %v2797_v0, %v2794_v29  ;;  %v7307_v27 = vcombine.low %v8768_v25, %v9863_v45  ;;  %v4200_v34 = vld [vmem:[#allocation2 + $0xc] sm:$0xf]  ;;  %v4258_v28 = vshll.u32 %v4201_v61, 16  ;;  %v4203_v4 = vld [vmem:[#allocation2 + $0x18] sm:$0xf] }
 0x258   : > { %v7288_v35 = vcombine.low %v2780_v19, %v2790_v55  ;;  %8130 = vmatprep.mubr.msk.bf16.mxu1 %vm2872_vm11, %v8720_v40  ;;  %v2807_v37 = vrot.slane %v2805_v63, 4  ;;  %v2813_v38 = vrot.slane %v2811_v17, 5  ;;  %v4262_v10 = vshrl.u32 %v4201_v61, 16  ;;  %v4204_v18 = vld [vmem:[#allocation2 + $0x1c] sm:$0xf] }
 0x259   : > { %v2799_v44 = vrot.slane %v2798_v33, 4  ;;  %v4249_v29 = vshrl.u32 %v4200_v34, 16  ;;  %v4252_v42 = vshll.u32 %v4200_v34, 16  ;;  %v9872_v0 = vrot.slane %v4258_v28, 5  ;;  %v8726_v19 = vld [vmem:[#allocation2 + $0x3c] sm:$0xff]  }
 0x25a   : > { %8056 = vmatprep.mubr.msk.bf16.mxu0 %vm2872_vm11, %v7288_v35  ;;  %v2808_v9 = vor.u32 %v2807_v37, %v2803_v11  ;;  %v4264_v40 = vrot.slane %v4262_v10, 4  ;;  %v4273_v63 = vshrl.u32 %v4203_v4, 16  ;;  %v4282_v35 = vshll.u32 %v4204_v18, 16  ;;  %v8770_v17 = vld [vmem:[#allocation2 + $0xc] sm:$0xf] }
 0x25b   : > { %v2804_v49 = vsel %vm8896_vm4, %v2799_v44, %v2803_v11  ;;  %v8725_v11 = vld [vmem:[#allocation2 + $0x30] sm:$0xff]   ;;  %v4251_v55 = vrot.slane %v4249_v29, 4  ;;  %v4254_v33 = vrot.slane %v4252_v42, 5  ;;  %v4286_v37 = vshrl.u32 %v4204_v18, 16 }
 0x25c   : > { %v2809_v8 = vrot.slane %v2808_v9, 4  ;;  %v9874_v44 = vld [vmem:[#allocation2 + $0x10] sm:$0xf]  ;;  %v9885_v28 = vrot.slane %v4282_v35, 5  ;;  %v8728_v35 = vld [vmem:[#allocation2 + $0x54] sm:$0xff]  }
 0x25d   : > { %v7308_v9 = vcombine.low %v8770_v17, %v9874_v44  ;;  %v4288_v10 = vrot.slane %v4286_v37, 4  ;;  %v8774_v29 = vld [vmem:[%s11333_s3 + $0x10] sm:$0xff]   ;;  %v4208_v17 = vld [vmem:[#allocation2 + $0x2c] sm:$0x1]  ;;  %v3437_v50 = vrot.slane %v9874_v44, 5 }
 0x25e   : > { %v2814_v21 = vsel %vm8896_vm4, %v2809_v8, %v2813_v38  ;;  %v4202_v8 = vld [vmem:[#allocation2 + $0x14] sm:$0x1]  ;;  %v8772_v38 = vld [vmem:[#allocation2 + $0x18] sm:$0xf] }
 0x25f   : > { %v7289_v15 = vcombine.low %v2804_v49, %v2814_v21  ;;  %8131 = vmatmul.mubr.msk.bf16.vlgmr.msra.gmra.mrb[16].mxu1 %vm2872_vm11, %v8723_v12  ;;  %v9878_v12 = vld [vmem:[#allocation2 + $0x1c] sm:$0xf]  ;;  %v4265_v49 = vor.u32 %v4264_v40, %v9872_v0  ;;  %v4207_v21 = vld [vmem:[#allocation2 + $0x28] sm:$0xf]  ;;  %v4268_v34 = vshll.u32 %v4202_v8, 16 }
 0x260   : > { %8163 = vmatpush3.bf16.msra.mxu1 %v9705_v16  ;;  %8134 = vmatprep.mubr.msk.bf16.mxu1 %vm2872_vm11, %v8724_v13  ;;  %v4276_v16 = vshll.u32 %v4203_v4, 16  ;;  %v7309_v61 = vcombine.low %v8772_v38, %v9878_v12  ;;  %v4275_v13 = vrot.slane %v4273_v63, 4  ;;  %v4306_v42 = vshll.u32 %v4207_v21, 16  ;;  %v4205_v40 = vld [vmem:[#allocation2 + $0x20] sm:$0x1] }
 0x261   : > { %8057 = vmatmul.mubr.msk.bf16.gmra.mrb[60].mxu0 %vm2872_vm11, %v7289_v15  ;;  %8196 = vmatprep.subr.bf16.mxu1 %v9857_v3  ;;  %v4255_v15 = vor.u32 %v4254_v33, %v4251_v55  ;;  %v4310_v4 = vshrl.u32 %v4207_v21, 16  ;;  %v4266_v18 = vrot.slane %v4265_v49, 4  ;;  %v9890_v55 = vld [vmem:[#allocation2 + $0x28] sm:$0xf]  ;;  %v4270_v8 = vrot.slane %v4268_v34, 5 }
 0x262   : > { %8062 = vmatprep.mubr.msk.bf16.mxu0 %vm2872_vm11, %v7307_v27  ;;  %v4278_v25 = vrot.slane %v4276_v16, 5  ;;  %v4206_v27 = vld [vmem:[#allocation2 + $0x24] sm:$0xf]  ;;  %v8727_v16 = vld [vmem:[#allocation2 + $0x48] sm:$0xff]   ;;  %v4289_v38 = vor.u32 %v4288_v10, %v9885_v28  ;;  %v4292_v21 = vshll.u32 %v4205_v40, 16 }
 0x263   : > { %v4300_v63 = vshll.u32 %v4206_v27, 16  ;;  %v4256_v37 = vrot.slane %v4255_v15, 4  ;;  %v8779_v10 = vld [vmem:[#allocation2 + $0x3c] sm:$0xf] }
 0x264   : > { %v7312_v32 = vcombine.low %v8779_v10, %v9585_v20  ;;  %v9916_v20 = vld [vmem:[#allocation2 + $0x40] sm:$0xf]  ;;  %v4212_v10 = vld [vmem:[#allocation2 + $0x3c] sm:$0xf] }
 0x265   : > { %v4302_v34 = vrot.slane %v4300_v63, 5  ;;  %v3377_v63 = vld [vmem:[#allocation2] sm:$0xe]  ;;  %11418 = vst [vmem:[#allocation6_spill] sm:$0xff] %v9916_v20  ;;  %v4345_v14 = vshrl.u32 %v4212_v10, 16 }
 0x267   : > { %8135 = vmatmul.mubr.msk.bf16.gmra.mrb[20].mxu1 %vm2872_vm11, %v8725_v11  ;;  %v4297_v11 = vshrl.u32 %v4206_v27, 16  ;;  %v4271_v27 = vsel %vm8896_vm4, %v4266_v18, %v4270_v8  ;;  %v4261_v18 = vsel %vm8896_vm4, %v4256_v37, %v9872_v0  ;;  %v8729_v37 = vld [vmem:[#allocation2 + $0x60] sm:$0xff]  }
 0x268   : > { %8138 = vmatprep.mubr.msk.bf16.mxu1 %vm2872_vm11, %v8726_v19  ;;  %v4279_v19 = vor.u32 %v4278_v25, %v4275_v13  ;;  %v9898_v13 = vrot.slane %v4306_v42, 5  ;;  %v4312_v25 = vrot.slane %v4310_v4, 4  ;;  %v9907_v42 = vld [vmem:[#allocation2 + $0x34] sm:$0xf] }
 0x269   : > { %8063 = vmatmul.mubr.msk.bf16.vlgmr.msra.gmra.mrb[32].mxu0 %vm2872_vm11, %v7308_v9  ;;  %v8775_v9 = vld [vmem:[#allocation2 + $0x24] sm:$0xf]  ;;  %v4299_v15 = vrot.slane %v4297_v11, 4  ;;  %11417 = vst [vmem:[#allocation5_spill] sm:$0xff] %v9907_v42  ;;  %v4290_v11 = vrot.slane %v4289_v38, 4  ;;  %v4334_v0 = vshrl.u32 %v9907_v42, 16 }
 0x26a   : > { %8066 = vmatprep.mubr.msk.bf16.mxu0 %vm2872_vm11, %v7309_v61  ;;  %8095 = vmatpush3.bf16.msra.mxu0 %v8774_v29  ;;  %v7310_v33 = vcombine.low %v8775_v9, %v9890_v55  ;;  %v8777_v61 = vld [vmem:[#allocation2 + $0x30] sm:$0xf]  ;;  %v9894_v29 = vld [vmem:[#allocation2 + $0x34] sm:$0xf]  ;;  %v4316_v9 = vshll.u32 %v4208_v17, 16  ;;  %v4280_v40 = vrot.slane %v4279_v19, 4 }
 0x26b   : > { %v7311_v49 = vcombine.low %v8777_v61, %v9894_v29  ;;  %v3430_v17 = vrot.slane %v9863_v45, 5  ;;  %v4294_v19 = vrot.slane %v4292_v21, 5  ;;  %v4209_v61 = vld [vmem:[#allocation2 + $0x30] sm:$0xf]  ;;  %v7340_v38 = vrot.slane %v3377_v63, 9 }
 0x26c   : > { %v4318_v8 = vrot.slane %v4316_v9, 5  ;;  %v4285_v45 = vsel %vm8896_vm4, %v4280_v40, %v9885_v28  ;;  %v4358_v21 = vshrl.u32 %v9916_v20, 16  ;;  %v3444_v28 = vrot.slane %v9878_v12, 5 }
 0x26d   : > { %v4321_v40 = vshrl.u32 %v4209_v61, 16  ;;  %v4324_v63 = vshll.u32 %v4209_v61, 16  ;;  %v4336_v7 = vrot.slane %v4334_v0, 4  ;;  %v9946_v12 = vsel %vm9624_vm1, %v7340_v38, %v3430_v17 }
 0x26e   : > { %v4360_v44 = vrot.slane %v4358_v21, 4  ;;  %v3439_v61 = vrot.slane %v3437_v50, 4  ;;  %v4347_v38 = vrot.slane %v4345_v14, 4 }
 0x26f   : > { %8139 = vmatmul.mubr.msk.bf16.gmra.mrb[24].mxu1 %vm2872_vm11, %v8727_v16  ;;  %v7313_v16 = vcombine.low %v9594_v58, %v9596_v2  ;;  %v9920_v2 = vcombine.low %v4261_v18, %v4271_v27  ;;  %v4354_v27 = vshll.u32 %v9916_v20, 16  ;;  %v8730_v18 = vld [vmem:[#allocation2 + $0x6c] sm:$0xff]   ;;  %v3472_v20 = vrot.slane %v8786_v47, 5 }
 0x270   : > { %8142 = vmatprep.mubr.msk.bf16.mxu1 %vm2872_vm11, %v8728_v35  ;;  %v4303_v35 = vor.u32 %v4302_v34, %v4299_v15  ;;  %v3432_v15 = vrot.slane %v3430_v17, 4  ;;  %v8780_v34 = vld [vmem:[#allocation2 + $0x8] sm:$0x1]  ;;  %v9957_v17 = vld [vmem:[#allocation2 + $0x44] sm:$0x1]  ;;  %v11428_v47 = vcombine.low %v9754_v60, %v9733_v6 }
 0x271   : > { %8067 = vmatmul.mubr.msk.bf16.gmra.mrb[36].mxu0 %vm2872_vm11, %v7310_v33  ;;  %v4313_v33 = vor.u32 %v4312_v25, %v9898_v13  ;;  %v4295_v25 = vsel %vm8896_vm4, %v4290_v11, %v4294_v19  ;;  %v3433_v9 = vrot.slane %v8780_v34, 5  ;;  %v4348_v11 = vshll.u32 %v4212_v10, 16  ;;  %v9948_v10 = vld [vmem:[#allocation2 + $0x38] sm:$0x1]  ;;  %11420 = vst [vmem:[#allocation8_spill] sm:$0xff] %v9957_v17 }
 0x272   : > { %8070 = vmatprep.mubr.msk.bf16.mxu0 %vm2872_vm11, %v7311_v49  ;;  %v4330_v49 = vshll.u32 %v9907_v42, 16  ;;  %v4304_v19 = vrot.slane %v4303_v35, 4  ;;  %v7341_v34 = vrot.slane %v3378_v24, 9  ;;  %v9939_v58 = vrot.slane %v4354_v27, 5  ;;  %11419 = vst [vmem:[#allocation7_spill] sm:$0xff] %v9948_v10 }
 0x273   : > { %v4314_v59 = vrot.slane %v4313_v33, 4  ;;  %v9942_v33 = vcombine.low %v4285_v45, %v4295_v25  ;;  %v4323_v35 = vrot.slane %v4321_v40, 4  ;;  %v4326_v45 = vrot.slane %v4324_v63, 5  ;;  %v4227_v6 = vld [vmem:[#allocation2 + $0x78] sm:$0xf] }
 0x274   : > { %v9936_v36 = vrot.slane %v4330_v49, 5  ;;  %v8781_v49 = vld [vmem:[#allocation2 + $0x14] sm:$0x1]  ;;  %v4350_v21 = vrot.slane %v4348_v11, 5  ;;  %v4361_v4 = vor.u32 %v4360_v44, %v9939_v58  ;;  %v9969_v14 = vsel %vm9624_vm1, %v7341_v34, %v3437_v50  ;;  %v9983_v44 = vld [vmem:[#allocation2 + $0x4c] sm:$0xf] }
 0x275   : > { %v3440_v0 = vrot.slane %v8781_v49, 5  ;;  %v4319_v24 = vsel %vm8896_vm4, %v4314_v59, %v4318_v8  ;;  %v4340_v49 = vshll.u32 %v9948_v10, 16  ;;  %v3451_v59 = vrot.slane %v9890_v55, 5  ;;  %v8733_v8 = vld [vmem:[#allocation2 + $0x84] sm:$0xff]  }
 0x276   : > { %v4337_v27 = vor.u32 %v4336_v7, %v9936_v36  ;;  %v4364_v11 = vshll.u32 %v9957_v17, 16  ;;  %v4327_v34 = vor.u32 %v4326_v45, %v4323_v35  ;;  %v4378_v45 = vshll.u32 %v9983_v44, 16  ;;  %v10015_v7 = vld [vmem:[#allocation2 + $0x50] sm:$0x1]  ;;  %v3383_v10 = vld [vmem:[#allocation2 + $0x48] sm:$0xe] }
 0x277   : > { %8143 = vmatmul.mubr.msk.bf16.gmra.mrb[28].mxu1 %vm2872_vm11, %v8729_v37  ;;  %v3379_v37 = vld [vmem:[#allocation2 + $0x18] sm:$0xe]  ;;  %v9976_v55 = vsel %vm9624_vm1, %v3439_v61, %v3440_v0  ;;  %v11421_v61 = vcombine.low %v9632_v23, %v9644_v22  ;;  %v4362_v0 = vrot.slane %v4361_v4, 4 }
 0x278   : > { %8146 = vmatprep.mubr.msk.bf16.mxu1 %vm2872_vm11, %v8730_v18  ;;  %v8732_v18 = vld [vmem:[#allocation2 + $0x78] sm:$0xff]   ;;  %v7342_v25 = vrot.slane %v3379_v37, 9  ;;  %v4338_v37 = vrot.slane %v4337_v27, 4  ;;  %v4382_v27 = vshrl.u32 %v9983_v44, 16  ;;  %v4366_v4 = vrot.slane %v4364_v11, 5 }
 0x279   : > { %8071 = vmatmul.mubr.msk.bf16.gmra.mrb[40].mxu0 %vm2872_vm11, %v7312_v32  ;;  %v9954_v32 = vsel %vm9624_vm1, %v3432_v15, %v3433_v9  ;;  %v4309_v15 = vsel %vm8896_vm4, %v4304_v19, %v9898_v13  ;;  %v8782_v9 = vld [vmem:[#allocation2 + $0x20] sm:$0x1]  ;;  %v4215_v19 = vld [vmem:[#allocation2 + $0x48] sm:$0xf] }
 0x27a   : > { %8074 = vmatprep.mubr.msk.bf16.mxu0 %vm2872_vm11, %v7313_v16  ;;  %v3446_v16 = vrot.slane %v3444_v28, 4  ;;  %v3447_v40 = vrot.slane %v8782_v9, 5  ;;  %v9972_v63 = vcombine.low %v4309_v15, %v4319_v24  ;;  %v9980_v13 = vsel %vm9624_vm1, %v7342_v25, %v3444_v28 }
 0x27b   : > { %v4351_v24 = vor.u32 %v4350_v21, %v4347_v38  ;;  %v4342_v28 = vrot.slane %v4340_v49, 5  ;;  %v3453_v25 = vrot.slane %v3451_v59, 4  ;;  %v3458_v15 = vrot.slane %v9894_v29, 5  ;;  %v8783_v38 = vld [vmem:[#allocation2 + $0x2c] sm:$0x1] }
 0x27c   : > { %v9988_v50 = vsel %vm9624_vm1, %v3446_v16, %v3447_v40  ;;  %v4369_v16 = vshrl.u32 %v4215_v19, 16  ;;  %v4372_v35 = vshll.u32 %v4215_v19, 16  ;;  %v3454_v29 = vrot.slane %v8783_v38, 5  ;;  %v3381_v21 = vld [vmem:[#allocation2 + $0x30] sm:$0xe] }
 0x27d   : > { %v4218_v49 = vld [vmem:[#allocation2 + $0x54] sm:$0xf]  ;;  %v4352_v9 = vrot.slane %v4351_v24, 4  ;;  %v10007_v19 = vld [vmem:[#allocation2 + $0x58] sm:$0xf]  ;;  %v3460_v11 = vrot.slane %v3458_v15, 4 }
 0x27e   : > { %v10013_v22 = vsel %vm9624_vm1, %v3453_v25, %v3454_v29  ;;  %v8784_v38 = vld [vmem:[#allocation2 + $0x38] sm:$0x1]  ;;  %v4371_v46 = vrot.slane %v4369_v16, 4  ;;  %v10017_v24 = vrot.slane %v4378_v45, 5  ;;  %v4396_v17 = vshll.u32 %v4218_v49, 16 }
 0x27f   : > { %8147 = vmatmul.mubr.msk.bf16.gmra.mrb[0].mxu1 %vm2872_vm11, %v8732_v18  ;;  %v3380_v18 = vld [vmem:[#allocation2 + $0x24] sm:$0xe]  ;;  %v3461_v23 = vrot.slane %v8784_v38, 5  ;;  %v4406_v25 = vshrl.u32 %v10007_v19, 16  ;;  %v4388_v45 = vshll.u32 %v10015_v7, 16 }
 0x280   : > { %8150 = vmatprep.mubr.msk.bf16.mxu1 %vm2872_vm11, %v8733_v8  ;;  %v11422_v8 = vcombine.low %v9656_v1, %v9598_v48  ;;  %v4328_v48 = vrot.slane %v4327_v34, 4  ;;  %v4343_v1 = vsel %vm8896_vm4, %v4338_v37, %v4342_v28  ;;  %v7343_v40 = vrot.slane %v3380_v18, 9  ;;  %v8737_v34 = vld [vmem:[#allocation2 + $0x9c] sm:$0xff]  }
 0x281   : > { %8075 = vmatmul.mubr.msk.bf16.gmra.mrb[44].mxu0 %vm2872_vm11, %v11421_v61  ;;  %v8736_v61 = vld [vmem:[#allocation2 + $0x90] sm:$0xff]   ;;  %v4374_v37 = vrot.slane %v4372_v35, 5  ;;  %v4384_v28 = vrot.slane %v4382_v27, 4  ;;  %v4393_v18 = vshrl.u32 %v4218_v49, 16  ;;  %v7344_v35 = vrot.slane %v3381_v21, 9 }
 0x282   : > { %8078 = vmatprep.mubr.msk.bf16.mxu0 %vm2872_vm11, %v11422_v8  ;;  %v4367_v8 = vsel %vm8896_vm4, %v4362_v0, %v4366_v4  ;;  %v4402_v0 = vshll.u32 %v10007_v19, 16  ;;  %v4333_v4 = vsel %vm8896_vm4, %v4328_v48, %v9936_v36  ;;  %v10028_v16 = vsel %vm9624_vm1, %v7343_v40, %v3451_v59  ;;  %v4221_v21 = vld [vmem:[#allocation2 + $0x60] sm:$0xf]  ;;  %v10057_v40 = vld [vmem:[#allocation2 + $0x64] sm:$0xf] }
 0x283   : > { %v11423_v27 = vcombine.low %v9685_v30, %v9660_v52  ;;  %v10035_v29 = vcombine.low %v4333_v4, %v4343_v1  ;;  %v4357_v49 = vsel %vm8896_vm4, %v4352_v9, %v9939_v58  ;;  %v10044_v59 = vsel %vm9624_vm1, %v3460_v11, %v3461_v23  ;;  %v3382_v9 = vld [vmem:[#allocation2 + $0x3c] sm:$0xe]  ;;  %11425 = vst [vmem:[#allocation9_spill] sm:$0xff] %v10057_v40  ;;  %v10059_v23 = vld [vmem:[#allocation2 + $0x70] sm:$0xf] }
 0x284   : > { %v11424_v48 = vcombine.low %v9711_v41, %v9670_v54  ;;  %v10050_v52 = vcombine.low %v4357_v49, %v4367_v8  ;;  %v10054_v30 = vsel %vm9624_vm1, %v7344_v35, %v3458_v15  ;;  %v4375_v58 = vor.u32 %v4374_v37, %v4371_v46  ;;  %11426 = vst [vmem:[#allocation10_spill] sm:$0xff] %v10059_v23  ;;  %v4224_v37 = vld [vmem:[#allocation2 + $0x6c] sm:$0xf]  ;;  %v8785_v38 = vld [vmem:[#allocation2 + $0x40] sm:$0xf] }
 0x285   : > { %v4385_v1 = vor.u32 %v4384_v28, %v10017_v24  ;;  %v4395_v11 = vrot.slane %v4393_v18, 4  ;;  %v4398_v54 = vrot.slane %v4396_v17, 5  ;;  %v10063_v41 = vrot.slane %v4402_v0, 5  ;;  %v8740_v28 = vld [vmem:[#allocation2 + $0xa8] sm:$0xff]   ;;  %v8741_v17 = vld [vmem:[#allocation2 + $0xb4] sm:$0xff]  }
 0x286   : > { %v4408_v8 = vrot.slane %v4406_v25, 4  ;;  %v4390_v15 = vrot.slane %v4388_v45, 5  ;;  %v4420_v46 = vshll.u32 %v4221_v21, 16  ;;  %v4426_v4 = vshll.u32 %v10057_v40, 16 }
 0x287   : > { %8151 = vmatmul.mubr.msk.bf16.gmra.mrb[4].mxu1 %vm2872_vm11, %v8736_v61  ;;  %v10061_v61 = vld [vmem:[#allocation2 + $0x5c] sm:$0x1]  ;;  %v4430_v35 = vshrl.u32 %v10057_v40, 16  ;;  %v4454_v18 = vshrl.u32 %v10059_v23, 16  ;;  %v4376_v0 = vrot.slane %v4375_v58, 4  ;;  %v4386_v49 = vrot.slane %v4385_v1, 4 }
 0x288   : > { %8154 = vmatprep.mubr.msk.bf16.mxu1 %vm2872_vm11, %v8737_v34  ;;  %v4417_v34 = vshrl.u32 %v4221_v21, 16  ;;  %v4412_v25 = vshll.u32 %v10061_v61, 16  ;;  %v4399_v45 = vor.u32 %v4398_v54, %v4395_v11  ;;  %v4409_v21 = vor.u32 %v4408_v8, %v10063_v41 }
 0x289   : > { %8079 = vmatmul.mubr.msk.bf16.gmra.mrb[48].mxu0 %vm2872_vm11, %v11423_v27  ;;  %v4450_v27 = vshll.u32 %v10059_v23, 16  ;;  %v3465_v36 = vrot.slane %v8785_v38, 5  ;;  %v4422_v23 = vrot.slane %v4420_v46, 5  ;;  %v4441_v40 = vshrl.u32 %v4224_v37, 16  ;;  %v8787_v46 = vld [vmem:[#allocation2 + $0x44] sm:$0x1] }
 0x28a   : > { %8082 = vmatprep.mubr.msk.bf16.mxu0 %vm2872_vm11, %v11424_v48  ;;  %v7345_v48 = vrot.slane %v3382_v9, 9  ;;  %v4419_v42 = vrot.slane %v4417_v34, 4  ;;  %v4444_v58 = vshll.u32 %v4224_v37, 16  ;;  %v11427_v1 = vcombine.low %v9741_v62, %v9727_v26 }
 0x28b   : > { %v10079_v9 = vrot.slane %v4426_v4, 5  ;;  %v4432_v11 = vrot.slane %v4430_v35, 4  ;;  %v10081_v54 = vrot.slane %v4450_v27, 5  ;;  %v4456_v8 = vrot.slane %v4454_v18, 4  ;;  %v10096_v18 = vld [vmem:[#allocation2 + $0x68] sm:$0x1] }
 0x28c   : > { %v4381_v38 = vsel %vm8896_vm4, %v4376_v0, %v10017_v24  ;;  %v4414_v34 = vrot.slane %v4412_v25, 5  ;;  %v3468_v26 = vrot.slane %v8787_v46, 5  ;;  %v7346_v62 = vrot.slane %v3383_v10, 9  ;;  %v8744_v0 = vld [vmem:[#allocation2 + $0xc0] sm:$0xff]  }
 0x28d   : > { %v4391_v37 = vsel %vm8896_vm4, %v4386_v49, %v4390_v15  ;;  %v10094_v4 = vsel %vm9624_vm1, %v7345_v48, %v3465_v36  ;;  %v3467_v35 = vrot.slane %v3465_v36, 4  ;;  %v4410_v60 = vrot.slane %v4409_v21, 4  ;;  %v8788_v49 = vld [vmem:[#allocation2 + $0x58] sm:$0xf]  ;;  %v8789_v36 = vld [vmem:[#allocation2 + $0x50] sm:$0x1] }
 0x28e   : > { %v3474_v27 = vrot.slane %v3472_v20, 4  ;;  %v4446_v24 = vrot.slane %v4444_v58, 5  ;;  %v4423_v25 = vor.u32 %v4422_v23, %v4419_v42  ;;  %v4433_v10 = vor.u32 %v4432_v11, %v10079_v9  ;;  %v10117_v11 = vld [vmem:[#allocation2 + $0x7c] sm:$0xf] }
 0x28f   : > { %8155 = vmatmul.mubr.msk.bf16.gmra.mrb[8].mxu1 %vm2872_vm11, %v8740_v28  ;;  %v4400_v28 = vrot.slane %v4399_v45, 4  ;;  %v4457_v15 = vor.u32 %v4456_v8, %v10081_v54  ;;  %v3479_v45 = vrot.slane %v8788_v49, 5  ;;  %v10102_v48 = vcombine.low %v4381_v38, %v4391_v37  ;;  %v3384_v37 = vld [vmem:[#allocation2 + $0x54] sm:$0xe]  ;;  %v4230_v49 = vld [vmem:[#allocation2 + $0x84] sm:$0xf] }
 0x290   : > { %8158 = vmatprep.mubr.msk.bf16.mxu1 %vm2872_vm11, %v8741_v17  ;;  %v4443_v17 = vrot.slane %v4441_v40, 4  ;;  %v4465_v21 = vshrl.u32 %v4227_v6, 16  ;;  %v4468_v46 = vshll.u32 %v4227_v6, 16  ;;  %v10110_v40 = vsel %vm9624_vm1, %v3467_v35, %v3468_v26 }
 0x291   : > { %8083 = vmatmul.mubr.msk.bf16.gmra.mrb[52].mxu0 %vm2872_vm11, %v11427_v1  ;;  %v10099_v1 = vld [vmem:[#allocation2 + $0x74] sm:$0x1]  ;;  %v4405_v42 = vsel %vm8896_vm4, %v4400_v28, %v10063_v41  ;;  %v10114_v23 = vsel %vm9624_vm1, %v7346_v62, %v3472_v20  ;;  %v4436_v58 = vshll.u32 %v10096_v18, 16  ;;  %v4415_v8 = vsel %vm8896_vm4, %v4410_v60, %v4414_v34 }
 0x292   : > { %8086 = vmatprep.mubr.msk.bf16.mxu0 %vm2872_vm11, %v11428_v47  ;;  %v3475_v47 = vrot.slane %v8789_v36, 5  ;;  %v4447_v38 = vor.u32 %v4446_v24, %v4443_v17  ;;  %v4460_v26 = vshll.u32 %v10099_v1, 16  ;;  %v11429_v20 = vcombine.low %v9781_v56, %v9761_v51  ;;  %v10144_v36 = vld [vmem:[#allocation2 + $0x88] sm:$0xf]  ;;  %v4242_v51 = vld [vmem:[#allocation2 + $0xb4] sm:$0xf] }
 0x293   : > { %v4424_v62 = vrot.slane %v4423_v25, 4  ;;  %v4434_v28 = vrot.slane %v4433_v10, 4  ;;  %v4458_v35 = vrot.slane %v4457_v15, 4  ;;  %v11430_v34 = vcombine.low %v9793_v5, %v9773_v57 }
 0x294   : > { %v10125_v41 = vsel %vm9624_vm1, %v3474_v27, %v3475_v47  ;;  %v4467_v6 = vrot.slane %v4465_v21, 4  ;;  %v4470_v60 = vrot.slane %v4468_v46, 5  ;;  %v4474_v27 = vshll.u32 %v10117_v11, 16 }
 0x295   : > { %v4478_v17 = vshrl.u32 %v10117_v11, 16  ;;  %v4438_v56 = vrot.slane %v4436_v58, 5  ;;  %v7347_v24 = vrot.slane %v3384_v37, 9  ;;  %v10140_v10 = vcombine.low %v4405_v42, %v4415_v8  ;;  %v10162_v58 = vld [vmem:[%s11333_s3 + $0x30] sm:$0xff]  }
 0x296   : > { %v4448_v5 = vrot.slane %v4447_v38, 4  ;;  %v4462_v15 = vrot.slane %v4460_v26, 5  ;;  %v4429_v47 = vsel %vm8896_vm4, %v4424_v62, %v10079_v9  ;;  %11431 = vst [vmem:[#allocation11_spill] sm:$0xff] %v10162_v58  ;;  %v4471_v9 = vor.u32 %v4470_v60, %v4467_v6  ;;  %v10168_v37 = vld [vmem:[#allocation2 + $0x94] sm:$0xf] }
 0x297   : > { %8159 = vmatmul.mubr.msk.bf16.gmra.mrb[12].mxu1 %vm2872_vm11, %v8744_v0  ;;  %v8790_v0 = vld [vmem:[#allocation2 + $0x5c] sm:$0x1]  ;;  %v4439_v21 = vsel %vm8896_vm4, %v4434_v28, %v4438_v56  ;;  %v10153_v46 = vsel %vm9624_vm1, %v7347_v24, %v3479_v45  ;;  %v10166_v38 = vrot.slane %v4474_v27, 5  ;;  %v4480_v26 = vrot.slane %v4478_v17, 4  ;;  %11432 = vst [vmem:[#allocation12_spill] sm:$0xff] %v10168_v37 }
 0x298   : > { %8164 = vmatprep.mubr.msk.bf16.mxu1 %vm2872_vm11, %v9920_v2  ;;  %v3481_v2 = vrot.slane %v3479_v45, 4  ;;  %v3482_v25 = vrot.slane %v8790_v0, 5  ;;  %v4463_v8 = vsel %vm8896_vm4, %v4458_v35, %v4462_v15  ;;  %v10170_v45 = vld [vmem:[#allocation2 + $0xa0] sm:$0xf]  ;;  %v4489_v62 = vshrl.u32 %v4230_v49, 16 }
 0x299   : > { %8087 = vmatmul.mubr.msk.bf16.gmra.mrb[56].mxu0 %vm2872_vm11, %v11429_v20  ;;  %11433 = vst [vmem:[#allocation13_spill] sm:$0xff] %v10170_v45  ;;  %v10174_v20 = vld [vmem:[#allocation2 + $0x80] sm:$0x1]  ;;  %v4492_v28 = vshll.u32 %v4230_v49, 16  ;;  %v10181_v35 = vcombine.low %v4429_v47, %v4439_v21  ;;  %v4453_v6 = vsel %vm8896_vm4, %v4448_v5, %v10081_v54  ;;  %v4233_v60 = vld [vmem:[#allocation2 + $0x90] sm:$0xf]  ;;  %v11434_v27 = vcombine.low %v9816_v39, %v9812_v43 }
 0x29a   : > { %8090 = vmatprep.mubr.msk.bf16.mxu0 %vm2872_vm11, %v11430_v34  ;;  %v10157_v42 = vsel %vm9624_vm1, %v3481_v2, %v3482_v25  ;;  %v4498_v2 = vshll.u32 %v10144_v36, 16  ;;  %v4502_v34 = vshrl.u32 %v10144_v36, 16  ;;  %v4526_v17 = vshrl.u32 %v10168_v37, 16  ;;  %v10205_v5 = vld [vmem:[#allocation2 + $0x8c] sm:$0x1] }
 0x29b   : > { %v4546_v56 = vshll.u32 %v10170_v45, 16  ;;  %v4550_v24 = vshrl.u32 %v10170_v45, 16  ;;  %v11435_v54 = vcombine.low %v9946_v12, %v9954_v32  ;;  %v10201_v0 = vcombine.low %v4453_v6, %v4463_v8  ;;  %v10209_v32 = vld [vmem:[#allocation2 + $0xac] sm:$0xf] }
 0x29c   : > { %v4472_v43 = vrot.slane %v4471_v9, 4  ;;  %v4481_v39 = vor.u32 %v4480_v26, %v10166_v38  ;;  %v4484_v25 = vshll.u32 %v10174_v20, 16  ;;  %v4491_v15 = vrot.slane %v4489_v62, 4  ;;  %11436 = vst [vmem:[#allocation14_spill] sm:$0xff] %v10209_v32 }
 0x29d   : > { %v4494_v49 = vrot.slane %v4492_v28, 5  ;;  %v10207_v47 = vrot.slane %v4498_v2, 5  ;;  %v4504_v21 = vrot.slane %v4502_v34, 4  ;;  %v4528_v9 = vrot.slane %v4526_v17, 4  ;;  %v10224_v17 = vld [vmem:[#allocation2 + $0xa4] sm:$0x1] }
 0x29e   : > { %v10213_v6 = vrot.slane %v4546_v56, 5  ;;  %v4552_v26 = vrot.slane %v4550_v24, 4  ;;  %v4477_v62 = vsel %vm8896_vm4, %v4472_v43, %v10166_v38  ;;  %v4482_v28 = vrot.slane %v4481_v39, 4 }
 0x29f   : > { %8165 = vmatmul.mubr.msk.bf16.vlgmr.msra.gmra.mrb[16].mxu1 %vm2872_vm11, %v9942_v33  ;;  %v4516_v33 = vshll.u32 %v4233_v60, 16  ;;  %v4486_v2 = vrot.slane %v4484_v25, 5  ;;  %v4508_v34 = vshll.u32 %v10205_v5, 16  ;;  %v4570_v56 = vshll.u32 %v10209_v32, 16 }
 0x2a0   : > { %8197 = vmatpush3.bf16.msra.mxu1 %v9857_v3  ;;  %8168 = vmatprep.mubr.msk.bf16.mxu1 %vm2872_vm11, %v9972_v63  ;;  %v4522_v3 = vshll.u32 %v10168_v37, 16  ;;  %v4236_v63 = vld [vmem:[#allocation2 + $0x9c] sm:$0xf]  ;;  %v4574_v24 = vshrl.u32 %v10209_v32, 16  ;;  %v11439_v32 = vcombine.low %v9980_v13, %v9988_v50 }
 0x2a1   : > { %8091 = vmatmul.mubr.msk.bf16.gmra.mrb[60].mxu0 %vm2872_vm11, %v11434_v27  ;;  %8230 = vmatprep.subr.bf16.mxu1 %v10162_v58  ;;  %v4513_v27 = vshrl.u32 %v4233_v60, 16  ;;  %v4537_v57 = vshrl.u32 %v4236_v63, 16  ;;  %v4540_v12 = vshll.u32 %v4236_v63, 16  ;;  %v4495_v60 = vor.u32 %v4494_v49, %v4491_v15  ;;  %v10222_v63 = vld [vmem:[#allocation2 + $0x98] sm:$0x1] }
 0x2a2   : > { %8096 = vmatprep.mubr.msk.bf16.mxu0 %vm2872_vm11, %v11435_v54  ;;  %v10211_v8 = vrot.slane %v4522_v3, 5  ;;  %v4239_v54 = vld [vmem:[#allocation2 + $0xa8] sm:$0xf]  ;;  %v4505_v3 = vor.u32 %v4504_v21, %v10207_v47  ;;  %11437 = vst [vmem:[#allocation15_spill] sm:$0xff] %v10222_v63  ;;  %v4518_v43 = vrot.slane %v4516_v33, 5  ;;  %v4553_v49 = vor.u32 %v4552_v26, %v10213_v6 }
 0x2a3   : > { %v4515_v38 = vrot.slane %v4513_v27, 4  ;;  %v4539_v39 = vrot.slane %v4537_v57, 4  ;;  %v4542_v25 = vrot.slane %v4540_v12, 5  ;;  %v4561_v21 = vshrl.u32 %v4239_v54, 16  ;;  %v10246_v12 = vld [vmem:[#allocation2 + $0xb8] sm:$0xf] }
 0x2a4   : > { %v4529_v15 = vor.u32 %v4528_v9, %v10211_v8  ;;  %v4564_v58 = vshll.u32 %v4239_v54, 16  ;;  %v4510_v57 = vrot.slane %v4508_v34, 5  ;;  %v4532_v33 = vshll.u32 %v10222_v63, 16  ;;  %v10250_v63 = vld [vmem:[#allocation2 + $0xb0] sm:$0x1] }
 0x2a5   : > { %v4576_v27 = vrot.slane %v4574_v24, 4  ;;  %v4585_v9 = vshrl.u32 %v4242_v51, 16  ;;  %v4588_v26 = vshll.u32 %v4242_v51, 16  ;;  %v4496_v54 = vrot.slane %v4495_v60, 4 }
 0x2a6   : > { %v4519_v13 = vor.u32 %v4518_v43, %v4515_v38  ;;  %v4543_v50 = vor.u32 %v4542_v25, %v4539_v39  ;;  %v4554_v45 = vrot.slane %v4553_v49, 4  ;;  %v4563_v37 = vrot.slane %v4561_v21, 4  ;;  %v10257_v43 = vld [vmem:[#allocation2 + $0xc4] sm:$0xf] }
 0x2a7   : > { %8169 = vmatmul.mubr.msk.bf16.gmra.mrb[20].mxu1 %vm2872_vm11, %v10035_v29  ;;  %v11438_v29 = vcombine.low %v9969_v14, %v9976_v55  ;;  %v4556_v14 = vshll.u32 %v10224_v17, 16  ;;  %v10244_v55 = vrot.slane %v4570_v56, 5  ;;  %v4534_v34 = vrot.slane %v4532_v33, 5 }
 0x2a8   : > { %8172 = vmatprep.mubr.msk.bf16.mxu1 %vm2872_vm11, %v10050_v52  ;;  %v4487_v52 = vsel %vm8896_vm4, %v4482_v28, %v4486_v2  ;;  %v4566_v28 = vrot.slane %v4564_v58, 5  ;;  %v4594_v56 = vshll.u32 %v10246_v12, 16  ;;  %v4598_v24 = vshrl.u32 %v10246_v12, 16 }
 0x2a9   : > { %8097 = vmatmul.mubr.msk.bf16.vlgmr.msra.gmra.mrb[32].mxu0 %vm2872_vm11, %v11438_v29  ;;  %v4506_v29 = vrot.slane %v4505_v3, 4  ;;  %v10248_v2 = vcombine.low %v4477_v62, %v4487_v52  ;;  %v4558_v51 = vrot.slane %v4556_v14, 5  ;;  %v4577_v60 = vor.u32 %v4576_v27, %v10244_v55  ;;  %v4245_v52 = vld [vmem:[#allocation2 + $0xc0] sm:$0xf] }
 0x2aa   : > { %8100 = vmatprep.mubr.msk.bf16.mxu0 %vm2872_vm11, %v11439_v32  ;;  %v4530_v32 = vrot.slane %v4529_v15, 4  ;;  %v4587_v3 = vrot.slane %v4585_v9, 4  ;;  %v4590_v38 = vrot.slane %v4588_v26, 5  ;;  %v4501_v58 = vsel %vm8896_vm4, %v4496_v54, %v10207_v47 }
 0x2ab   : > { %v4511_v62 = vsel %vm8896_vm4, %v4506_v29, %v4510_v57  ;;  %v4520_v39 = vrot.slane %v4519_v13, 4  ;;  %v4544_v25 = vrot.slane %v4543_v50, 4  ;;  %v11440_v15 = vcombine.low %v10028_v16, %v10013_v22 }
 0x2ac   : > { %v4535_v49 = vsel %vm8896_vm4, %v4530_v32, %v4534_v34  ;;  %v4567_v21 = vor.u32 %v4566_v28, %v4563_v37  ;;  %v4580_v47 = vshll.u32 %v10250_v63, 16  ;;  %v11441_v57 = vcombine.low %v10054_v30, %v10044_v59  ;;  %v4935_v28 = vld [vmem:[#allocation2 + $0x48] sm:$0xe] }
 0x2ad   : > { %v10281_v33 = vrot.slane %v4594_v56, 5  ;;  %v4600_v22 = vrot.slane %v4598_v24, 4  ;;  %v4618_v16 = vshll.u32 %v10257_v43, 16  ;;  %v4622_v14 = vshrl.u32 %v10257_v43, 16 }
 0x2ae   : > { %v10285_v27 = vcombine.low %v4501_v58, %v4511_v62  ;;  %v10287_v9 = vrot.slane %v4577_v60, 4  ;;  %v4591_v37 = vor.u32 %v4590_v38, %v4587_v3  ;;  %v4525_v59 = vsel %vm8896_vm4, %v4520_v39, %v10211_v8  ;;  %v4937_v39 = vld [vmem:[#allocation2 + $0x60] sm:$0xe] }
 0x2af   : > { %8173 = vmatmul.mubr.msk.bf16.gmra.mrb[24].mxu1 %vm2872_vm11, %v10102_v48  ;;  %v10266_v48 = vld [vmem:[#allocation2 + $0xbc] sm:$0x1]  ;;  %v4549_v30 = vsel %vm8896_vm4, %v4544_v25, %v10213_v6  ;;  %v4609_v26 = vshrl.u32 %v4245_v52, 16  ;;  %v4612_v54 = vshll.u32 %v4245_v52, 16  ;;  %v10296_v29 = vcombine.low %v4525_v59, %v4535_v49  ;;  %v4936_v6 = vld [vmem:[#allocation2 + $0x54] sm:$0xe] }
 0x2b0   : > { %8176 = vmatprep.mubr.msk.bf16.mxu1 %vm2872_vm11, %v10140_v10  ;;  %v4559_v10 = vsel %vm8896_vm4, %v4554_v45, %v4558_v51  ;;  %v4604_v45 = vshll.u32 %v10266_v48, 16  ;;  %v10300_v50 = vrot.slane %v4567_v21, 4  ;;  %v10302_v32 = vrot.slane %v4580_v47, 5  ;;  %v4938_v52 = vld [vmem:[#allocation2 + $0x6c] sm:$0xe] }
 0x2b1   : > { %8101 = vmatmul.mubr.msk.bf16.gmra.mrb[36].mxu0 %vm2872_vm11, %v11440_v15  ;;  %v10298_v13 = vcombine.low %v4549_v30, %v4559_v10  ;;  %v4601_v34 = vor.u32 %v4600_v22, %v10281_v33  ;;  %v10305_v56 = vrot.slane %v4618_v16, 5  ;;  %v10307_v8 = vrot.slane %v4622_v14, 4  ;;  %v4939_v22 = vld [vmem:[#allocation2 + $0x78] sm:$0xe]  ;;  %v4940_v59 = vld [vmem:[#allocation2 + $0x84] sm:$0xe] }
 0x2b2   : > { %8104 = vmatprep.mubr.msk.bf16.mxu0 %vm2872_vm11, %v11441_v57  ;;  %v5031_v24 = vrot.slane %v9983_v44, 5  ;;  %v4583_v51 = vsel %vm8896_vm4, %v10287_v9, %v10302_v32  ;;  %v10316_v60 = vrot.slane %v4591_v37, 4  ;;  %v10318_v3 = vrot.slane %v4604_v45, 5 }
 0x2b3   : > { %v5038_v38 = vrot.slane %v10007_v19, 5  ;;  %v10323_v58 = vrot.slane %v4609_v26, 4  ;;  %v10325_v44 = vrot.slane %v4612_v54, 5  ;;  %v7466_v62 = vrot.slane %v4935_v28, 9  ;;  %v11445_v54 = vld [vmem:[#allocation10_spill] sm:$0xff] }
 0x2b4   : > { %v11442_v25 = vcombine.low %v10094_v4, %v10110_v40  ;;  %v5033_v15 = vrot.slane %v5031_v24, 4  ;;  %v7467_v49 = vrot.slane %v4936_v6, 9  ;;  %v5041_v19 = vrot.slane %v10061_v61, 5  ;;  %v11444_v40 = vld [vmem:[#allocation9_spill] sm:$0xff] }
 0x2b5   : > { %v5040_v10 = vrot.slane %v5038_v38, 4  ;;  %v10337_v21 = vrot.slane %v4601_v34, 4  ;;  %v10343_v4 = vsel %vm9624_vm1, %v7466_v62, %v5031_v24  ;;  %v5045_v47 = vrot.slane %v11444_v40, 5 }
 0x2b6   : > { %v7468_v57 = vrot.slane %v4937_v39, 9  ;;  %v5048_v45 = vrot.slane %v10096_v18, 5  ;;  %v7469_v26 = vrot.slane %v4938_v52, 9  ;;  %v5052_v28 = vrot.slane %v11445_v54, 5  ;;  %v4943_v52 = vld [vmem:[#allocation2 + $0xa8] sm:$0xe] }
 0x2b7   : > { %8177 = vmatmul.mubr.msk.bf16.gmra.mrb[28].mxu1 %vm2872_vm11, %v10181_v35  ;;  %v5034_v35 = vrot.slane %v10015_v7, 5  ;;  %v4625_v7 = vor.u32 %v10307_v8, %v10305_v56  ;;  %v5047_v37 = vrot.slane %v5045_v47, 4  ;;  %v5059_v34 = vrot.slane %v10117_v11, 5  ;;  %v4941_v11 = vld [vmem:[#allocation2 + $0x90] sm:$0xe] }
 0x2b8   : > { %8180 = vmatprep.mubr.msk.bf16.mxu1 %vm2872_vm11, %v10201_v0  ;;  %v11443_v0 = vcombine.low %v10114_v23, %v10125_v41  ;;  %v10352_v23 = vsel %vm9624_vm1, %v7467_v49, %v5038_v38  ;;  %v10356_v41 = vsel %vm9624_vm1, %v5040_v10, %v5041_v19  ;;  %v10365_v30 = vsel %vm9624_vm1, %v7468_v57, %v5045_v47  ;;  %v11447_v19 = vld [vmem:[#allocation12_spill] sm:$0xff] }
 0x2b9   : > { %8105 = vmatmul.mubr.msk.bf16.gmra.mrb[40].mxu0 %vm2872_vm11, %v11442_v25  ;;  %v10348_v61 = vsel %vm9624_vm1, %v5033_v15, %v5034_v35  ;;  %v7485_v14 = vcombine.low %v10352_v23, %v10356_v41  ;;  %v10371_v24 = vsel %vm9624_vm1, %v5047_v37, %v5048_v45  ;;  %v5055_v6 = vrot.slane %v10099_v1, 5  ;;  %v11448_v45 = vld [vmem:[#allocation15_spill] sm:$0xff]  ;;  %v10584_v41 = vld [vmem:[#allocation2 + $0x20] sm:$0x1] }
 0x2ba   : > { %8108 = vmatprep.mubr.msk.bf16.mxu0 %vm2872_vm11, %v11443_v0  ;;  %v7484_v16 = vcombine.low %v10343_v4, %v10348_v61  ;;  %v7470_v38 = vrot.slane %v4939_v22, 9  ;;  %v5066_v62 = vrot.slane %v10144_v36, 5  ;;  %v7486_v18 = vcombine.low %v10365_v30, %v10371_v24  ;;  %v10572_v4 = vld [vmem:[#allocation2 + $0x1c] sm:$0xf]  ;;  %v10578_v61 = vld [vmem:[#allocation2 + $0x28] sm:$0xf] }
 0x2bb   : > { %v5054_v35 = vrot.slane %v5052_v28, 4  ;;  %v5062_v39 = vrot.slane %v10174_v20, 5  ;;  %v7471_v25 = vrot.slane %v4940_v59, 9  ;;  %v10384_v1 = vsel %vm9624_vm1, %v7469_v26, %v5052_v28  ;;  %v4944_v26 = vld [vmem:[#allocation2 + $0xb4] sm:$0xe] }
 0x2bc   : > { %v5061_v15 = vrot.slane %v5059_v34, 4  ;;  %v5068_v36 = vrot.slane %v5066_v62, 4  ;;  %v5069_v49 = vrot.slane %v10205_v5, 5  ;;  %v5073_v0 = vrot.slane %v11447_v19, 5  ;;  %v4942_v5 = vld [vmem:[#allocation2 + $0x9c] sm:$0xe] }
 0x2bd   : > { %v10393_v20 = vsel %vm9624_vm1, %v5054_v35, %v5055_v6  ;;  %v10401_v10 = vsel %vm9624_vm1, %v7471_v25, %v5066_v62  ;;  %v7472_v47 = vrot.slane %v4941_v11, 9  ;;  %v5076_v59 = vrot.slane %v11448_v45, 5  ;;  %v4945_v19 = vld [vmem:[#allocation2 + $0xc0] sm:$0xe]  ;;  %v6497_v23 = vld [vmem:[#allocation2 + $0x18] sm:$0xe] }
 0x2be   : > { %v10412_v40 = vsel %vm9624_vm1, %v5068_v36, %v5069_v49  ;;  %v5075_v37 = vrot.slane %v5073_v0, 4  ;;  %v7473_v28 = vrot.slane %v4942_v5, 9  ;;  %v7474_v25 = vrot.slane %v4943_v52, 9  ;;  %v10587_v30 = vld [vmem:[#allocation2 + $0x2c] sm:$0x1] }
 0x2bf   : > { %8181 = vmatmul.mubr.msk.bf16.gmra.mrb[0].mxu1 %vm2872_vm11, %v10248_v2  ;;  %v11446_v2 = vcombine.low %v10153_v46, %v10157_v42  ;;  %v7487_v46 = vcombine.low %v10384_v1, %v10393_v20  ;;  %v10408_v42 = vsel %vm9624_vm1, %v5061_v15, %v5062_v39  ;;  %v7489_v22 = vcombine.low %v10401_v10, %v10412_v40  ;;  %v10589_v24 = vld [vmem:[#allocation2 + $0x34] sm:$0xf]  ;;  %v10592_v20 = vld [vmem:[#allocation2 + $0x38] sm:$0x1] }
 0x2c0   : > { %8184 = vmatprep.mubr.msk.bf16.mxu1 %vm2872_vm11, %v10285_v27  ;;  %v10397_v27 = vsel %vm9624_vm1, %v7470_v38, %v5059_v34  ;;  %v10421_v54 = vsel %vm9624_vm1, %v7472_v47, %v5073_v0  ;;  %v11449_v34 = vld [vmem:[#allocation13_spill] sm:$0xff]  ;;  %v11450_v38 = vld [vmem:[#allocation14_spill] sm:$0xff]  ;;  %v10427_v35 = vsel %vm9624_vm1, %v5075_v37, %v5076_v59  ;;  %v5083_v39 = vrot.slane %v10224_v17, 5 }
 0x2c1   : > { %8109 = vmatmul.mubr.msk.bf16.gmra.mrb[44].mxu0 %vm2872_vm11, %v11446_v2  ;;  %v7488_v57 = vcombine.low %v10397_v27, %v10408_v42  ;;  %v5080_v6 = vrot.slane %v11449_v34, 5  ;;  %v5087_v62 = vrot.slane %v11450_v38, 5  ;;  %v5094_v11 = vrot.slane %v10246_v12, 5  ;;  %v4247_v0 = vld [vmem:[#allocation2 + $0xc8] sm:$0x1] }
 0x2c2   : > { %v7490_v15 = vcombine.low %v10421_v54, %v10427_v35  ;;  %v5090_v49 = vrot.slane %v10250_v63, 5  ;;  %v7475_v2 = vrot.slane %v4944_v26, 9  ;;  %v5097_v12 = vrot.slane %v10266_v48, 5 }
 0x2c3   : > { %v5082_v36 = vrot.slane %v5080_v6, 4  ;;  %v10438_v5 = vsel %vm9624_vm1, %v7473_v28, %v5080_v6  ;;  %v5089_v17 = vrot.slane %v5087_v62, 4  ;;  %v5096_v47 = vrot.slane %v5094_v11, 4 }
 0x2c4   : > { %v10449_v52 = vsel %vm9624_vm1, %v7474_v25, %v5087_v62  ;;  %v5101_v37 = vrot.slane %v10257_v43, 5  ;;  %v7476_v59 = vrot.slane %v4945_v19, 9  ;;  %v5104_v43 = vrot.slane %v4247_v0, 5  ;;  %v8791_v62 = vld [vmem:[#allocation2 + $0x10] sm:$0xf] }
 0x2c5   : > { %v10445_v63 = vsel %vm9624_vm1, %v5082_v36, %v5083_v39  ;;  %v10464_v45 = vsel %vm9624_vm1, %v5096_v47, %v5097_v12  ;;  %v4573_v6 = vsel %vm8896_vm4, %v10300_v50, %v10244_v55  ;;  %v4607_v38 = vsel %vm8896_vm4, %v10337_v21, %v10318_v3 }
 0x2c6   : > { %v7491_v48 = vcombine.low %v10438_v5, %v10445_v63  ;;  %v5103_v34 = vrot.slane %v5101_v37, 4  ;;  %v4996_v39 = vrot.slane %v8791_v62, 5  ;;  %v4615_v25 = vor.u32 %v10325_v44, %v10323_v58  ;;  %v8795_v62 = vld [vmem:[#allocation2 + $0x20] sm:$0x1]  ;;  %v6500_v5 = vld [vmem:[#allocation2 + $0x3c] sm:$0xe] }
 0x2c7   : > { %8185 = vmatmul.mubr.msk.bf16.gmra.mrb[4].mxu1 %vm2872_vm11, %v10296_v29  ;;  %v10453_v29 = vsel %vm9624_vm1, %v7475_v2, %v5094_v11  ;;  %v4628_v11 = vshll.u32 %v4247_v0, 16  ;;  %v10482_v36 = vsel %vm9624_vm1, %v7476_v59, %v5101_v37  ;;  %v7441_v55 = vcombine.low %v4573_v6, %v4583_v51  ;;  %v4930_v51 = vld [vmem:[#allocation2 + $0xc] sm:$0xe]  ;;  %v8792_v2 = vld [vmem:[#allocation2 + $0x14] sm:$0x1] }
 0x2c8   : > { %8188 = vmatprep.mubr.msk.bf16.mxu1 %vm2872_vm11, %v10298_v13  ;;  %v10460_v13 = vsel %vm9624_vm1, %v5089_v17, %v5090_v49  ;;  %v7493_v28 = vcombine.low %v10453_v29, %v10464_v45  ;;  %v10486_v49 = vsel %vm9624_vm1, %v5103_v34, %v5104_v43  ;;  %v4597_v50 = vsel %vm8896_vm4, %v10316_v60, %v10281_v33  ;;  %v8793_v60 = vld [vmem:[#allocation2 + $0x1c] sm:$0xf]  ;;  %v4931_v6 = vld [vmem:[#allocation2 + $0x18] sm:$0xe]  ;;  %v10607_v63 = vld [vmem:[#allocation2 + $0x44] sm:$0x1] }
 0x2c9   : > { %v7492_v26 = vcombine.low %v10449_v52, %v10460_v13  ;;  %v7494_v3 = vcombine.low %v10482_v36, %v10486_v49  ;;  %v7442_v58 = vcombine.low %v4597_v50, %v4607_v38  ;;  %v4626_v44 = vrot.slane %v4625_v7, 4  ;;  %v8794_v7 = vld [vmem:[#allocation2 + $0x28] sm:$0xf] }
 0x2ca   : > { %v4998_v21 = vrot.slane %v4996_v39, 4  ;;  %v4616_v9 = vrot.slane %v4615_v25, 4  ;;  %v4630_v32 = vrot.slane %v4628_v11, 5  ;;  %v4999_v19 = vrot.slane %v8792_v2, 5  ;;  %v4932_v11 = vld [vmem:[#allocation2 + $0x24] sm:$0xe] }
 0x2cb   : > { %v5003_v0 = vrot.slane %v8793_v60, 5  ;;  %v7461_v17 = vrot.slane %v4930_v51, 9  ;;  %v5010_v47 = vrot.slane %v8794_v7, 5  ;;  %v5006_v25 = vrot.slane %v8795_v62, 5  ;;  %v10528_v60 = vld [vmem:[%s11333_s3 + $0x38] sm:$0xff]  }
 0x2cc   : > { %v4631_v33 = vsel %vm8896_vm4, %v4626_v44, %v4630_v32  ;;  %v5000_v8 = vsel %vm9624_vm1, %v4998_v21, %v4999_v19  ;;  %v4621_v12 = vsel %vm8896_vm4, %v4616_v9, %v10305_v56  ;;  %v11451_v44 = vld [vmem:[#allocation5_spill] sm:$0xff]  ;;  %v11452_v32 = vld [vmem:[#allocation6_spill] sm:$0xff]  ;;  %v6570_v1 = vrot.slane %v10578_v61, 5 }
 0x2cd   : > { %v7443_v37 = vcombine.low %v4621_v12, %v4631_v33  ;;  %v4997_v59 = vsel %vm9624_vm1, %v7461_v17, %v4996_v39  ;;  %v5005_v43 = vrot.slane %v5003_v0, 4  ;;  %v5012_v38 = vrot.slane %v5010_v47, 4  ;;  %v1789_v17 = vld [vmem:[#allocation2 + $0xcc] sm:$0x1]  ;;  %v10637_v12 = vld [vmem:[#allocation2 + $0x5c] sm:$0x1] }
 0x2ce   : > { %v7479_v34 = vcombine.low %v4997_v59, %v5000_v8  ;;  %v5017_v21 = vrot.slane %v11451_v44, 5  ;;  %v7463_v39 = vrot.slane %v4932_v11, 9  ;;  %v5024_v51 = vrot.slane %v11452_v32, 5  ;;  %v4933_v59 = vld [vmem:[#allocation2 + $0x30] sm:$0xe] }
 0x2cf   : > { %8189 = vmatmul.mubr.msk.bf16.gmra.mrb[8].mxu1 %vm2872_vm11, %v7441_v55  ;;  %v8796_v55 = vld [vmem:[#allocation2 + $0x2c] sm:$0x1]  ;;  %v5007_v56 = vsel %vm9624_vm1, %v5005_v43, %v5006_v25  ;;  %v7464_v25 = vrot.slane %v4933_v59, 9  ;;  %v6566_v10 = vrot.slane %v10584_v41, 5  ;;  %v6572_v54 = vrot.slane %v6570_v1, 4 }
 0x2d0   : > { %8192 = vmatprep.mubr.msk.bf16.mxu1 %vm2872_vm11, %v7442_v58  ;;  %v5013_v50 = vrot.slane %v8796_v55, 5  ;;  %v7462_v58 = vrot.slane %v4931_v6, 9  ;;  %v5011_v33 = vsel %vm9624_vm1, %v7463_v39, %v5010_v47  ;;  %v5019_v7 = vrot.slane %v5017_v21, 4  ;;  %v11455_v47 = vld [vmem:[#allocation7_spill] sm:$0xff]  ;;  %v6509_v52 = vld [vmem:[#allocation2 + $0xa8] sm:$0xe] }
 0x2d1   : > { %v5020_v43 = vrot.slane %v11455_v47, 5  ;;  %v4934_v6 = vld [vmem:[#allocation2 + $0x3c] sm:$0xe]  ;;  %v6573_v35 = vrot.slane %v10587_v30, 5  ;;  %v7585_v13 = vrot.slane %v6500_v5, 9  ;;  %v6587_v45 = vrot.slane %v10607_v63, 5 }
 0x2d2   : > { %v5014_v9 = vsel %vm9624_vm1, %v5012_v38, %v5013_v50  ;;  %v5004_v2 = vsel %vm9624_vm1, %v7462_v58, %v5003_v0  ;;  %v11454_v0 = vld [vmem:[#allocation11_spill] sm:$0xff]  ;;  %v11456_v38 = vld [vmem:[#allocation8_spill] sm:$0xff]  ;;  %v7465_v55 = vrot.slane %v4934_v6, 9  ;;  %v5018_v58 = vsel %vm9624_vm1, %v7464_v25, %v5017_v21  ;;  %v10654_v6 = vld [vmem:[#allocation2 + $0x68] sm:$0x1] }
 0x2d3   : > { %v7480_v19 = vcombine.low %v5004_v2, %v5007_v56  ;;  %v7481_v8 = vcombine.low %v5011_v33, %v5014_v9  ;;  %v5027_v62 = vrot.slane %v11456_v38, 5  ;;  %v5021_v11 = vsel %vm9624_vm1, %v5019_v7, %v5020_v43  ;;  %v10611_v21 = vld [vmem:[#allocation2 + $0x58] sm:$0xf]  ;;  %v6502_v7 = vld [vmem:[#allocation2 + $0x54] sm:$0xe] }
 0x2d4   : > { %v7482_v56 = vcombine.low %v5018_v58, %v5021_v11  ;;  %v5025_v44 = vsel %vm9624_vm1, %v7465_v55, %v5024_v51  ;;  %v6580_v33 = vrot.slane %v10592_v20, 5  ;;  %v6598_v43 = vrot.slane %v10611_v21, 5  ;;  %v10697_v5 = vld [vmem:[#allocation2 + $0x74] sm:$0x1]  ;;  %v10779_v9 = vld [vmem:[#allocation2 + $0xb8] sm:$0xf] }
 0x2d5   : > { %v7587_v11 = vrot.slane %v6502_v7, 9  ;;  %v6601_v58 = vrot.slane %v10637_v12, 5  ;;  %v10744_v7 = vld [vmem:[#allocation2 + $0xa0] sm:$0xf] }
 0x2d7   : > { %8193 = vmatmul.mubr.msk.bf16.gmra.mrb[12].mxu1 %vm2872_vm11, %v7443_v37  ;;  %v1790_v37 = vsel %vm9283_vm7, 0, %v1789_v17  ;;  %v6501_v17 = vld [vmem:[#allocation2 + $0x48] sm:$0xe] }
 0x2d8   : > { %8198 = vmatprep.mubr.msk.bf16.mxu1 %vm2872_vm11, %v7479_v34  ;;  %v5026_v34 = vrot.slane %v5024_v51, 4  ;;  %1791 = vst [vmem:[#allocation2 + $0xcc] sm:$0x1] %v1790_v37  ;;  %v10625_v51 = vsel %vm9624_vm1, %v6572_v54, %v6573_v35  ;;  %v10639_v37 = vld [vmem:[#allocation2 + $0x64] sm:$0xf]  ;;  %v7586_v47 = vrot.slane %v6501_v17, 9 }
 0x2d9   : > { %11459 = vst [vmem:[#allocation12_spill] sm:$0xff] %v10625_v51  ;;  %v10701_v17 = vld [vmem:[#allocation2 + $0x7c] sm:$0xf]  ;;  %v10761_v54 = vld [vmem:[#allocation2 + $0xa4] sm:$0x1] }
 0x2da   : > { %v5028_v50 = vsel %vm9624_vm1, %v5026_v34, %v5027_v62  ;;  %v6640_v34 = vrot.slane %v10744_v7, 5 }
 0x2db   : > { %v7483_v39 = vcombine.low %v5025_v44, %v5028_v50  ;;  %v6600_v50 = vrot.slane %v6598_v43, 4  ;;  %v6605_v44 = vrot.slane %v10639_v37, 5 }
 0x2df   : > { %8199 = vmatmul.mubr.msk.bf16.vlgmr.msra.gmra.mrb[16].mxu1 %vm2872_vm11, %v7480_v19 }
 0x2e0   : > { %8231 = vmatpush3.bf16.msra.mxu1 %v11454_v0  ;;  %8202 = vmatprep.mubr.msk.bf16.mxu1 %vm2872_vm11, %v7481_v8  ;;  %v10632_v8 = vld [vmem:[#allocation2 + $0x50] sm:$0x1] }
 0x2e1   : > { %8264 = vmatprep.subr.bf16.mxu1 %v10528_v60  ;;  %v6594_v25 = vrot.slane %v10632_v8, 5 }
 0x2e7   : > { %8203 = vmatmul.mubr.msk.bf16.gmra.mrb[20].mxu1 %vm2872_vm11, %v7482_v56  ;;  %v6503_v56 = vld [vmem:[#allocation2 + $0x60] sm:$0xe] }
 0x2e8   : > { %8206 = vmatprep.mubr.msk.bf16.mxu1 %vm2872_vm11, %v7483_v39  ;;  %v7588_v35 = vrot.slane %v6503_v56, 9  ;;  %v10729_v56 = vld [vmem:[#allocation2 + $0x98] sm:$0x1] }
 0x2e9   : > { %v6636_v39 = vrot.slane %v10729_v56, 5 }
 0x2ea   : > { %v10705_v36 = vsel %vm9624_vm1, %v7588_v35, %v6605_v44 }
 0x2eb   : > { %11469 = vst [vmem:[#allocation8_spill] sm:$0xff] %v10705_v36  ;;  %v10808_v36 = vld [vmem:[#allocation2 + $0xc8] sm:$0x1] }
 0x2ef   : > { %8207 = vmatmul.mubr.msk.bf16.gmra.mrb[24].mxu1 %vm2872_vm11, %v7484_v16  ;;  %v6563_v16 = vrot.slane %v10572_v4, 5 }
 0x2f0   : > { %8210 = vmatprep.mubr.msk.bf16.mxu1 %vm2872_vm11, %v7485_v14  ;;  %v6498_v14 = vld [vmem:[#allocation2 + $0x24] sm:$0xe] }
 0x2f1   : > { %v6565_v27 = vrot.slane %v6563_v16, 4  ;;  %v7583_v40 = vrot.slane %v6498_v14, 9  ;;  %v8748_v14 = vld [vmem:[#allocation2 + $0x18] sm:$0xff]  }
 0x2f3   : > { %v10617_v32 = vsel %vm9624_vm1, %v7583_v40, %v6570_v1  ;;  %v6607_v40 = vrot.slane %v6605_v44, 4 }
 0x2f4   : > { %11458 = vst [vmem:[#allocation10_spill] sm:$0xff] %v10617_v32 }
 0x2f7   : > { %8211 = vmatmul.mubr.msk.bf16.gmra.mrb[28].mxu1 %vm2872_vm11, %v7486_v18  ;;  %v7582_v18 = vrot.slane %v6497_v23, 9 }
 0x2f8   : > { %8214 = vmatprep.mubr.msk.bf16.mxu1 %vm2872_vm11, %v7487_v46  ;;  %v10595_v46 = vld [vmem:[#allocation2 + $0x40] sm:$0xf] }
 0x2f9   : > { %v10599_v42 = vsel %vm9624_vm1, %v7582_v18, %v6563_v16  ;;  %v10677_v18 = vld [vmem:[#allocation2 + $0x70] sm:$0xf] }
 0x2ff   : > { %8215 = vmatmul.mubr.msk.bf16.gmra.mrb[0].mxu1 %vm2872_vm11, %v7488_v57  ;;  %v6499_v57 = vld [vmem:[#allocation2 + $0x30] sm:$0xe] }
 0x300   : > { %8218 = vmatprep.mubr.msk.bf16.mxu1 %vm2872_vm11, %v7489_v22  ;;  %v10603_v22 = vsel %vm9624_vm1, %v6565_v27, %v6566_v10  ;;  %v7584_v2 = vrot.slane %v6499_v57, 9  ;;  %v10683_v27 = vsel %vm9624_vm1, %v7587_v11, %v6598_v43  ;;  %v10687_v10 = vsel %vm9624_vm1, %v6600_v50, %v6601_v58  ;;  %v1845_v57 = vld [vmem:[#allocation2 + $0xd4] sm:$0x1]  ;;  %v8750_v43 = vld [vmem:[#allocation2 + $0x24] sm:$0xff]  }
 0x301   : > { %11457 = vst [vmem:[#allocation9_spill] sm:$0xff] %v10603_v22  ;;  %11466 = vst [vmem:[#allocation11_spill] sm:$0xff] %v10683_v27  ;;  %v6506_v11 = vld [vmem:[#allocation2 + $0x84] sm:$0xe]  ;;  %v10727_v58 = vld [vmem:[#allocation2 + $0x94] sm:$0xf] }
 0x302   : > { %11467 = vst [vmem:[#allocation7_spill] sm:$0xff] %v10687_v10  ;;  %v10725_v50 = vld [vmem:[%s11333_s3 + $0x40] sm:$0xff]   ;;  %v8761_v10 = vld [vmem:[#allocation2 + $0xa8] sm:$0xff]  }
 0x307   : > { %8219 = vmatmul.mubr.msk.bf16.gmra.mrb[4].mxu1 %vm2872_vm11, %v7490_v15  ;;  %v6577_v15 = vrot.slane %v10589_v24, 5 }
 0x308   : > { %8222 = vmatprep.mubr.msk.bf16.mxu1 %vm2872_vm11, %v7491_v48  ;;  %v10609_v48 = vld [vmem:[#allocation2 + $0x4c] sm:$0xf] }
 0x309   : > { %v6579_v19 = vrot.slane %v6577_v15, 4  ;;  %v10643_v59 = vsel %vm9624_vm1, %v7584_v2, %v6577_v15  ;;  %v6608_v15 = vrot.slane %v10654_v6, 5 }
 0x30a   : > { %11460 = vst [vmem:[#allocation15_spill] sm:$0xff] %v10643_v59 }
 0x30b   : > { %v10647_v29 = vsel %vm9624_vm1, %v6579_v19, %v6580_v33  ;;  %v1846_v19 = vsel %vm9293_vm9, 0, %v1845_v57  ;;  %v6504_v33 = vld [vmem:[#allocation2 + $0x6c] sm:$0xe]  ;;  %v10709_v49 = vsel %vm9624_vm1, %v6607_v40, %v6608_v15  ;;  %v8751_v57 = vld [vmem:[#allocation2 + $0x30] sm:$0xff]  }
 0x30c   : > { %11461 = vst [vmem:[#allocation13_spill] sm:$0xff] %v10647_v29  ;;  %1847 = vst [vmem:[#allocation2 + $0xd4] sm:$0x1] %v1846_v19  ;;  %v5949_v29 = vshrl.u32 %v10611_v21, 16 }
 0x30d   : > { %11470 = vst [vmem:[#allocation4_spill] sm:$0xff] %v10709_v49  ;;  %v6511_v49 = vld [vmem:[#allocation2 + $0xc0] sm:$0xe] }
 0x30e   : > { %v5951_v53 = vrot.slane %v5949_v29, 4 }
 0x30f   : > { %8223 = vmatmul.mubr.msk.bf16.gmra.mrb[8].mxu1 %vm2872_vm11, %v7492_v26  ;;  %v6584_v26 = vrot.slane %v10595_v46, 5 }
 0x310   : > { %8226 = vmatprep.mubr.msk.bf16.mxu1 %vm2872_vm11, %v7493_v28  ;;  %v6591_v28 = vrot.slane %v10609_v48, 5 }
 0x311   : > { %v6586_v0 = vrot.slane %v6584_v26, 4  ;;  %v10658_v38 = vsel %vm9624_vm1, %v7585_v13, %v6584_v26  ;;  %v10712_v13 = vld [vmem:[#allocation2 + $0x80] sm:$0x1]  ;;  %v10714_v26 = vld [vmem:[#allocation2 + $0x88] sm:$0xf] }
 0x312   : > { %11462 = vst [vmem:[#allocation14_spill] sm:$0xff] %v10658_v38  ;;  %v6593_v62 = vrot.slane %v6591_v28, 4  ;;  %v10671_v23 = vsel %vm9624_vm1, %v7586_v47, %v6591_v28  ;;  %v6505_v47 = vld [vmem:[#allocation2 + $0x78] sm:$0xe]  ;;  %v6626_v40 = vrot.slane %v10714_v26, 5  ;;  %v6622_v19 = vrot.slane %v10712_v13, 5 }
 0x313   : > { %v10663_v55 = vsel %vm9624_vm1, %v6586_v0, %v6587_v45  ;;  %11464 = vst [vmem:[#allocation6_spill] sm:$0xff] %v10671_v23  ;;  %v7589_v45 = vrot.slane %v6504_v33, 9  ;;  %v6615_v0 = vrot.slane %v10697_v5, 5  ;;  %v7590_v15 = vrot.slane %v6505_v47, 9  ;;  %v6507_v33 = vld [vmem:[#allocation2 + $0x90] sm:$0xe] }
 0x314   : > { %11463 = vst [vmem:[#allocation5_spill] sm:$0xff] %v10663_v55  ;;  %v10675_v16 = vsel %vm9624_vm1, %v6593_v62, %v6594_v25  ;;  %v10719_v62 = vld [vmem:[#allocation2 + $0x8c] sm:$0x1]  ;;  %v6619_v25 = vrot.slane %v10701_v17, 5  ;;  %v5945_v38 = vshll.u32 %v10611_v21, 16 }
 0x315   : > { %11465 = vst [vmem:[#allocation3_spill] sm:$0xff] %v10675_v16 }
 0x316   : > { %v6621_v2 = vrot.slane %v6619_v25, 4  ;;  %v10753_v47 = vsel %vm9624_vm1, %v7590_v15, %v6619_v25 }
 0x317   : > { %8227 = vmatmul.mubr.msk.bf16.gmra.mrb[12].mxu1 %vm2872_vm11, %v7494_v3  ;;  %v6612_v3 = vrot.slane %v10677_v18, 5  ;;  %11473 = vst [vmem:[#allocation18_spill] sm:$0xff] %v10753_v47  ;;  %v7594_v47 = vrot.slane %v6509_v52, 9  ;;  %v7596_v52 = vrot.slane %v6511_v49, 9 }
 0x318   : > { %8232 = vmatprep.mubr.msk.bf16.mxu1 %vm2872_vm11, %v8748_v14  ;;  %v10757_v35 = vsel %vm9624_vm1, %v6621_v2, %v6622_v19  ;;  %v7592_v2 = vrot.slane %v6507_v33, 9  ;;  %v6643_v19 = vrot.slane %v10761_v54, 5 }
 0x319   : > { %v6614_v28 = vrot.slane %v6612_v3, 4  ;;  %v10733_v44 = vsel %vm9624_vm1, %v7589_v45, %v6612_v3  ;;  %v7591_v3 = vrot.slane %v6506_v11, 9  ;;  %v6628_v45 = vrot.slane %v6626_v40, 4  ;;  %11474 = vst [vmem:[#allocation19_spill] sm:$0xff] %v10757_v35  ;;  %v6508_v11 = vld [vmem:[#allocation2 + $0x9c] sm:$0xe] }
 0x31a   : > { %11471 = vst [vmem:[#allocation16_spill] sm:$0xff] %v10733_v44  ;;  %v10793_v35 = vld [vmem:[#allocation2 + $0xbc] sm:$0x1] }
 0x31b   : > { %v10737_v14 = vsel %vm9624_vm1, %v6614_v28, %v6615_v0  ;;  %v6629_v28 = vrot.slane %v10719_v62, 5  ;;  %v10749_v0 = vld [vmem:[#allocation2 + $0xac] sm:$0xf]  ;;  %v10769_v25 = vsel %vm9624_vm1, %v7591_v3, %v6626_v40  ;;  %v10782_v3 = vld [vmem:[#allocation2 + $0xc4] sm:$0xf] }
 0x31c   : > { %11472 = vst [vmem:[#allocation17_spill] sm:$0xff] %v10737_v14  ;;  %11475 = vst [vmem:[#allocation20_spill] sm:$0xff] %v10769_v25  ;;  %v6647_v40 = vrot.slane %v10749_v0, 5  ;;  %v8752_v25 = vld [vmem:[#allocation2 + $0x3c] sm:$0xff]  }
 0x31d   : > { %v10773_v15 = vsel %vm9624_vm1, %v6628_v45, %v6629_v28  ;;  %v6642_v28 = vrot.slane %v6640_v34, 4 }
 0x31e   : > { %11476 = vst [vmem:[#allocation21_spill] sm:$0xff] %v10773_v15  ;;  %v6510_v15 = vld [vmem:[#allocation2 + $0xb4] sm:$0xe]  ;;  %v6649_v14 = vrot.slane %v6647_v40, 4 }
 0x31f   : > { %8233 = vmatmul.mubr.msk.bf16.vlgmr.msra.gmra.mrb[16].mxu1 %vm2872_vm11, %v8750_v43  ;;  %v6633_v43 = vrot.slane %v10727_v58, 5 }
 0x320   : > { %8265 = vmatpush3.bf16.msra.mxu1 %v10528_v60  ;;  %8236 = vmatprep.mubr.msk.bf16.mxu1 %vm2872_vm11, %v8751_v57  ;;  %v10763_v60 = vld [vmem:[#allocation2 + $0xb0] sm:$0x1]  ;;  %v7593_v57 = vrot.slane %v6508_v11, 9  ;;  %v10814_v11 = vsel %vm9624_vm1, %v7594_v47, %v6647_v40 }
 0x321   : > { %8298 = vmatprep.subr.bf16.mxu1 %v10725_v50  ;;  %v6635_v1 = vrot.slane %v6633_v43, 4  ;;  %v10786_v45 = vsel %vm9624_vm1, %v7592_v2, %v6633_v43  ;;  %v6650_v44 = vrot.slane %v10763_v60, 5  ;;  %v8753_v43 = vld [vmem:[#allocation2 + $0x48] sm:$0xff]   ;;  %11481 = vst [vmem:[#allocation26_spill] sm:$0xff] %v10814_v11 }
 0x322   : > { %11477 = vst [vmem:[#allocation22_spill] sm:$0xff] %v10786_v45  ;;  %v10800_v2 = vsel %vm9624_vm1, %v7593_v57, %v6640_v34  ;;  %v7595_v57 = vrot.slane %v6510_v15, 9  ;;  %v6664_v15 = vrot.slane %v10808_v36, 5 }
 0x323   : > { %v10790_v33 = vsel %vm9624_vm1, %v6635_v1, %v6636_v39  ;;  %11479 = vst [vmem:[#allocation24_spill] sm:$0xff] %v10800_v2  ;;  %v10804_v39 = vsel %vm9624_vm1, %v6642_v28, %v6643_v19  ;;  %v6654_v1 = vrot.slane %v10779_v9, 5  ;;  %v10818_v34 = vsel %vm9624_vm1, %v6649_v14, %v6650_v44  ;;  %v8757_v19 = vld [vmem:[#allocation2 + $0x78] sm:$0xff]  }
 0x324   : > { %11478 = vst [vmem:[#allocation23_spill] sm:$0xff] %v10790_v33  ;;  %11480 = vst [vmem:[#allocation25_spill] sm:$0xff] %v10804_v39  ;;  %v6657_v28 = vrot.slane %v10793_v35, 5  ;;  %v6661_v33 = vrot.slane %v10782_v3, 5  ;;  %v8760_v2 = vld [vmem:[#allocation2 + $0x9c] sm:$0xff]  }
 0x325   : > { %11482 = vst [vmem:[#allocation27_spill] sm:$0xff] %v10818_v34  ;;  %v10827_v47 = vsel %vm9624_vm1, %v7595_v57, %v6654_v1  ;;  %v5825_v57 = vshll.u32 %v10572_v4, 16 }
 0x326   : > { %11483 = vst [vmem:[#allocation28_spill] sm:$0xff] %v10827_v47  ;;  %v6663_v14 = vrot.slane %v6661_v33, 4  ;;  %v5853_v47 = vshrl.u32 %v10578_v61, 16 }
 0x327   : > { %8237 = vmatmul.mubr.msk.bf16.gmra.mrb[20].mxu1 %vm2872_vm11, %v8752_v25  ;;  %v6656_v25 = vrot.slane %v6654_v1, 4  ;;  %v8754_v1 = vld [vmem:[#allocation2 + $0x54] sm:$0xff]   ;;  %v10856_v34 = vrot.slane %v5825_v57, 5 }
 0x328   : > { %8240 = vmatprep.mubr.msk.bf16.mxu1 %vm2872_vm11, %v8753_v43  ;;  %v10838_v43 = vsel %vm9624_vm1, %v7596_v52, %v6661_v33  ;;  %v10842_v49 = vsel %vm9624_vm1, %v6663_v14, %v6664_v15  ;;  %v5767_v33 = vld [vmem:[#allocation2 + $0x18] sm:$0xf]  ;;  %v8758_v52 = vld [vmem:[#allocation2 + $0x84] sm:$0xff]  }
 0x329   : > { %v10831_v44 = vsel %vm9624_vm1, %v6656_v25, %v6657_v28  ;;  %11485 = vst [vmem:[#allocation30_spill] sm:$0xff] %v10838_v43  ;;  %11486 = vst [vmem:[#allocation31_spill] sm:$0xff] %v10842_v49  ;;  %v8755_v25 = vld [vmem:[#allocation2 + $0x60] sm:$0xff]   ;;  %v8756_v28 = vld [vmem:[#allocation2 + $0x6c] sm:$0xff]   ;;  %v5816_v40 = vshrl.u32 %v5767_v33, 16  ;;  %v5819_v14 = vshll.u32 %v5767_v33, 16 }
 0x32a   : > { %11484 = vst [vmem:[#allocation29_spill] sm:$0xff] %v10831_v44  ;;  %v5770_v15 = vld [vmem:[#allocation2 + $0x24] sm:$0xf]  ;;  %v8759_v44 = vld [vmem:[#allocation2 + $0x90] sm:$0xff]  }
 0x32b   : > { %v5843_v49 = vshll.u32 %v5770_v15, 16  ;;  %v5818_v43 = vrot.slane %v5816_v40, 4  ;;  %v5855_v40 = vrot.slane %v5853_v47, 4 }
 0x32d   : > { %v5845_v39 = vrot.slane %v5843_v49, 5  ;;  %v5835_v49 = vshll.u32 %v10584_v41, 16 }
 0x32f   : > { %8241 = vmatmul.mubr.msk.bf16.gmra.mrb[24].mxu1 %vm2872_vm11, %v8754_v1  ;;  %v5829_v1 = vshrl.u32 %v10572_v4, 16  ;;  %v5873_v4 = vshll.u32 %v10589_v24, 16  ;;  %v5837_v23 = vrot.slane %v5835_v49, 5 }
 0x330   : > { %8244 = vmatprep.mubr.msk.bf16.mxu1 %vm2872_vm11, %v8755_v25  ;;  %v5840_v25 = vshrl.u32 %v5770_v15, 16 }
 0x331   : > { %v5831_v33 = vrot.slane %v5829_v1, 4 }
 0x332   : > { %v5842_v11 = vrot.slane %v5840_v25, 4 }
 0x334   : > { %v5846_v1 = vor.u32 %v5845_v39, %v5842_v11  ;;  %v8762_v11 = vld [vmem:[#allocation2 + $0xb4] sm:$0xff]  }
 0x337   : > { %8245 = vmatmul.mubr.msk.bf16.gmra.mrb[28].mxu1 %vm2872_vm11, %v8756_v28  ;;  %v5821_v28 = vrot.slane %v5819_v14, 5 }
 0x338   : > { %8248 = vmatprep.mubr.msk.bf16.mxu1 %vm2872_vm11, %v8757_v19  ;;  %v5849_v19 = vshll.u32 %v10578_v61, 16  ;;  %v5832_v61 = vor.u32 %v5831_v33, %v10856_v34  ;;  %v5779_v33 = vld [vmem:[#allocation2 + $0x48] sm:$0xf] }
 0x339   : > { %v5822_v45 = vor.u32 %v5821_v28, %v5818_v43  ;;  %v5859_v43 = vshll.u32 %v10587_v30, 16  ;;  %v10867_v28 = vrot.slane %v5873_v4, 5  ;;  %v5897_v4 = vshll.u32 %v10595_v46, 16 }
 0x33a   : > { %v10860_v15 = vrot.slane %v5849_v19, 5  ;;  %v5776_v19 = vld [vmem:[#allocation2 + $0x3c] sm:$0xf]  ;;  %v5833_v27 = vrot.slane %v5832_v61, 4  ;;  %v5883_v61 = vshll.u32 %v10592_v20, 16  ;;  %v5925_v20 = vshrl.u32 %v10609_v48, 16 }
 0x33b   : > { %v5823_v25 = vrot.slane %v5822_v45, 4  ;;  %v5888_v41 = vshrl.u32 %v5776_v19, 16  ;;  %v5891_v39 = vshll.u32 %v5776_v19, 16 }
 0x33c   : > { %v5856_v47 = vor.u32 %v5855_v40, %v10860_v15  ;;  %v5838_v49 = vsel %vm8896_vm4, %v5833_v27, %v5837_v23  ;;  %v5782_v27 = vld [vmem:[#allocation2 + $0x54] sm:$0xf]  ;;  %v5885_v21 = vrot.slane %v5883_v61, 5 }
 0x33d   : > { %v5828_v30 = vsel %vm8896_vm4, %v5823_v25, %v10856_v34  ;;  %v5921_v34 = vshll.u32 %v10609_v48, 16  ;;  %v10885_v25 = vld [vmem:[#allocation2 + $0xd0] sm:$0xf]  ;;  %v5890_v19 = vrot.slane %v5888_v41, 4  ;;  %v5893_v23 = vrot.slane %v5891_v39, 5 }
 0x33e   : > { %v5857_v40 = vrot.slane %v5856_v47, 4  ;;  %v6668_v47 = vrot.slane %v10885_v25, 5  ;;  %v8764_v41 = vld [vmem:[#allocation2 + $0xcc] sm:$0xff]   ;;  %v5936_v39 = vshrl.u32 %v5782_v27, 16 }
 0x33f   : > { %8249 = vmatmul.mubr.msk.bf16.gmra.mrb[0].mxu1 %vm2872_vm11, %v8758_v52  ;;  %v5773_v52 = vld [vmem:[#allocation2 + $0x30] sm:$0xf]  ;;  %v10897_v51 = vrot.slane %v5921_v34, 5  ;;  %v5894_v61 = vor.u32 %v5893_v23, %v5890_v19  ;;  %v5973_v23 = vshrl.u32 %v10639_v37, 16 }
 0x340   : > { %8252 = vmatprep.mubr.msk.bf16.mxu1 %vm2872_vm11, %v8759_v44  ;;  %v5877_v44 = vshrl.u32 %v10589_v24, 16  ;;  %v5864_v57 = vshrl.u32 %v5773_v52, 16  ;;  %v5867_v14 = vshll.u32 %v5773_v52, 16  ;;  %v10870_v52 = vrot.slane %v5846_v1, 4 }
 0x342   : > { %v5879_v24 = vrot.slane %v5877_v44, 4  ;;  %v5869_v16 = vrot.slane %v5867_v14, 5  ;;  %v8763_v44 = vld [vmem:[#allocation2 + $0xc0] sm:$0xff]   ;;  %v5912_v14 = vshrl.u32 %v5779_v33, 16 }
 0x344   : > { %v5880_v45 = vor.u32 %v5879_v24, %v10867_v28  ;;  %v10887_v24 = vld [vmem:[#allocation2 + $0xd4] sm:$0x1]  ;;  %v5914_v59 = vrot.slane %v5912_v14, 4 }
 0x346   : > { %v5881_v55 = vrot.slane %v5880_v45, 4  ;;  %v5927_v45 = vrot.slane %v5925_v20, 4  ;;  %v10916_v20 = vrot.slane %v5945_v38, 5 }
 0x347   : > { %8253 = vmatmul.mubr.msk.bf16.gmra.mrb[4].mxu1 %vm2872_vm11, %v8760_v2  ;;  %v5866_v2 = vrot.slane %v5864_v57, 4  ;;  %v5901_v57 = vshrl.u32 %v10595_v46, 16  ;;  %v6512_v46 = vld [vmem:[#allocation2 + $0xcc] sm:$0xe] }
 0x348   : > { %8256 = vmatprep.mubr.msk.bf16.mxu1 %vm2872_vm11, %v8761_v10  ;;  %v10872_v10 = vrot.slane %v5859_v43, 5  ;;  %v5915_v43 = vshll.u32 %v5779_v33, 16  ;;  %v5952_v19 = vor.u32 %v5951_v53, %v10916_v20 }
 0x349   : > { %v5870_v1 = vor.u32 %v5869_v16, %v5866_v2  ;;  %v10893_v16 = vrot.slane %v5897_v4, 5  ;;  %v7597_v2 = vrot.slane %v6512_v46, 9  ;;  %v5903_v33 = vrot.slane %v5901_v57, 4 }
 0x34a   : > { %v5917_v48 = vrot.slane %v5915_v43, 5  ;;  %v5939_v4 = vshll.u32 %v5782_v27, 16  ;;  %v7549_v46 = vcombine.low %v5828_v30, %v5838_v49  ;;  %v5852_v43 = vsel %vm8896_vm4, %v10870_v52, %v10860_v15 }
 0x34b   : > { %v10901_v32 = vsel %vm9624_vm1, %v7597_v2, %v6668_v47  ;;  %v5871_v22 = vrot.slane %v5870_v1, 4  ;;  %v5862_v34 = vsel %vm8896_vm4, %v5857_v40, %v10872_v10  ;;  %v5886_v30 = vsel %vm8896_vm4, %v5881_v55, %v5885_v21 }
 0x34c   : > { %v5904_v49 = vor.u32 %v5903_v33, %v10893_v16  ;;  %v5907_v1 = vshll.u32 %v10607_v63, 16  ;;  %v5918_v15 = vor.u32 %v5917_v48, %v5914_v59  ;;  %v5928_v52 = vor.u32 %v5927_v45, %v10897_v51  ;;  %v5788_v59 = vld [vmem:[#allocation2 + $0x6c] sm:$0xf] }
 0x34d   : > { %v5938_v10 = vrot.slane %v5936_v39, 4  ;;  %v5941_v38 = vrot.slane %v5939_v4, 5  ;;  %v7550_v40 = vcombine.low %v5852_v43, %v5862_v34  ;;  %v5876_v29 = vsel %vm8896_vm4, %v5871_v22, %v10867_v28 }
 0x34e   : > { %v5931_v55 = vshll.u32 %v10632_v8, 16  ;;  %v5969_v63 = vshll.u32 %v10639_v37, 16  ;;  %v7551_v2 = vcombine.low %v5876_v29, %v5886_v30  ;;  %v5895_v33 = vrot.slane %v5894_v61, 4 }
 0x34f   : > { %8257 = vmatmul.mubr.msk.bf16.gmra.mrb[8].mxu1 %vm2872_vm11, %v8762_v11  ;;  %v6671_v11 = vrot.slane %v10887_v24, 5  ;;  %v5919_v45 = vrot.slane %v5918_v15, 4  ;;  %v5929_v39 = vrot.slane %v5928_v52, 4  ;;  %v5942_v22 = vor.u32 %v5941_v38, %v5938_v10  ;;  %v5791_v52 = vld [vmem:[#allocation2 + $0x78] sm:$0xf] }
 0x350   : > { %8260 = vmatprep.mubr.msk.bf16.mxu1 %vm2872_vm11, %v8763_v44  ;;  %v6670_v44 = vrot.slane %v6668_v47, 4  ;;  %v5785_v47 = vld [vmem:[#allocation2 + $0x60] sm:$0xf]  ;;  %v5955_v28 = vshll.u32 %v10637_v12, 16  ;;  %v5984_v21 = vshrl.u32 %v5788_v59, 16  ;;  %v5987_v43 = vshll.u32 %v5788_v59, 16 }
 0x351   : > { %v5963_v27 = vshll.u32 %v5785_v47, 16  ;;  %v5933_v37 = vrot.slane %v5931_v55, 5  ;;  %v5953_v53 = vrot.slane %v5952_v19, 4  ;;  %v5975_v30 = vrot.slane %v5973_v23, 4 }
 0x352   : > { %v10905_v57 = vsel %vm9624_vm1, %v6670_v44, %v6671_v11  ;;  %v5960_v11 = vshrl.u32 %v5785_v47, 16  ;;  %v5905_v44 = vrot.slane %v5904_v49, 4  ;;  %v10939_v47 = vrot.slane %v5969_v63, 5 }
 0x353   : > { %v7615_v14 = vcombine.low %v10901_v32, %v10905_v57  ;;  %v5900_v12 = vsel %vm8896_vm4, %v5895_v33, %v10893_v16  ;;  %v5997_v15 = vshrl.u32 %v10677_v18, 16  ;;  %v5924_v10 = vsel %vm8896_vm4, %v5919_v45, %v10897_v51 }
 0x354   : > { %v5962_v8 = vrot.slane %v5960_v11, 4  ;;  %v5934_v38 = vsel %vm8896_vm4, %v5929_v39, %v5933_v37  ;;  %v5943_v16 = vrot.slane %v5942_v22, 4  ;;  %v5979_v11 = vshll.u32 %v10654_v6, 16 }
 0x355   : > { %v5989_v55 = vrot.slane %v5987_v43, 5  ;;  %v6008_v19 = vshrl.u32 %v5791_v52, 16  ;;  %v6011_v63 = vshll.u32 %v5791_v52, 16  ;;  %v5999_v51 = vrot.slane %v5997_v15, 4 }
 0x356   : > { %v6017_v59 = vshll.u32 %v10701_v17, 16  ;;  %v7553_v6 = vcombine.low %v5924_v10, %v5934_v38  ;;  %v5948_v45 = vsel %vm8896_vm4, %v5943_v16, %v10916_v20  ;;  %v5981_v22 = vrot.slane %v5979_v11, 5 }
 0x357   : > { %8261 = vmatmul.mubr.msk.bf16.gmra.mrb[12].mxu1 %vm2872_vm11, %v8764_v41  ;;  %v5909_v41 = vrot.slane %v5907_v1, 5  ;;  %v5993_v1 = vshll.u32 %v10677_v18, 16  ;;  %v6013_v37 = vrot.slane %v6011_v63, 5  ;;  %v6041_v52 = vshll.u32 %v10714_v26, 16 }
 0x358   : > { %8266 = vmatprep.mubr.msk.bf16.mxu1 %vm2872_vm11, %v7549_v46  ;;  %v5965_v46 = vrot.slane %v5963_v27, 5  ;;  %v5986_v27 = vrot.slane %v5984_v21, 4  ;;  %v10980_v20 = vrot.slane %v6017_v59, 5  ;;  %v6045_v10 = vshrl.u32 %v10714_v26, 16 }
 0x359   : > { %v5910_v49 = vsel %vm8896_vm4, %v5905_v44, %v5909_v41  ;;  %v10962_v23 = vrot.slane %v5993_v1, 5  ;;  %v6027_v26 = vshll.u32 %v10712_v13, 16 }
 0x35a   : > { %v5966_v29 = vor.u32 %v5965_v46, %v5962_v8  ;;  %v7552_v44 = vcombine.low %v5900_v12, %v5910_v49  ;;  %v5794_v8 = vld [vmem:[#allocation2 + $0x84] sm:$0xf]  ;;  %v5990_v43 = vor.u32 %v5989_v55, %v5986_v27 }
 0x35b   : > { %v6000_v49 = vor.u32 %v5999_v51, %v10962_v23  ;;  %v6035_v15 = vshll.u32 %v5794_v8, 16  ;;  %v5800_v51 = vld [vmem:[#allocation2 + $0x9c] sm:$0xf] }
 0x35c   : > { %v10932_v48 = vpop.f32.mrb[48].mxu0  ;;  %v5967_v39 = vrot.slane %v5966_v29, 4  ;;  %v6069_v29 = vshrl.u32 %v10727_v58, 16  ;;  %v5991_v27 = vrot.slane %v5990_v43, 4 }
 0x35d   : > { %v10935_v4 = vpop.f32.mrb[49].mxu0 }
 0x35e   : > { %v10937_v34 = vpop.f32.mrb[50].mxu0  ;;  %v5972_v11 = vsel %vm8896_vm4, %v5967_v39, %v10939_v47 }
 0x35f   : > { %v10941_v61 = vpop.f32.mrb[51].mxu0  ;;  %8267 = vmatmul.mubr.msk.bf16.vlgmr.msra.gmra.mrb[16].mxu1 %vm2872_vm11, %v7550_v40  ;;  %v5957_v40 = vrot.slane %v5955_v28, 5  ;;  %v6003_v28 = vshll.u32 %v10697_v5, 16  ;;  %v6032_v5 = vshrl.u32 %v5794_v8, 16 }
 0x360   : > { %8299 = vmatpush3.bf16.msra.mxu1 %v10725_v50  ;;  %8270 = vmatprep.mubr.msk.bf16.mxu1 %vm2872_vm11, %v7551_v2  ;;  %v5976_v50 = vor.u32 %v5975_v30, %v10939_v47  ;;  %v6021_v2 = vshrl.u32 %v10701_v17, 16  ;;  %v6010_v17 = vrot.slane %v6008_v19, 4  ;;  %v6001_v19 = vrot.slane %v6000_v49, 4 }
 0x361   : > { %v5958_v18 = vsel %vm8896_vm4, %v5953_v53, %v5957_v40  ;;  %v5797_v53 = vld [vmem:[#allocation2 + $0x90] sm:$0xf]  ;;  %v6065_v40 = vshll.u32 %v10727_v58, 16  ;;  %v6005_v55 = vrot.slane %v6003_v28, 5  ;;  %v6037_v58 = vrot.slane %v6035_v15, 5 }
 0x362   : > { %v7554_v21 = vcombine.low %v5948_v45, %v5958_v18  ;;  %v5977_v12 = vrot.slane %v5976_v50, 4  ;;  %v6023_v1 = vrot.slane %v6021_v2, 4  ;;  %v6056_v38 = vshrl.u32 %v5797_v53, 16 }
 0x363   : > { %v6059_v16 = vshll.u32 %v5797_v53, 16  ;;  %v6014_v18 = vor.u32 %v6013_v37, %v6010_v17  ;;  %v6034_v2 = vrot.slane %v6032_v5, 4  ;;  %v11000_v28 = vrot.slane %v6065_v40, 5 }
 0x364   : > { %v10966_v33 = vpop.f32.mrb[52].mxu0  ;;  %v5982_v50 = vsel %vm8896_vm4, %v5977_v12, %v5981_v22  ;;  %v6024_v63 = vor.u32 %v6023_v1, %v10980_v20  ;;  %v6058_v45 = vrot.slane %v6056_v38, 4  ;;  %v6071_v22 = vrot.slane %v6069_v29, 4 }
 0x365   : > { %v10968_v41 = vpop.f32.mrb[53].mxu0  ;;  %v6061_v39 = vrot.slane %v6059_v16, 5  ;;  %v7555_v43 = vcombine.low %v5972_v11, %v5982_v50  ;;  %v6015_v17 = vrot.slane %v6014_v18, 4  ;;  %v5996_v37 = vsel %vm8896_vm4, %v5991_v27, %v10962_v23  ;;  %v5803_v11 = vld [vmem:[#allocation2 + $0xa8] sm:$0xf] }
 0x366   : > { %v10974_v46 = vpop.f32.mrb[54].mxu0  ;;  %v6006_v53 = vsel %vm8896_vm4, %v6001_v19, %v6005_v55  ;;  %v6025_v12 = vrot.slane %v6024_v63, 4  ;;  %v6038_v49 = vor.u32 %v6037_v58, %v6034_v2  ;;  %v6080_v5 = vshrl.u32 %v5800_v51, 16 }
 0x367   : > { %v10976_v30 = vpop.f32.mrb[55].mxu0  ;;  %8271 = vmatmul.mubr.msk.bf16.gmra.mrb[20].mxu1 %vm2872_vm11, %v7552_v44  ;;  %v10996_v44 = vrot.slane %v6041_v52, 5  ;;  %v6083_v15 = vshll.u32 %v5800_v51, 16  ;;  %v6029_v52 = vrot.slane %v6027_v26, 5  ;;  %v6062_v38 = vor.u32 %v6061_v39, %v6058_v45 }
 0x368   : > { %8274 = vmatprep.mubr.msk.bf16.mxu1 %vm2872_vm11, %v7553_v6  ;;  %v6047_v6 = vrot.slane %v6045_v10, 4  ;;  %v6051_v10 = vshll.u32 %v10719_v62, 16  ;;  %v7556_v16 = vcombine.low %v5996_v37, %v6006_v53  ;;  %v6020_v23 = vsel %vm8896_vm4, %v6015_v17, %v10980_v20 }
 0x369   : > { %v6089_v40 = vshll.u32 %v10744_v7, 16  ;;  %v6093_v29 = vshrl.u32 %v10744_v7, 16  ;;  %v6030_v27 = vsel %vm8896_vm4, %v6025_v12, %v6029_v52  ;;  %v6075_v55 = vshll.u32 %v10729_v56, 16  ;;  %v5806_v12 = vld [vmem:[#allocation2 + $0xb4] sm:$0xf] }
 0x36a   : > { %v6048_v1 = vor.u32 %v6047_v6, %v10996_v44  ;;  %v6113_v62 = vshll.u32 %v10749_v0, 16  ;;  %v6117_v18 = vshrl.u32 %v10749_v0, 16  ;;  %v6039_v19 = vrot.slane %v6038_v49, 4 }
 0x36b   : > { %v6082_v26 = vrot.slane %v6080_v5, 4  ;;  %v6085_v20 = vrot.slane %v6083_v15, 5  ;;  %v6063_v2 = vrot.slane %v6062_v38, 4  ;;  %v6104_v58 = vshrl.u32 %v5803_v11, 16 }
 0x36c   : > { %v10994_v59 = vpop.f32.mrb[56].mxu0  ;;  %v6049_v63 = vrot.slane %v6048_v1, 4  ;;  %v6107_v6 = vshll.u32 %v5803_v11, 16  ;;  %v7557_v39 = vcombine.low %v6020_v23, %v6030_v27  ;;  %v6053_v56 = vrot.slane %v6051_v10, 5 }
 0x36d   : > { %v10998_v47 = vpop.f32.mrb[57].mxu0  ;;  %v6077_v17 = vrot.slane %v6075_v55, 5  ;;  %v11037_v37 = vrot.slane %v6113_v62, 5  ;;  %v6119_v53 = vrot.slane %v6117_v18, 4  ;;  %v6044_v49 = vsel %vm8896_vm4, %v6039_v19, %v10996_v44 }
 0x36e   : > { %v11002_v8 = vpop.f32.mrb[58].mxu0  ;;  %v6054_v1 = vsel %vm8896_vm4, %v6049_v63, %v6053_v56  ;;  %v6086_v5 = vor.u32 %v6085_v20, %v6082_v26  ;;  %v6099_v15 = vshll.u32 %v10761_v54, 16  ;;  %v6068_v52 = vsel %vm8896_vm4, %v6063_v2, %v11000_v28 }
 0x36f   : > { %v11004_v13 = vpop.f32.mrb[59].mxu0  ;;  %8275 = vmatmul.mubr.msk.bf16.gmra.mrb[24].mxu1 %vm2872_vm11, %v7554_v21  ;;  %v6072_v21 = vor.u32 %v6071_v22, %v11000_v28  ;;  %v11032_v22 = vrot.slane %v6089_v40, 5  ;;  %v6106_v38 = vrot.slane %v6104_v58, 4  ;;  %v6128_v23 = vshrl.u32 %v5806_v12, 16  ;;  %v5812_v58 = vld [vmem:[#allocation2 + $0xcc] sm:$0xf] }
 0x370   : > { %8278 = vmatprep.mubr.msk.bf16.mxu1 %vm2872_vm11, %v7555_v43  ;;  %v6095_v43 = vrot.slane %v6093_v29, 4  ;;  %v6137_v44 = vshll.u32 %v10779_v9, 16  ;;  %v6141_v40 = vshrl.u32 %v10779_v9, 16  ;;  %v5809_v29 = vld [vmem:[#allocation2 + $0xc0] sm:$0xf]  ;;  %v6120_v11 = vor.u32 %v6119_v53, %v11037_v37 }
 0x371   : > { %v6073_v7 = vrot.slane %v6072_v21, 4  ;;  %v6109_v21 = vrot.slane %v6107_v6, 5  ;;  %v6131_v54 = vshll.u32 %v5806_v12, 16  ;;  %v6161_v27 = vshll.u32 %v10782_v3, 16 }
 0x372   : > { %v6165_v28 = vshrl.u32 %v10782_v3, 16  ;;  %v7558_v62 = vcombine.low %v6044_v49, %v6054_v1  ;;  %v6087_v19 = vrot.slane %v6086_v5, 4  ;;  %v6101_v63 = vrot.slane %v6099_v15, 5 }
 0x373   : > { %v6078_v10 = vsel %vm8896_vm4, %v6073_v7, %v6077_v17  ;;  %v6110_v20 = vor.u32 %v6109_v21, %v6106_v38  ;;  %v6123_v2 = vshll.u32 %v10763_v60, 16  ;;  %v6152_v9 = vshrl.u32 %v5809_v29, 16 }
 0x374   : > { %v11026_v50 = vpop.f32.mrb[60].mxu0  ;;  %v7559_v18 = vcombine.low %v6068_v52, %v6078_v10  ;;  %v6155_v7 = vshll.u32 %v5809_v29, 16  ;;  %v6130_v56 = vrot.slane %v6128_v23, 4  ;;  %v6143_v3 = vrot.slane %v6141_v40, 4 }
 0x375   : > { %v11028_v51 = vpop.f32.mrb[61].mxu0  ;;  %v6121_v53 = vrot.slane %v6120_v11, 4  ;;  %v6133_v12 = vrot.slane %v6131_v54, 5  ;;  %v6163_v49 = vrot.slane %v6161_v27, 5  ;;  %v6167_v1 = vrot.slane %v6165_v28, 4 }
 0x376   : > { %v11030_v45 = vpop.f32.mrb[62].mxu0  ;;  %v6176_v60 = vshrl.u32 %v5812_v58, 16  ;;  %v6179_v5 = vshll.u32 %v5812_v58, 16  ;;  %v6185_v15 = vshll.u32 %v10885_v25, 16  ;;  %v6189_v52 = vshrl.u32 %v10885_v25, 16 }
 0x377   : > { %v11034_v0 = vpop.f32.mrb[63].mxu0  ;;  %8279 = vmatmul.mubr.msk.bf16.gmra.mrb[28].mxu1 %vm2872_vm11, %v7556_v16  ;;  %v6096_v16 = vor.u32 %v6095_v43, %v11032_v22  ;;  %v6139_v43 = vrot.slane %v6137_v44, 5  ;;  %v6111_v10 = vrot.slane %v6110_v20, 4  ;;  %v6125_v38 = vrot.slane %v6123_v2, 5 }
 0x378   : > { %8282 = vmatprep.mubr.msk.bf16.mxu1 %vm2872_vm11, %v7557_v39  ;;  %v6154_v21 = vrot.slane %v6152_v9, 4  ;;  %v6092_v23 = vsel %vm8896_vm4, %v6087_v19, %v11032_v22  ;;  %v6134_v11 = vor.u32 %v6133_v12, %v6130_v56  ;;  %v6147_v54 = vshll.u32 %v10793_v35, 16 }
 0x379   : > { %v6097_v39 = vrot.slane %v6096_v16, 4  ;;  %v6157_v16 = vrot.slane %v6155_v7, 5  ;;  %v6144_v40 = vor.u32 %v6143_v3, %v6139_v43  ;;  %v6126_v29 = vsel %vm8896_vm4, %v6121_v53, %v6125_v38 }
 0x37a   : > { %v6168_v27 = vor.u32 %v6167_v1, %v6163_v49  ;;  %v6178_v28 = vrot.slane %v6176_v60, 4  ;;  %v6191_v20 = vrot.slane %v6189_v52, 4  ;;  %v6116_v19 = vsel %vm8896_vm4, %v6111_v10, %v11037_v37 }
 0x37b   : > { %v6102_v44 = vsel %vm8896_vm4, %v6097_v39, %v6101_v63  ;;  %v6158_v63 = vor.u32 %v6157_v16, %v6154_v21  ;;  %v6171_v9 = vshll.u32 %v10808_v36, 16  ;;  %v7561_v35 = vcombine.low %v6116_v19, %v6126_v29 }
 0x37c   : > { %v11057_v55 = vpop.f32.mrb[32].mxu0  ;;  %v7560_v22 = vcombine.low %v6092_v23, %v6102_v44  ;;  %v6145_v58 = vrot.slane %v6144_v40, 4  ;;  %v6149_v56 = vrot.slane %v6147_v54, 5  ;;  %v6169_v3 = vrot.slane %v6168_v27, 4 }
 0x37d   : > { %v11059_v26 = vpop.f32.mrb[33].mxu0  ;;  %v6135_v53 = vrot.slane %v6134_v11, 4  ;;  %v6195_v37 = vshll.u32 %v10887_v24, 16  ;;  %v6159_v60 = vrot.slane %v6158_v63, 4  ;;  %v11490_v63 = vld [vmem:[#allocation12_spill] sm:$0xff] }
 0x37e   : > { %v11062_v6 = vpop.f32.mrb[34].mxu0  ;;  %v6150_v36 = vsel %vm8896_vm4, %v6145_v58, %v6149_v56  ;;  %v11495_v56 = vld [vmem:[#allocation14_spill] sm:$0xff] }
 0x37f   : > { %v11064_v17 = vpop.f32.mrb[35].mxu0  ;;  %8283 = vmatmul.mubr.msk.bf16.gmra.mrb[0].mxu1 %vm2872_vm11, %v7558_v62  ;;  %v6181_v62 = vrot.slane %v6179_v5, 5  ;;  %v6173_v5 = vrot.slane %v6171_v9, 5  ;;  %v6140_v10 = vsel %vm8896_vm4, %v6135_v53, %v6139_v43  ;;  %v6197_v16 = vrot.slane %v6195_v37, 5  ;;  %v11492_v9 = vld [vmem:[#allocation15_spill] sm:$0xff] }
 0x380   : > { %8286 = vmatprep.mubr.msk.bf16.mxu1 %vm2872_vm11, %v7559_v18  ;;  %v6187_v18 = vrot.slane %v6185_v15, 5  ;;  %v7562_v44 = vcombine.low %v6140_v10, %v6150_v36  ;;  %v6164_v24 = vsel %vm8896_vm4, %v6159_v60, %v6163_v49  ;;  %v11501_v37 = vld [vmem:[#allocation11_spill] sm:$0xff]  ;;  %v11504_v36 = vld [vmem:[#allocation8_spill] sm:$0xff] }
 0x381   : > { %v6182_v12 = vor.u32 %v6181_v62, %v6178_v28  ;;  %v6174_v15 = vsel %vm8896_vm4, %v6169_v3, %v6173_v5  ;;  %v11496_v3 = vld [vmem:[#allocation5_spill] sm:$0xff]  ;;  %v11502_v60 = vld [vmem:[#allocation7_spill] sm:$0xff] }
 0x382   : > { %v6192_v1 = vor.u32 %v6191_v20, %v6187_v18  ;;  %v7563_v29 = vcombine.low %v6164_v24, %v6174_v15  ;;  %v11497_v53 = vcombine.low %v11495_v56, %v11496_v3  ;;  %v11503_v5 = vcombine.low %v11501_v37, %v11502_v60  ;;  %v11505_v15 = vld [vmem:[#allocation4_spill] sm:$0xff]  ;;  %v11511_v24 = vld [vmem:[#allocation19_spill] sm:$0xff] }
 0x383   : > { %v6183_v38 = vrot.slane %v6182_v12, 4  ;;  %v11498_v12 = vld [vmem:[#allocation6_spill] sm:$0xff]  ;;  %v11506_v10 = vcombine.low %v11504_v36, %v11505_v15  ;;  %v11525_v3 = vld [vmem:[#allocation28_spill] sm:$0xff] }
 0x384   : > { %v11078_v25 = vpop.f32.mrb[36].mxu0  ;;  %v6193_v21 = vrot.slane %v6192_v1, 4 }
 0x385   : > { %v11080_v2 = vpop.f32.mrb[37].mxu0  ;;  %v6188_v43 = vsel %vm8896_vm4, %v6183_v38, %v6187_v18  ;;  %v11489_v18 = vld [vmem:[#allocation10_spill] sm:$0xff]  ;;  %v11507_v38 = vld [vmem:[#allocation16_spill] sm:$0xff] }
 0x386   : > { %v11086_v7 = vpop.f32.mrb[38].mxu0  ;;  %v6198_v54 = vsel %vm8896_vm4, %v6193_v21, %v6197_v16  ;;  %v11491_v31 = vcombine.low %v11489_v18, %v11490_v63  ;;  %v11508_v21 = vld [vmem:[#allocation17_spill] sm:$0xff]  ;;  %v11519_v63 = vld [vmem:[#allocation24_spill] sm:$0xff] }
 0x387   : > { %v11088_v39 = vpop.f32.mrb[39].mxu0  ;;  %8287 = vmatmul.mubr.msk.bf16.gmra.mrb[4].mxu1 %vm2872_vm11, %v7560_v22  ;;  %v7564_v27 = vcombine.low %v6188_v43, %v6198_v54  ;;  %v11487_v22 = vld [vmem:[#allocation9_spill] sm:$0xff]  ;;  %v11509_v16 = vcombine.low %v11507_v38, %v11508_v21  ;;  %v11513_v43 = vld [vmem:[#allocation20_spill] sm:$0xff] }
 0x388   : > { %8290 = vmatprep.mubr.msk.bf16.mxu1 %vm2872_vm11, %v7561_v35  ;;  %v11488_v19 = vcombine.low %v10599_v42, %v11487_v22  ;;  %v11493_v35 = vld [vmem:[#allocation13_spill] sm:$0xff]  ;;  %v11499_v42 = vld [vmem:[#allocation3_spill] sm:$0xff]  ;;  %v11516_v22 = vld [vmem:[#allocation22_spill] sm:$0xff] }
 0x389   : > { %v11494_v58 = vcombine.low %v11492_v9, %v11493_v35  ;;  %v11500_v1 = vcombine.low %v11498_v12, %v11499_v42  ;;  %v11514_v54 = vld [vmem:[#allocation21_spill] sm:$0xff]  ;;  %v11522_v35 = vld [vmem:[#allocation26_spill] sm:$0xff] }
 0x38a   : > { %v11528_v42 = vld [vmem:[#allocation30_spill] sm:$0xff] }
 0x38c   : > { %v11097_v52 = vpop.f32.mrb[40].mxu0 }
 0x38d   : > { %v11101_v23 = vpop.f32.mrb[41].mxu0 }
 0x38e   : > { %v11105_v40 = vpop.f32.mrb[42].mxu0 }
 0x38f   : > { %v11107_v11 = vpop.f32.mrb[43].mxu0  ;;  %8291 = vmatmul.mubr.msk.bf16.gmra.mrb[8].mxu1 %vm2872_vm11, %v7562_v44  ;;  %v11510_v44 = vld [vmem:[#allocation18_spill] sm:$0xff] }
 0x390   : > { %8294 = vmatprep.mubr.msk.bf16.mxu1 %vm2872_vm11, %v7563_v29  ;;  %v11512_v29 = vcombine.low %v11510_v44, %v11511_v24 }
 0x394   : > { %v11115_v28 = vpop.f32.mrb[44].mxu0 }
 0x395   : > { %v11117_v62 = vpop.f32.mrb[45].mxu0 }
 0x396   : > { %v11119_v49 = vpop.f32.mrb[46].mxu0 }
 0x397   : > { %v11121_v20 = vpop.f32.mrb[47].mxu0  ;;  %8295 = vmatmul.mubr.msk.bf16.gmra.mrb[12].mxu1 %vm2872_vm11, %v7564_v27  ;;  %v11515_v27 = vcombine.low %v11513_v43, %v11514_v54 }
 0x398   : > { %8300 = vmatprep.mubr.msk.bf16.mxu1 %vm2872_vm11, %v11488_v19  ;;  %v11517_v19 = vld [vmem:[#allocation23_spill] sm:$0xff] }
 0x399   : > { %v11518_v18 = vcombine.low %v11516_v22, %v11517_v19 }
 0x39f   : > { %8301 = vmatmul.mubr.msk.bf16.vlgmr.msra.gmra.mrb[16].mxu1 %vm2872_vm11, %v11491_v31  ;;  %v11520_v31 = vld [vmem:[#allocation25_spill] sm:$0xff] }
 0x3a0   : > { %8304 = vmatprep.mubr.msk.bf16.mxu1 %vm2872_vm11, %v11494_v58  ;;  %v11521_v9 = vcombine.low %v11519_v63, %v11520_v31  ;;  %v11523_v58 = vld [vmem:[#allocation27_spill] sm:$0xff] }
 0x3a1   : > { %v11524_v56 = vcombine.low %v11522_v35, %v11523_v58 }
 0x3a7   : > { %8305 = vmatmul.mubr.msk.bf16.gmra.mrb[20].mxu1 %vm2872_vm11, %v11497_v53  ;;  %v11526_v53 = vld [vmem:[#allocation29_spill] sm:$0xff] }
 0x3a8   : > { %8308 = vmatprep.mubr.msk.bf16.mxu1 %vm2872_vm11, %v11500_v1  ;;  %v11527_v12 = vcombine.low %v11525_v3, %v11526_v53  ;;  %v11529_v1 = vld [vmem:[#allocation31_spill] sm:$0xff] }
 0x3a9   : > { %v11530_v37 = vcombine.low %v11528_v42, %v11529_v1 }
 0x3af   : > { %8309 = vmatmul.mubr.msk.bf16.gmra.mrb[24].mxu1 %vm2872_vm11, %v11503_v5  ;;  %v11191_v5 = vld [vmem:[%s11334_s4] ss:$0 sm:$0xff] }
 0x3b0   : > { %8312 = vmatprep.mubr.msk.bf16.mxu1 %vm2872_vm11, %v11506_v10 }
 0x3b7   : > { %8313 = vmatmul.mubr.msk.bf16.gmra.mrb[28].mxu1 %vm2872_vm11, %v11509_v16 }
 0x3b8   : > { %8316 = vmatprep.mubr.msk.bf16.mxu1 %vm2872_vm11, %v11512_v29 }
 0x3bf   : > { %8317 = vmatmul.mubr.msk.bf16.gmra.mrb[0].mxu1 %vm2872_vm11, %v11515_v27 }
 0x3c0   : > { %8320 = vmatprep.mubr.msk.bf16.mxu1 %vm2872_vm11, %v11518_v18 }
 0x3c7   : > { %8321 = vmatmul.mubr.msk.bf16.gmra.mrb[4].mxu1 %vm2872_vm11, %v11521_v9 }
 0x3c8   : > { %8324 = vmatprep.mubr.msk.bf16.mxu1 %vm2872_vm11, %v11524_v56 }
 0x3cf   : > { %8325 = vmatmul.mubr.msk.bf16.gmra.mrb[8].mxu1 %vm2872_vm11, %v11527_v12 }
 0x3d0   : > { %8328 = vmatprep.mubr.msk.bf16.mxu1 %vm2872_vm11, %v11530_v37 }
 0x3d7   : > { %8329 = vmatmul.mubr.msk.bf16.gmra.mrb[12].mxu1 %vm2872_vm11, %v7615_v14 }
 0x472   : > { %v8302_v60 = vpop.f32.mrb[16].mxu1 }
 0x473   : > { %v8334_v36 = vadd.f32 %v8302_v60, %v11057_v55  ;;  %v6812_v15 = vpop.f32.mrb[17].mxu1 }
 0x474   : > { %v8335_v10 = vadd.f32 %v6812_v15, %v11059_v26  ;;  %v8303_v38 = vpop.f32.mrb[18].mxu1 }
 0x475   : > { %v6980_v21 = vadd.f32 %v8334_v36, %v11191_v5  ;;  %v8336_v16 = vadd.f32 %v8303_v38, %v11062_v6  ;;  %v6815_v32 = vpop.f32.mrb[19].mxu1 }
 0x476   : > { %v6978_v57 = vadd.f32 %v8335_v10, %v11191_v5  ;;  %v8337_v14 = vadd.f32 %v6815_v32, %v11064_v17 }
 0x477   : > { %v7012_v55 = vmax.f32 %v6980_v21, 0.0  ;;  %v6981_v26 = vadd.f32 %v8336_v16, %v11191_v5 }
 0x478   : > { %v7010_v44 = vmax.f32 %v6978_v57, 0.0  ;;  %v6979_v6 = vadd.f32 %v8337_v14, %v11191_v5 }
 0x479   : > { %7045 = vst.msk [vmem:[%s11201_s15 + $0x10] sm:$0xff] %vm7042_vm2, %v7012_v55  ;;  %v7013_v24 = vmax.f32 %v6981_v26, 0.0 }
 0x47a   : > { %7043 = vst.msk [vmem:[%s11201_s15] sm:$0xff] %vm7042_vm2, %v7010_v44  ;;  %v7011_v29 = vmax.f32 %v6979_v6, 0.0  ;;  %v8306_v43 = vpop.f32.mrb[20].mxu1 }
 0x47b   : > { %7046 = vst.msk [vmem:[%s11201_s15 + $0x18] sm:$0xff] %vm7042_vm2, %v7013_v24  ;;  %v8338_v54 = vadd.f32 %v8306_v43, %v11078_v25  ;;  %v6828_v17 = vpop.f32.mrb[21].mxu1 }
 0x47c   : > { %7044 = vst.msk [vmem:[%s11201_s15 + $0x8] sm:$0xff] %vm7042_vm2, %v7011_v29  ;;  %v8339_v27 = vadd.f32 %v6828_v17, %v11080_v2  ;;  %v8307_v22 = vpop.f32.mrb[22].mxu1 }
 0x47d   : > { %v6984_v19 = vadd.f32 %v8338_v54, %v11191_v5  ;;  %v8340_v18 = vadd.f32 %v8307_v22, %v11086_v7  ;;  %v6831_v63 = vpop.f32.mrb[23].mxu1 }
 0x47e   : > { %v6982_v31 = vadd.f32 %v8339_v27, %v11191_v5  ;;  %v8341_v9 = vadd.f32 %v6831_v63, %v11088_v39 }
 0x47f   : > { %v7016_v35 = vmax.f32 %v6984_v19, 0.0  ;;  %v6985_v25 = vadd.f32 %v8340_v18, %v11191_v5 }
 0x480   : > { %v7014_v58 = vmax.f32 %v6982_v31, 0.0  ;;  %v6983_v56 = vadd.f32 %v8341_v9, %v11191_v5 }
 0x481   : > { %7049 = vst.msk [vmem:[%s11201_s15 + $0x30] sm:$0xff] %vm7042_vm2, %v7016_v35  ;;  %v7017_v2 = vmax.f32 %v6985_v25, 0.0 }
 0x482   : > { %7047 = vst.msk [vmem:[%s11201_s15 + $0x20] sm:$0xff] %vm7042_vm2, %v7014_v58  ;;  %v7015_v3 = vmax.f32 %v6983_v56, 0.0  ;;  %v8310_v53 = vpop.f32.mrb[24].mxu1 }
 0x483   : > { %7050 = vst.msk [vmem:[%s11201_s15 + $0x38] sm:$0xff] %vm7042_vm2, %v7017_v2  ;;  %v8342_v7 = vadd.f32 %v8310_v53, %v11097_v52  ;;  %v6844_v39 = vpop.f32.mrb[25].mxu1 }
 0x484   : > { %7048 = vst.msk [vmem:[%s11201_s15 + $0x28] sm:$0xff] %vm7042_vm2, %v7015_v3  ;;  %v8343_v12 = vadd.f32 %v6844_v39, %v11101_v23  ;;  %v8311_v42 = vpop.f32.mrb[26].mxu1 }
 0x485   : > { %v6988_v1 = vadd.f32 %v8342_v7, %v11191_v5  ;;  %v8344_v37 = vadd.f32 %v8311_v42, %v11105_v40  ;;  %v6847_v60 = vpop.f32.mrb[27].mxu1 }
 0x486   : > { %v6986_v36 = vadd.f32 %v8343_v12, %v11191_v5  ;;  %v8345_v15 = vadd.f32 %v6847_v60, %v11107_v11 }
 0x487   : > { %v7020_v10 = vmax.f32 %v6988_v1, 0.0  ;;  %v6989_v52 = vadd.f32 %v8344_v37, %v11191_v5 }
 0x488   : > { %v7018_v38 = vmax.f32 %v6986_v36, 0.0  ;;  %v6987_v21 = vadd.f32 %v8345_v15, %v11191_v5 }
 0x489   : > { %7053 = vst.msk [vmem:[%s11201_s15 + $0x50] sm:$0xff] %vm7042_vm2, %v7020_v10  ;;  %v7021_v23 = vmax.f32 %v6989_v52, 0.0 }
 0x48a   : > { %7051 = vst.msk [vmem:[%s11201_s15 + $0x40] sm:$0xff] %vm7042_vm2, %v7018_v38  ;;  %v7019_v16 = vmax.f32 %v6987_v21, 0.0  ;;  %v8314_v32 = vpop.f32.mrb[28].mxu1 }
 0x48b   : > { %7054 = vst.msk [vmem:[%s11201_s15 + $0x58] sm:$0xff] %vm7042_vm2, %v7021_v23  ;;  %v8346_v40 = vadd.f32 %v8314_v32, %v11115_v28  ;;  %v6860_v11 = vpop.f32.mrb[29].mxu1 }
 0x48c   : > { %7052 = vst.msk [vmem:[%s11201_s15 + $0x48] sm:$0xff] %vm7042_vm2, %v7019_v16  ;;  %v8347_v57 = vadd.f32 %v6860_v11, %v11117_v62  ;;  %v8315_v14 = vpop.f32.mrb[30].mxu1 }
 0x48d   : > { %v6992_v55 = vadd.f32 %v8346_v40, %v11191_v5  ;;  %v8348_v26 = vadd.f32 %v8315_v14, %v11119_v49  ;;  %v6863_v44 = vpop.f32.mrb[31].mxu1 }
 0x48e   : > { %v6990_v6 = vadd.f32 %v8347_v57, %v11191_v5  ;;  %v8349_v24 = vadd.f32 %v6863_v44, %v11121_v20 }
 0x48f   : > { %v7024_v29 = vmax.f32 %v6992_v55, 0.0  ;;  %v6993_v28 = vadd.f32 %v8348_v26, %v11191_v5 }
 0x490   : > { %v7022_v43 = vmax.f32 %v6990_v6, 0.0  ;;  %v6991_v54 = vadd.f32 %v8349_v24, %v11191_v5 }
 0x491   : > { %7057 = vst.msk [vmem:[%s11201_s15 + $0x70] sm:$0xff] %vm7042_vm2, %v7024_v29  ;;  %v7025_v62 = vmax.f32 %v6993_v28, 0.0 }
 0x492   : > { %7055 = vst.msk [vmem:[%s11201_s15 + $0x60] sm:$0xff] %vm7042_vm2, %v7022_v43  ;;  %v7023_v17 = vmax.f32 %v6991_v54, 0.0  ;;  %v8318_v27 = vpop.f32.mrb[0].mxu1 }
 0x493   : > { %7058 = vst.msk [vmem:[%s11201_s15 + $0x78] sm:$0xff] %vm7042_vm2, %v7025_v62  ;;  %v8350_v49 = vadd.f32 %v8318_v27, %v10932_v48  ;;  %v6876_v20 = vpop.f32.mrb[1].mxu1 }
 0x494   : > { %7056 = vst.msk [vmem:[%s11201_s15 + $0x68] sm:$0xff] %vm7042_vm2, %v7023_v17  ;;  %v8351_v22 = vadd.f32 %v6876_v20, %v10935_v4  ;;  %v8319_v19 = vpop.f32.mrb[2].mxu1 }
 0x495   : > { %v6996_v18 = vadd.f32 %v8350_v49, %v11191_v5  ;;  %v8352_v63 = vadd.f32 %v8319_v19, %v10937_v34  ;;  %v6879_v31 = vpop.f32.mrb[3].mxu1 }
 0x496   : > { %v6994_v9 = vadd.f32 %v8351_v22, %v11191_v5  ;;  %v8353_v35 = vadd.f32 %v6879_v31, %v10941_v61 }
 0x497   : > { %v7028_v25 = vmax.f32 %v6996_v18, 0.0  ;;  %v6997_v48 = vadd.f32 %v8352_v63, %v11191_v5 }
 0x498   : > { %v7026_v58 = vmax.f32 %v6994_v9, 0.0  ;;  %v6995_v56 = vadd.f32 %v8353_v35, %v11191_v5 }
 0x499   : > { %7061 = vst.msk [vmem:[%s11201_s15 + $0x90] sm:$0xff] %vm7042_vm2, %v7028_v25  ;;  %v7029_v4 = vmax.f32 %v6997_v48, 0.0 }
 0x49a   : > { %7059 = vst.msk [vmem:[%s11201_s15 + $0x80] sm:$0xff] %vm7042_vm2, %v7026_v58  ;;  %v7027_v2 = vmax.f32 %v6995_v56, 0.0  ;;  %v8322_v3 = vpop.f32.mrb[4].mxu1 }
 0x49b   : > { %7062 = vst.msk [vmem:[%s11201_s15 + $0x98] sm:$0xff] %vm7042_vm2, %v7029_v4  ;;  %v8354_v34 = vadd.f32 %v8322_v3, %v10966_v33  ;;  %v6892_v61 = vpop.f32.mrb[5].mxu1 }
 0x49c   : > { %7060 = vst.msk [vmem:[%s11201_s15 + $0x88] sm:$0xff] %vm7042_vm2, %v7027_v2  ;;  %v8355_v53 = vadd.f32 %v6892_v61, %v10968_v41  ;;  %v8323_v7 = vpop.f32.mrb[6].mxu1 }
 0x49d   : > { %v7000_v39 = vadd.f32 %v8354_v34, %v11191_v5  ;;  %v8356_v12 = vadd.f32 %v8323_v7, %v10974_v46  ;;  %v6895_v42 = vpop.f32.mrb[7].mxu1 }
 0x49e   : > { %v6998_v1 = vadd.f32 %v8355_v53, %v11191_v5  ;;  %v8357_v37 = vadd.f32 %v6895_v42, %v10976_v30 }
 0x49f   : > { %v7032_v60 = vmax.f32 %v7000_v39, 0.0  ;;  %v7001_v33 = vadd.f32 %v8356_v12, %v11191_v5 }
 0x4a0   : > { %v7030_v36 = vmax.f32 %v6998_v1, 0.0  ;;  %v6999_v15 = vadd.f32 %v8357_v37, %v11191_v5 }
 0x4a1   : > { %7065 = vst.msk [vmem:[%s11201_s15 + $0xb0] sm:$0xff] %vm7042_vm2, %v7032_v60  ;;  %v7033_v41 = vmax.f32 %v7001_v33, 0.0 }
 0x4a2   : > { %7063 = vst.msk [vmem:[%s11201_s15 + $0xa0] sm:$0xff] %vm7042_vm2, %v7030_v36  ;;  %v7031_v10 = vmax.f32 %v6999_v15, 0.0  ;;  %v8326_v52 = vpop.f32.mrb[8].mxu1 }
 0x4a3   : > { %7066 = vst.msk [vmem:[%s11201_s15 + $0xb8] sm:$0xff] %vm7042_vm2, %v7033_v41  ;;  %v8358_v46 = vadd.f32 %v8326_v52, %v10994_v59  ;;  %v6908_v30 = vpop.f32.mrb[9].mxu1 }
 0x4a4   : > { %7064 = vst.msk [vmem:[%s11201_s15 + $0xa8] sm:$0xff] %vm7042_vm2, %v7031_v10  ;;  %v8359_v38 = vadd.f32 %v6908_v30, %v10998_v47  ;;  %v8327_v21 = vpop.f32.mrb[10].mxu1 }
 0x4a5   : > { %v7004_v23 = vadd.f32 %v8358_v46, %v11191_v5  ;;  %v8360_v16 = vadd.f32 %v8327_v21, %v11002_v8  ;;  %v6911_v32 = vpop.f32.mrb[11].mxu1 }
 0x4a6   : > { %v7002_v40 = vadd.f32 %v8359_v38, %v11191_v5  ;;  %v8361_v11 = vadd.f32 %v6911_v32, %v11004_v13 }
 0x4a7   : > { %v7036_v57 = vmax.f32 %v7004_v23, 0.0  ;;  %v7005_v59 = vadd.f32 %v8360_v16, %v11191_v5 }
 0x4a8   : > { %v7034_v14 = vmax.f32 %v7002_v40, 0.0  ;;  %v7003_v55 = vadd.f32 %v8361_v11, %v11191_v5 }
 0x4a9   : > { %7069 = vst.msk [vmem:[%s11201_s15 + $0xd0] sm:$0xff] %vm7042_vm2, %v7036_v57  ;;  %v7037_v47 = vmax.f32 %v7005_v59, 0.0 }
 0x4aa   : > { %7067 = vst.msk [vmem:[%s11201_s15 + $0xc0] sm:$0xff] %vm7042_vm2, %v7034_v14  ;;  %v7035_v26 = vmax.f32 %v7003_v55, 0.0  ;;  %v8330_v44 = vpop.f32.mrb[12].mxu1 }
 0x4ab   : > { %7070 = vst.msk [vmem:[%s11201_s15 + $0xd8] sm:$0xff] %vm7042_vm2, %v7037_v47  ;;  %v8362_v8 = vadd.f32 %v8330_v44, %v11026_v50  ;;  %v6924_v13 = vpop.f32.mrb[13].mxu1 }
 0x4ac   : > { %7068 = vst.msk [vmem:[%s11201_s15 + $0xc8] sm:$0xff] %vm7042_vm2, %v7035_v26  ;;  %v8363_v6 = vadd.f32 %v6924_v13, %v11028_v51  ;;  %v8331_v24 = vpop.f32.mrb[14].mxu1 }
 0x4ad   : > { %v7008_v29 = vadd.f32 %v8362_v8, %v11191_v5  ;;  %v8364_v28 = vadd.f32 %v8331_v24, %v11030_v45  ;;  %v6927_v43 = vpop.f32.mrb[15].mxu1 }
 0x4ae   : > { %v7006_v54 = vadd.f32 %v8363_v6, %v11191_v5  ;;  %v8365_v62 = vadd.f32 %v6927_v43, %v11034_v0 }
 0x4af   : > { %v7040_v17 = vmax.f32 %v7008_v29, 0.0  ;;  %v7009_v50 = vadd.f32 %v8364_v28, %v11191_v5 }
 0x4b0   : > { %v7038_v27 = vmax.f32 %v7006_v54, 0.0  ;;  %v7007_v49 = vadd.f32 %v8365_v62, %v11191_v5 }
 0x4b1   : > { %7073 = vst.msk [vmem:[%s11201_s15 + $0xf0] sm:$0xff] %vm7042_vm2, %v7040_v17  ;;  %v7041_v51 = vmax.f32 %v7009_v50, 0.0 }
 0x4b2   : > { %7071 = vst.msk [vmem:[%s11201_s15 + $0xe0] sm:$0xff] %vm7042_vm2, %v7038_v27  ;;  %v7039_v20 = vmax.f32 %v7007_v49, 0.0 }
 0x4b3   : > { %7074 = vst.msk [vmem:[%s11201_s15 + $0xf8] sm:$0xff] %vm7042_vm2, %v7041_v51 }
 0x4b4   : > { %7072 = vst.msk [vmem:[%s11201_s15 + $0xe8] sm:$0xff] %vm7042_vm2, %v7039_v20 }
 0x4b5 PF: > { %s15_s18 = sadd.s32 1, %s8803_s18  }
 0x4b6   : > { %p12_p4 = scmp.ge.s32.totalorder %s15_s18, 4  }
 0x4b8   :  { %14 = sbr.rel (!%p12_p4) target bundleno = 1 (0x1), region = 84 }

</bundles_post_ra>
